<compile_context>
chip_gen: v7x
topology: tpu7x:2x2x1
jax: 0.10.0
libtpu: 0.0.40
codegen_flags: <defaults>
</compile_context>

<pallas_src>
import jax
import jax.numpy as jnp
from jax.experimental import pallas as pl
from jax.experimental.pallas import tpu as pltpu


def _round_up(x, m):
    return ((x + m - 1) // m) * m


def _cnn_kernel(x_ref, w1_ref, b1_ref, w2_ref, b2_ref, wl_ref, bl_ref, o_ref):
    """One batch tile (BT elements, living on the lane axis) per grid step."""
    H, K = w1_ref.shape
    L, BT = x_ref.shape
    M = o_ref.shape[0]            # == matrix_size == L - 2*(K-1)
    L1 = L - K + 1                # length after conv1

    xT = x_ref[...]               # (L, BT): sequence on sublanes, batch on lanes

    # ---- Conv1d(1 -> H, K) + ReLU, vectorized over hidden channels & batch ----
    # h[c, j, b] = sum_s w1[c, s] * x[b, j + s]
    # NOTE: the sublane-axis slices xT[s:s+L1] are unaligned for s >= 1; at
    # K=3, L=20 this is negligible.  For scaled K/L, reformulate as
    # im2col + MXU matmul (or pltpu.roll + mask).
    h = w1_ref[:, 0:1][:, :, None] * xT[0:L1, :][None, :, :]
    for s in range(1, K):
        h = h + w1_ref[:, s:s + 1][:, :, None] * xT[s:s + L1, :][None, :, :]
    h = jnp.maximum(h + b1_ref[...][:, :, None], 0.0)        # (H, L1, BT)

    # ---- Conv1d(H -> 1, K) + ReLU ----
    # y[l, b] = sum_t sum_c w2[c, t] * h[c, l + t, b]
    acc = w2_ref[:, 0:1][:, :, None] * h[:, 0:M, :]
    for t in range(1, K):
        acc = acc + w2_ref[:, t:t + 1][:, :, None] * h[:, t:t + M, :]
    # Channel reduction over the OUTER axis -> elementwise VPU adds (no XLU).
    y = jnp.sum(acc, axis=0)                                  # (M, BT)
    y = jnp.maximum(y + b2_ref[...], 0.0)

    # ---- Linear(M -> M): out^T = Wl @ y^T + bl  (single batched MXU matmul,
    #      weight used as-is, no in-kernel transpose) ----
    out = jnp.dot(wl_ref[...], y, preferred_element_type=jnp.float32)
    o_ref[...] = (out + bl_ref[...]).astype(o_ref.dtype)      # (M, BT) lane-dense


def custom_cnn_forward(x, params, *, kernel_size, batch_tile=256):
    """x: (B, 1, L) float32 -> (B, 1, M) float32."""
    B, C, L = x.shape
    assert C == 1, "CustomCNN expects a single input channel"
    w1, b1, w2, b2, wl, bl = params
    H, K = w1.shape
    assert K == kernel_size
    M = wl.shape[0]
    assert L - 2 * (K - 1) == M, "input length must equal matrix_size + 2*(K-1)"

    LANE = 128
    BT = min(_round_up(batch_tile, LANE), _round_up(B, LANE))
    B_pad = _round_up(B, BT)
    n_steps = B_pad // BT

    # Transposed, lane-dense data layout: batch on the lane (last) axis.
    xT = x[:, 0, :].T                                          # (L, B)
    if B_pad != B:
        xT = jnp.pad(xT, ((0, 0), (0, B_pad - B)))             # zero-pad batch

    b1v = b1.reshape(H, 1)
    b2v = b2.reshape(1, 1)
    blv = bl.reshape(M, 1)

    L1 = L - K + 1
    flops = 2 * B_pad * (H * K * L1 + H * K * M + M * M)
    bytes_accessed = 4 * (L * B_pad + 2 * H * K + H + 1 + M * M + M + M * B_pad)
    cost = pl.CostEstimate(flops=flops, transcendentals=0,
                           bytes_accessed=bytes_accessed)

    outT = pl.pallas_call(
        _cnn_kernel,
        out_shape=jax.ShapeDtypeStruct((M, B_pad), jnp.float32),
        grid_spec=pltpu.PrefetchScalarGridSpec(
            num_scalar_prefetch=0,
            grid=(n_steps,),
            in_specs=[
                pl.BlockSpec((L, BT), lambda i: (0, i)),   # x (transposed)
                pl.BlockSpec((H, K), lambda i: (0, 0)),    # conv1 weight
                pl.BlockSpec((H, 1), lambda i: (0, 0)),    # conv1 bias
                pl.BlockSpec((H, K), lambda i: (0, 0)),    # conv2 weight
                pl.BlockSpec((1, 1), lambda i: (0, 0)),    # conv2 bias
                # TODO(synk): if matrix_size is scaled far past VMEM limits
                # (v7x: 64 MiB physical), tile this (M, M) weight over an
                # extra grid axis instead of keeping it fully resident.
                pl.BlockSpec((M, M), lambda i: (0, 0)),    # linear weight
                pl.BlockSpec((M, 1), lambda i: (0, 0)),    # linear bias
            ],
            out_specs=pl.BlockSpec((M, BT), lambda i: (0, i)),
        ),
        compiler_params=pltpu.CompilerParams(
            dimension_semantics=("parallel",)),
        cost_estimate=cost,
    )(xT, w1, b1v, w2, b2v, wl, blv)

    # Back to PyTorch's (B, 1, M) convention; drop padded batch rows.
    return outT[:, :B].T.reshape(B, 1, M)


def reference_forward(x, params, *, kernel_size):
    """Pure-JAX reference of the PyTorch forward (for validation)."""
    w1, b1, w2, b2, wl, bl = params
    K = kernel_size
    B, _, L = x.shape
    H = w1.shape[0]
    L1, L2 = L - K + 1, L - 2 * (K - 1)

    xv = x[:, 0, :]                                   # (B, L)
    # conv1
    h = jnp.zeros((B, H, L1), jnp.float32)
    for t in range(K):
        h = h + xv[:, None, t:t + L1] * w1[None, :, t:t + 1]
    h = jax.nn.relu(h + b1[None, :, :])
    # conv2
    y = jnp.zeros((B, 1, L2), jnp.float32)
    for t in range(K):
        y = y + jnp.sum(h[:, :, t:t + L2] * w2[None, :, t:t + 1],
                        axis=1, keepdims=True)
    y = jax.nn.relu(y + b2[None, :, :])
    # linear on last dim: y @ W.T + b
    out = jnp.einsum("bcl,ml->bcm", y, wl) + bl[None, :, :]
    return out


def init_params(key, hidden_size, kernel_size, matrix_size):
    """Deterministic parameter init (uniform, PyTorch-like fan-in scaling)."""
    k1, k2, k3, k4, k5, k6 = jax.random.split(key, 6)
    H, K, M = hidden_size, kernel_size, matrix_size

    def u(k, shape, fan_in):
        bound = 1.0 / jnp.sqrt(fan_in)
        return jax.random.uniform(k, shape, jnp.float32, -bound, bound)

    w1 = u(k1, (H, K), 1 * K)        # Conv1d(1, H, K) weight
    b1 = u(k2, (H, 1), 1 * K)
    w2 = u(k3, (H, K), H * K)        # Conv1d(H, 1, K) weight (in=H, K)
    b2 = u(k4, (1, 1), H * K)
    wl = u(k5, (M, M), M)            # Linear(M, M) weight (out, in)
    bl = u(k6, (1, M), M)
    return (w1, b1, w2, b2, wl, bl)


if __name__ == "__main__":
    # modelparam: hidden_size=32, kernel_size=3, matrix_size=16
    HIDDEN, KSIZE, MSIZE = 32, 3, 16
    SEQ = MSIZE + 2 * (KSIZE - 1)    # 20, so the Linear input size matches

    key = jax.random.PRNGKey(0)
    kx, kp, kx2 = jax.random.split(key, 3)
    params = init_params(kp, HIDDEN, KSIZE, MSIZE)

    # Small-shape run (batch=2) — single padded batch tile.
    x = jax.random.normal(kx, (2, 1, SEQ), dtype=jnp.float32)
    out = jax.block_until_ready(custom_cnn_forward(x, params, kernel_size=KSIZE))
    ref = reference_forward(x, params, kernel_size=KSIZE)
    assert out.shape == (2, 1, MSIZE)
    assert jnp.allclose(out, ref, atol=1e-5, rtol=1e-5), "mismatch vs reference (B=2)"

    # Larger batch exercises multi-step grid + batch padding/masking path.
    x2 = jax.random.normal(kx2, (300, 1, SEQ), dtype=jnp.float32)
    out2 = jax.block_until_ready(custom_cnn_forward(x2, params, kernel_size=KSIZE))
    ref2 = reference_forward(x2, params, kernel_size=KSIZE)
    assert out2.shape == (300, 1, MSIZE)
    assert jnp.allclose(out2, ref2, atol=1e-5, rtol=1e-5), "mismatch vs reference (B=300)"

    print("KERNEL_OK")
</pallas_src>

<mosaic_0001>
module attributes {stable_mosaic.version = 11 : i64} {
  func.func @_cnn_kernel(%arg0: i32, %arg1: memref<20x128xf32, #tpu.memory_space<vmem>>, %arg2: memref<32x3xf32, #tpu.memory_space<vmem>>, %arg3: memref<32x1xf32, #tpu.memory_space<vmem>>, %arg4: memref<32x3xf32, #tpu.memory_space<vmem>>, %arg5: memref<1x1xf32, #tpu.memory_space<vmem>>, %arg6: memref<16x16xf32, #tpu.memory_space<vmem>>, %arg7: memref<16x1xf32, #tpu.memory_space<vmem>>, %arg8: memref<16x128xf32, #tpu.memory_space<vmem>>) attributes {dimension_semantics = [#tpu.dimension_semantics<parallel>], iteration_bounds = array<i64: 1>, scalar_prefetch = 0 : i64, scratch_operands = 0 : i64, tpu.core_type = #tpu.core_type<tc>, window_params = [{transform_indices = @transform_0, window_bounds = array<i64: 20, 128>}, {pipeline_mode = #tpu.pipeline_mode<synchronous>, transform_indices = @transform_1, window_bounds = array<i64: 32, 3>}, {pipeline_mode = #tpu.pipeline_mode<synchronous>, transform_indices = @transform_2, window_bounds = array<i64: 32, 1>}, {pipeline_mode = #tpu.pipeline_mode<synchronous>, transform_indices = @transform_3, window_bounds = array<i64: 32, 3>}, {pipeline_mode = #tpu.pipeline_mode<synchronous>, transform_indices = @transform_4, window_bounds = array<i64: 1, 1>}, {pipeline_mode = #tpu.pipeline_mode<synchronous>, transform_indices = @transform_5, window_bounds = array<i64: 16, 16>}, {pipeline_mode = #tpu.pipeline_mode<synchronous>, transform_indices = @transform_6, window_bounds = array<i64: 16, 1>}, {transform_indices = @transform_7, window_bounds = array<i64: 16, 128>}]} {
    %c0 = arith.constant 0 : index
    %c0_0 = arith.constant 0 : index
    %0 = vector.load %arg1[%c0, %c0_0] : memref<20x128xf32, #tpu.memory_space<vmem>>, vector<20x128xf32>
    %c0_1 = arith.constant 0 : index
    %c0_2 = arith.constant 0 : index
    %1 = vector.load %arg2[%c0_1, %c0_2] : memref<32x3xf32, #tpu.memory_space<vmem>>, vector<32x1xf32>
    %2 = vector.shape_cast %1 : vector<32x1xf32> to vector<32x1x1xf32>
    %3 = vector.extract_strided_slice %0 {offsets = [0, 0], sizes = [18, 128], strides = [1, 1]} : vector<20x128xf32> to vector<18x128xf32>
    %4 = vector.shape_cast %3 : vector<18x128xf32> to vector<1x18x128xf32>
    %5 = vector.broadcast %2 : vector<32x1x1xf32> to vector<32x18x128xf32>
    %6 = vector.broadcast %4 : vector<1x18x128xf32> to vector<32x18x128xf32>
    %7 = arith.mulf %5, %6 : vector<32x18x128xf32>
    %c0_3 = arith.constant 0 : index
    %c1 = arith.constant 1 : index
    %8 = vector.load %arg2[%c0_3, %c1] : memref<32x3xf32, #tpu.memory_space<vmem>>, vector<32x1xf32>
    %9 = vector.shape_cast %8 : vector<32x1xf32> to vector<32x1x1xf32>
    %10 = vector.extract_strided_slice %0 {offsets = [1, 0], sizes = [18, 128], strides = [1, 1]} : vector<20x128xf32> to vector<18x128xf32>
    %11 = vector.shape_cast %10 : vector<18x128xf32> to vector<1x18x128xf32>
    %12 = vector.broadcast %9 : vector<32x1x1xf32> to vector<32x18x128xf32>
    %13 = vector.broadcast %11 : vector<1x18x128xf32> to vector<32x18x128xf32>
    %14 = arith.mulf %12, %13 : vector<32x18x128xf32>
    %15 = arith.addf %7, %14 : vector<32x18x128xf32>
    %c0_4 = arith.constant 0 : index
    %c2 = arith.constant 2 : index
    %16 = vector.load %arg2[%c0_4, %c2] : memref<32x3xf32, #tpu.memory_space<vmem>>, vector<32x1xf32>
    %17 = vector.shape_cast %16 : vector<32x1xf32> to vector<32x1x1xf32>
    %18 = vector.extract_strided_slice %0 {offsets = [2, 0], sizes = [18, 128], strides = [1, 1]} : vector<20x128xf32> to vector<18x128xf32>
    %19 = vector.shape_cast %18 : vector<18x128xf32> to vector<1x18x128xf32>
    %20 = vector.broadcast %17 : vector<32x1x1xf32> to vector<32x18x128xf32>
    %21 = vector.broadcast %19 : vector<1x18x128xf32> to vector<32x18x128xf32>
    %22 = arith.mulf %20, %21 : vector<32x18x128xf32>
    %23 = arith.addf %15, %22 : vector<32x18x128xf32>
    %c0_5 = arith.constant 0 : index
    %c0_6 = arith.constant 0 : index
    %24 = vector.load %arg3[%c0_5, %c0_6] : memref<32x1xf32, #tpu.memory_space<vmem>>, vector<32x1xf32>
    %25 = vector.shape_cast %24 : vector<32x1xf32> to vector<32x1x1xf32>
    %26 = vector.broadcast %25 : vector<32x1x1xf32> to vector<32x18x128xf32>
    %27 = arith.addf %23, %26 : vector<32x18x128xf32>
    %cst = arith.constant 0.000000e+00 : f32
    %28 = vector.broadcast %cst : f32 to vector<32x18x128xf32>
    %29 = arith.maximumf %27, %28 : vector<32x18x128xf32>
    %c0_7 = arith.constant 0 : index
    %c0_8 = arith.constant 0 : index
    %30 = vector.load %arg4[%c0_7, %c0_8] : memref<32x3xf32, #tpu.memory_space<vmem>>, vector<32x1xf32>
    %31 = vector.shape_cast %30 : vector<32x1xf32> to vector<32x1x1xf32>
    %32 = vector.extract_strided_slice %29 {offsets = [0, 0, 0], sizes = [32, 16, 128], strides = [1, 1, 1]} : vector<32x18x128xf32> to vector<32x16x128xf32>
    %33 = vector.broadcast %31 : vector<32x1x1xf32> to vector<32x16x128xf32>
    %34 = arith.mulf %33, %32 : vector<32x16x128xf32>
    %c0_9 = arith.constant 0 : index
    %c1_10 = arith.constant 1 : index
    %35 = vector.load %arg4[%c0_9, %c1_10] : memref<32x3xf32, #tpu.memory_space<vmem>>, vector<32x1xf32>
    %36 = vector.shape_cast %35 : vector<32x1xf32> to vector<32x1x1xf32>
    %37 = vector.extract_strided_slice %29 {offsets = [0, 1, 0], sizes = [32, 16, 128], strides = [1, 1, 1]} : vector<32x18x128xf32> to vector<32x16x128xf32>
    %38 = vector.broadcast %36 : vector<32x1x1xf32> to vector<32x16x128xf32>
    %39 = arith.mulf %38, %37 : vector<32x16x128xf32>
    %40 = arith.addf %34, %39 : vector<32x16x128xf32>
    %c0_11 = arith.constant 0 : index
    %c2_12 = arith.constant 2 : index
    %41 = vector.load %arg4[%c0_11, %c2_12] : memref<32x3xf32, #tpu.memory_space<vmem>>, vector<32x1xf32>
    %42 = vector.shape_cast %41 : vector<32x1xf32> to vector<32x1x1xf32>
    %43 = vector.extract_strided_slice %29 {offsets = [0, 2, 0], sizes = [32, 16, 128], strides = [1, 1, 1]} : vector<32x18x128xf32> to vector<32x16x128xf32>
    %44 = vector.broadcast %42 : vector<32x1x1xf32> to vector<32x16x128xf32>
    %45 = arith.mulf %44, %43 : vector<32x16x128xf32>
    %46 = arith.addf %40, %45 : vector<32x16x128xf32>
    %cst_13 = arith.constant dense<0.000000e+00> : vector<16x128xf32>
    %47 = vector.multi_reduction <add>, %46, %cst_13 [0] : vector<32x16x128xf32> to vector<16x128xf32>
    %c0_14 = arith.constant 0 : index
    %c0_15 = arith.constant 0 : index
    %48 = vector.load %arg5[%c0_14, %c0_15] : memref<1x1xf32, #tpu.memory_space<vmem>>, vector<1x1xf32>
    %49 = vector.broadcast %48 : vector<1x1xf32> to vector<16x128xf32>
    %50 = arith.addf %47, %49 : vector<16x128xf32>
    %cst_16 = arith.constant 0.000000e+00 : f32
    %51 = vector.broadcast %cst_16 : f32 to vector<16x128xf32>
    %52 = arith.maximumf %50, %51 : vector<16x128xf32>
    %c0_17 = arith.constant 0 : index
    %c0_18 = arith.constant 0 : index
    %53 = vector.load %arg6[%c0_17, %c0_18] : memref<16x16xf32, #tpu.memory_space<vmem>>, vector<16x16xf32>
    %cst_19 = arith.constant dense<0.000000e+00> : vector<16x128xf32>
    %54 = tpu.matmul %53, %52, %cst_19 {dimension_numbers = #tpu.dot_dimension_numbers<[1], [0], [0], [1], [0, 0, 1, 1], [], []>} : vector<16x16xf32>, vector<16x128xf32>, vector<16x128xf32> -> vector<16x128xf32>
    %c0_20 = arith.constant 0 : index
    %c0_21 = arith.constant 0 : index
    %55 = vector.load %arg7[%c0_20, %c0_21] : memref<16x1xf32, #tpu.memory_space<vmem>>, vector<16x1xf32>
    %56 = vector.broadcast %55 : vector<16x1xf32> to vector<16x128xf32>
    %57 = arith.addf %54, %56 : vector<16x128xf32>
    %c0_22 = arith.constant 0 : index
    %c0_23 = arith.constant 0 : index
    %58 = vector.load %arg8[%c0_22, %c0_23] : memref<16x128xf32, #tpu.memory_space<vmem>>, vector<16x128xf32>
    tpu.vector_store %arg8[%c0_22, %c0_23], %57 {strides = array<i32>} : memref<16x128xf32, #tpu.memory_space<vmem>>, vector<16x128xf32>,
    return
  }
  func.func @transform_0(%arg0: i32) -> (i32, i32) {
    %c0_i32 = arith.constant 0 : i32
    %c0_i32_0 = arith.constant 0 : i32
    return %c0_i32, %arg0 : i32, i32
  }
  func.func @transform_1(%arg0: i32) -> (i32, i32) {
    %c0_i32 = arith.constant 0 : i32
    %c0_i32_0 = arith.constant 0 : i32
    %c0_i32_1 = arith.constant 0 : i32
    return %c0_i32, %c0_i32_0 : i32, i32
  }
  func.func @transform_2(%arg0: i32) -> (i32, i32) {
    %c0_i32 = arith.constant 0 : i32
    %c0_i32_0 = arith.constant 0 : i32
    %c0_i32_1 = arith.constant 0 : i32
    return %c0_i32, %c0_i32_0 : i32, i32
  }
  func.func @transform_3(%arg0: i32) -> (i32, i32) {
    %c0_i32 = arith.constant 0 : i32
    %c0_i32_0 = arith.constant 0 : i32
    %c0_i32_1 = arith.constant 0 : i32
    return %c0_i32, %c0_i32_0 : i32, i32
  }
  func.func @transform_4(%arg0: i32) -> (i32, i32) {
    %c0_i32 = arith.constant 0 : i32
    %c0_i32_0 = arith.constant 0 : i32
    %c0_i32_1 = arith.constant 0 : i32
    return %c0_i32, %c0_i32_0 : i32, i32
  }
  func.func @transform_5(%arg0: i32) -> (i32, i32) {
    %c0_i32 = arith.constant 0 : i32
    %c0_i32_0 = arith.constant 0 : i32
    %c0_i32_1 = arith.constant 0 : i32
    return %c0_i32, %c0_i32_0 : i32, i32
  }
  func.func @transform_6(%arg0: i32) -> (i32, i32) {
    %c0_i32 = arith.constant 0 : i32
    %c0_i32_0 = arith.constant 0 : i32
    %c0_i32_1 = arith.constant 0 : i32
    return %c0_i32, %c0_i32_0 : i32, i32
  }
  func.func @transform_7(%arg0: i32) -> (i32, i32) {
    %c0_i32 = arith.constant 0 : i32
    %c0_i32_0 = arith.constant 0 : i32
    return %c0_i32, %arg0 : i32, i32
  }
}

</mosaic_0001>

<bundles_post_ra>
// kernel: tpu_custom_call.1
= control target key start
LH: loop header
LB: loop body
LE: loop exit
PB: predicated region body
PF: predicated region fallthrough
CT: control target
= control target key end

     0   :  { %s10972_s0 = inlined_call_operand.vmem [shape: f32[20,128], index: 0, kind: input, shape index: {}]   ;;  %s10973_s1 = inlined_call_operand.vmem [shape: f32[32,3], index: 1, kind: input, shape index: {}]   ;;  %s10974_s2 = inlined_call_operand.vmem [shape: f32[32,1], index: 2, kind: input, shape index: {}]   ;;  %s10975_s3 = inlined_call_operand.vmem [shape: f32[32,3], index: 3, kind: input, shape index: {}]   ;;  %s10976_s4 = inlined_call_operand.<no memory space> [shape: f32[1,1], index: 4, kind: input, shape index: {}]   ;;  %s10977_s5 = inlined_call_operand.vmem [shape: f32[16,16], index: 5, kind: input, shape index: {}]   ;;  %s10978_s6 = inlined_call_operand.vmem [shape: f32[16,1], index: 6, kind: input, shape index: {}]   ;;  %s10979_s7 = inlined_call_operand.hbm [shape: f32[16,128], index: 7, kind: output, shape index: {}]  }
   0x1   :  { %v12_v0 = vstv %s10976_s4 }
   0x2   :  { %13 = vst [vmem:[#allocation2] sm:$0x1] %v12_v0 }
   0x3   :  { %v44_v1 = vlaneseq  ;;  %v588_v2 = vld [vmem:[%s10973_s1] sm:$0xff]  ;;  %v10982_v3 = vmov 1   ;;  %v5973_v4 = vmov 1966171168   ;;  %v10984_v6 = vmov 0  }
   0x4   :  { %5870 = vset.pattern.permute.xlu0 %v10982_v3  ;;  %v42_v5 = vunpack.c.l.s4 %v5973_v4  ;;  %5869 = vset.pattern.permute.xlu1 %v10984_v6 }
   0x5   :  { %v45_v7 = vshrl.u32 %v44_v1, 7 }
   0x6   :  { %14 = vsyncpa [#allocation4], 0  ;;  %v43_v8 = vunpack.c.0.s8 %v42_v5  ;;  %v596_v9 = vcombine.high %v588_v2, %v588_v2  ;;  %v33_v10 = vld [vmem:[%s10973_s1 + $0x8] sm:$0xff]  ;;  %v590_v36 = vld [vmem:[%s10973_s1 + $0x10] sm:$0xff]  ;;  %vm1240_vm0 = vcmask 1046528   ;;  %vm2245_vm1 = vcmask 1045504  }
   0x7   :  { %v6032_v12 = vsub.s32 0, %v45_v7  ;;  %v645_v30 = vcombine.high %v33_v10, %v33_v10  ;;  %v694_v43 = vcombine.high %v590_v36, %v590_v36  ;;  %v591_v50 = vld [vmem:[%s10973_s1 + $0x18] sm:$0xff]  ;;  %vm5744_vm2 = vcmask 130048   ;;  %s5976_s12 = smov [#allocation3]  }
   0x8   :  { %v6030_v11 = vsub.s32 %v43_v8, %v45_v7  ;;  %v743_v57 = vcombine.high %v591_v50, %v591_v50  ;;  %s5833_s13 = sshll.u32 %s5976_s12, 4  ;;  %s5834_s13 = int_to_ptr.vmem [resolvable:$true] %s5833_s13 }
   0x9   :  { %s5948_s14 = scalar_lea.vmem %s5834_s13, 256  ;;  %p5953_p1 = scmp.lt.s32.totalorder %s5834_s13, %s5834_s13 }
   0xa   :  { %11282 = vst [vmem:[#allocation6_spill] sm:$0xff] %v6030_v11  ;;  %v603_v13 = vrot.slane %v588_v2, %v6030_v11  ;;  %v6036_v14 = vrot.slane %v596_v9, %v6030_v11  ;;  %v6039_v15 = vrot.slane %v33_v10, %v6030_v11  ;;  %v6077_v33 = vrot.slane %v645_v30, %v6030_v11  ;;  %v6162_v2 = vld [vmem:[%s10975_s3] sm:$0xff]  ;;  %p5949_p0 = scmp.ne.s32.totalorder %s5834_s13, %s5948_s14  ;;  %p5954_p2 = scmp.lt.s32.totalorder %s5948_s14, %s5948_s14 }
   0xb   :  { %v6093_v39 = vrot.slane %v590_v36, %v6030_v11  ;;  %v6109_v46 = vrot.slane %v694_v43, %v6030_v11  ;;  %v6128_v53 = vrot.slane %v591_v50, %v6030_v11  ;;  %v6144_v60 = vrot.slane %v743_v57, %v6030_v11 }
   0xc   :  { %v619_v16 = vrot.slane %v603_v13, %v6030_v11  ;;  %v611_v17 = vcombine.high %v603_v13, %v603_v13  ;;  %v612_v18 = vcombine.high %v6036_v14, %v6036_v14  ;;  %v104_v19 = vcombine.high %v6039_v15, %v6039_v15  ;;  %p5955_p3 = por %p5954_p2, %p5953_p1 }
   0xd   :  { %v661_v35 = vcombine.high %v6077_v33, %v6077_v33  ;;  %v709_v42 = vcombine.high %v6093_v39, %v6093_v39  ;;  %v710_v49 = vcombine.high %v6109_v46, %v6109_v46  ;;  %v758_v56 = vcombine.high %v6128_v53, %v6128_v53 }
   0xe   :  { %v6047_v20 = vrot.slane %v619_v16, %v6032_v12  ;;  %v641_v21 = vcombine.high %v619_v16, %v619_v16  ;;  %v640_v22 = vrot.slane %v612_v18, %v6030_v11  ;;  %v6051_v23 = vrot.slane %v611_v17, %v6030_v11  ;;  %p5956_p4 = pnand %p5955_p3, %p5949_p0 }
   0xf   :  { %v126_v27 = vrot.slane %v104_v19, %v6030_v11  ;;  %v689_v38 = vrot.slane %v661_v35, %v6030_v11  ;;  %v731_v45 = vrot.slane %v709_v42, %v6030_v11  ;;  %v738_v52 = vrot.slane %v710_v49, %v6030_v11 }
  0x10   :  { %921 = vperm.xlu0 %5870, %v6047_v20   ;;  %v6055_v24 = vrot.slane %v641_v21, %v6032_v12  ;;  %v6058_v25 = vrot.slane %v640_v22, %v6032_v12  ;;  %v643_v26 = vcombine.high %v6051_v23, %v6051_v23  ;;  %v644_v29 = vcombine.high %v640_v22, %v640_v22 }
  0x11   :  { %v6070_v31 = vrot.slane %v126_v27, %v6032_v12  ;;  %v692_v34 = vcombine.high %v126_v27, %v126_v27  ;;  %v6098_v40 = vrot.slane %v689_v38, %v6032_v12  ;;  %v693_v41 = vcombine.high %v689_v38, %v689_v38 }
  0x12   :  { %373 = vperm.xlu1 %5869, %v6055_v24   ;;  %v6066_v28 = vrot.slane %v643_v26, %v6032_v12  ;;  %v6074_v32 = vrot.slane %v644_v29, %v6032_v12  ;;  %v6114_v47 = vrot.slane %v731_v45, %v6032_v12  ;;  %v741_v48 = vcombine.high %v731_v45, %v731_v45 }
  0x13   :  { %v6089_v37 = vrot.slane %v692_v34, %v6032_v12  ;;  %v6105_v44 = vrot.slane %v693_v41, %v6032_v12  ;;  %v6133_v54 = vrot.slane %v738_v52, %v6032_v12  ;;  %v742_v55 = vcombine.high %v738_v52, %v738_v52 }
  0x14   :  { %941 = vperm.xlu0 %5870, %v6058_v25   ;;  %v6124_v51 = vrot.slane %v741_v48, %v6032_v12  ;;  %v780_v59 = vrot.slane %v758_v56, %v6030_v11  ;;  %v759_v63 = vcombine.high %v6144_v60, %v6144_v60  ;;  %v6171_v7 = vrot.slane %v6162_v2, %v6030_v11 }
  0x15   :  { %v6140_v58 = vrot.slane %v742_v55, %v6032_v12  ;;  %v6191_v13 = vrot.slane %v6051_v23, %v6032_v12  ;;  %v1631_v16 = vrot.slane %v6036_v14, %v6030_v11  ;;  %v10980_v17 = vmov 2  }
  0x16   :  { %385 = vperm.xlu1 %5869, %v6058_v25   ;;  %v6149_v61 = vrot.slane %v780_v59, %v6032_v12  ;;  %v790_v62 = vcombine.high %v780_v59, %v780_v59  ;;  %v787_v1 = vrot.slane %v759_v63, %v6030_v11  ;;  %v6180_v9 = vrot.slane %v6171_v7, %v6030_v11 }
  0x17   :  { %v6201_v18 = vrot.slane %v1631_v16, %v6032_v12  ;;  %v1647_v19 = vcombine.high %v1631_v16, %v1631_v16  ;;  %v1673_v14 = vrot.slane %v6039_v15, %v6030_v11  ;;  %v1680_v27 = vrot.slane %v6077_v33, %v6030_v11 }
  0x18   :  { %933 = vperm.xlu0 %5870, %v6066_v28   ;;  %v6156_v0 = vrot.slane %v790_v62, %v6032_v12  ;;  %v6167_v4 = vrot.slane %v787_v1, %v6032_v12  ;;  %v791_v5 = vcombine.high %v787_v1, %v787_v1  ;;  %v6186_v10 = vrot.slane %v6180_v9, %v6032_v12 }
  0x19   :  { %v6206_v21 = vrot.slane %v1647_v19, %v6032_v12  ;;  %v6213_v22 = vrot.slane %v1673_v14, %v6032_v12  ;;  %v1695_v23 = vcombine.high %v1673_v14, %v1673_v14  ;;  %v6225_v15 = vrot.slane %v1680_v27, %v6032_v12 }
  0x1a   :  { %401 = vperm.xlu1 %5869, %v6070_v31   ;;  %v6176_v8 = vrot.slane %v791_v5, %v6032_v12  ;;  %v1696_v29 = vcombine.high %v1680_v27, %v1680_v27  ;;  %v1722_v34 = vrot.slane %v6093_v39, %v6030_v11  ;;  %v1729_v38 = vrot.slane %v6109_v46, %v6030_v11 }
  0x1b   :  { %v6218_v26 = vrot.slane %v1695_v23, %v6032_v12  ;;  %v1771_v43 = vrot.slane %v6128_v53, %v6030_v11  ;;  %v1778_v49 = vrot.slane %v6144_v60, %v6030_v11  ;;  %v3797_v53 = vcombine.high %v6171_v7, %v6171_v7 }
  0x1c   :  { %949 = vperm.xlu0 %5870, %v6074_v32   ;;  %v6230_v30 = vrot.slane %v1696_v29, %v6032_v12  ;;  %v6237_v33 = vrot.slane %v1722_v34, %v6032_v12  ;;  %v1744_v35 = vcombine.high %v1722_v34, %v1722_v34  ;;  %v6249_v39 = vrot.slane %v1729_v38, %v6032_v12 }
  0x1d   :  { %v1745_v41 = vcombine.high %v1729_v38, %v1729_v38  ;;  %v6261_v45 = vrot.slane %v1771_v43, %v6032_v12  ;;  %v1793_v46 = vcombine.high %v1771_v43, %v1771_v43  ;;  %v6273_v50 = vrot.slane %v1778_v49, %v6032_v12  ;;  %v4715_v38 = vld [vmem:[%s10975_s3 + $0x8] sm:$0xff] }
  0x1e   :  { %377 = vperm.xlu1 %5869, %v6066_v28   ;;  %v6242_v36 = vrot.slane %v1744_v35, %v6032_v12  ;;  %11284 = vst [vmem:[#allocation8_spill] sm:$0xff] %v6249_v39  ;;  %v1794_v52 = vcombine.high %v1778_v49, %v1778_v49  ;;  %v3782_v56 = vcombine.high %v6162_v2, %v6162_v2 }
  0x1f   :  { %v6254_v42 = vrot.slane %v1745_v41, %v6032_v12  ;;  %11286 = vst [vmem:[#allocation10_spill] sm:$0xff] %v6261_v45  ;;  %v6266_v48 = vrot.slane %v1793_v46, %v6032_v12  ;;  %11288 = vst [vmem:[#allocation12_spill] sm:$0xff] %v6273_v50  ;;  %v3827_v57 = vcombine.high %v6180_v9, %v6180_v9 }
  0x20   :  { %957 = vperm.xlu0 %5870, %v6070_v31   ;;  %11283 = vst [vmem:[#allocation7_spill] sm:$0xff] %v6242_v36  ;;  %v6280_v55 = vrot.slane %v1794_v52, %v6032_v12  ;;  %v6289_v59 = vrot.slane %v3797_v53, %v6030_v11  ;;  %v4736_v2 = vrot.slane %v3782_v56, %v6030_v11 }
  0x21   :  { %11285 = vst [vmem:[#allocation9_spill] sm:$0xff] %v6254_v42  ;;  %11287 = vst [vmem:[#allocation11_spill] sm:$0xff] %v6266_v48  ;;  %v6298_v63 = vrot.slane %v3827_v57, %v6032_v12  ;;  %v4771_v49 = vcombine.high %v4715_v38, %v4715_v38  ;;  %v4778_v52 = vrot.slane %v4715_v38, %v6030_v11  ;;  %v4716_v38 = vld [vmem:[%s10975_s3 + $0x10] sm:$0xff] }
  0x22   :  { %393 = vperm.xlu1 %5869, %v6074_v32   ;;  %11289 = vst [vmem:[#allocation13_spill] sm:$0xff] %v6280_v55  ;;  %v4769_v1 = vcombine.high %v6289_v59, %v6289_v59  ;;  %v4738_v16 = vcombine.high %v4736_v2, %v4736_v2 }
  0x23   :  { %11290 = vst [vmem:[#allocation14_spill] sm:$0xff] %v6298_v63  ;;  %v6356_v57 = vrot.slane %v4778_v52, %v6030_v11 }
  0x24   :  { %965 = vperm.xlu0 %5870, %v6089_v37   ;;  %v6311_v9 = vrot.slane %v4769_v1, %v6032_v12  ;;  %v4766_v27 = vrot.slane %v4738_v16, %v6030_v11  ;;  %v4786_v1 = vcombine.high %v4778_v52, %v4778_v52 }
  0x25   :  { %11296 = vst [vmem:[#allocation20_spill] sm:$0xff] %v6356_v57  ;;  %v4953_v16 = vrot.slane %v6356_v57, %v6032_v12 }
  0x26   :  { %409 = vperm.xlu1 %5869, %v6089_v37   ;;  %11291 = vst [vmem:[#allocation15_spill] sm:$0xff] %v6311_v9  ;;  %v6331_v35 = vrot.slane %v4766_v27, %v6032_v12  ;;  %v4770_v46 = vcombine.high %v4766_v27, %v4766_v27  ;;  %v6368_v27 = vrot.slane %v4786_v1, %v6030_v11 }
  0x28   :  { %973 = vperm.xlu0 %5870, %v6098_v40   ;;  %11293 = vst [vmem:[#allocation17_spill] sm:$0xff] %v6331_v35  ;;  %11297 = vst [vmem:[#allocation21_spill] sm:$0xff] %v6368_v27  ;;  %v4957_v52 = vrot.slane %v6368_v27, %v6032_v12  ;;  %v2601_v27 = vld [vmem:[%s10974_s2 + $0x18] sm:$0xff] }
  0x2a   :  { %417 = vperm.xlu1 %5869, %v6098_v40  }
  0x2c   :  { %981 = vperm.xlu0 %5870, %v6105_v44  }
  0x2e   :  { %425 = vperm.xlu1 %5869, %v6105_v44  }
  0x30   :  { %989 = vperm.xlu0 %5870, %v6114_v47  }
  0x32   :  { %433 = vperm.xlu1 %5869, %v6114_v47  }
  0x34   :  { %997 = vperm.xlu0 %5870, %v6124_v51  }
  0x36   :  { %441 = vperm.xlu1 %5869, %v6124_v51  }
  0x38   :  { %1005 = vperm.xlu0 %5870, %v6133_v54  }
  0x3a   :  { %449 = vperm.xlu1 %5869, %v6133_v54  }
  0x3c   :  { %1013 = vperm.xlu0 %5870, %v6140_v58  }
  0x3e   :  { %457 = vperm.xlu1 %5869, %v6140_v58  }
  0x40   :  { %1021 = vperm.xlu0 %5870, %v6149_v61  }
  0x42   :  { %465 = vperm.xlu1 %5869, %v6149_v61  }
  0x44   :  { %1029 = vperm.xlu0 %5870, %v6156_v0  }
  0x46   :  { %473 = vperm.xlu1 %5869, %v6156_v0  }
  0x48   :  { %1037 = vperm.xlu0 %5870, %v6167_v4  }
  0x4a   :  { %481 = vperm.xlu1 %5869, %v6167_v4  }
  0x4c   :  { %1045 = vperm.xlu0 %5870, %v6176_v8  }
  0x4e   :  { %489 = vperm.xlu1 %5869, %v6176_v8  }
  0x50   :  { %4107 = vperm.xlu0 %5870, %v6186_v10  }
  0x52   :  { %5871 = vset.pattern.permute.xlu1 %v10982_v3  ;;  %v4827_v3 = vrot.slane %v4716_v38, %v6030_v11 }
  0x53   :  { %925 = vperm.xlu1 %5871, %v6191_v13  }
  0x54   :  { %5874 = vset.pattern.permute.xlu0 %v10980_v17 }
  0x55   :  { %1930 = vperm.xlu0 %5874, %v6191_v13  }
  0x57   :  { %929 = vperm.xlu1 %5871, %v6055_v24  }
  0x59   :  { %1942 = vperm.xlu0 %5874, %v6201_v18  }
  0x5b   :  { %937 = vperm.xlu1 %5871, %v6201_v18  }
  0x5d   :  { %1950 = vperm.xlu0 %5874, %v6206_v21  }
  0x5f   :  { %945 = vperm.xlu1 %5871, %v6206_v21  }
  0x61   :  { %1958 = vperm.xlu0 %5874, %v6213_v22  }
  0x63   :  { %953 = vperm.xlu1 %5871, %v6213_v22  }
  0x65   :  { %1966 = vperm.xlu0 %5874, %v6218_v26  }
  0x67   :  { %961 = vperm.xlu1 %5871, %v6218_v26  }
  0x69   :  { %1974 = vperm.xlu0 %5874, %v6225_v15  }
  0x6b   :  { %969 = vperm.xlu1 %5871, %v6225_v15  }
  0x6d   :  { %1982 = vperm.xlu0 %5874, %v6230_v30  }
  0x6f   :  { %977 = vperm.xlu1 %5871, %v6230_v30  }
  0x71   :  { %1990 = vperm.xlu0 %5874, %v6237_v33  }
  0x73   :  { %985 = vperm.xlu1 %5871, %v6237_v33  }
  0x75   :  { %1998 = vperm.xlu0 %5874, %v6242_v36  }
  0x77   :  { %993 = vperm.xlu1 %5871, %v6242_v36  }
  0x79   :  { %2006 = vperm.xlu0 %5874, %v6249_v39  }
  0x7b   :  { %1001 = vperm.xlu1 %5871, %v6249_v39  }
  0x7d   :  { %2014 = vperm.xlu0 %5874, %v6254_v42  }
  0x7f   :  { %1009 = vperm.xlu1 %5871, %v6254_v42   ;;  %v2600_v42 = vld [vmem:[%s10974_s2 + $0x10] sm:$0xff] }
  0x81   :  { %2022 = vperm.xlu0 %5874, %v6261_v45  }
  0x83   :  { %1017 = vperm.xlu1 %5871, %v6261_v45  }
  0x85   :  { %2030 = vperm.xlu0 %5874, %v6266_v48  }
  0x87   :  { %1025 = vperm.xlu1 %5871, %v6266_v48  }
  0x89   :  { %2038 = vperm.xlu0 %5874, %v6273_v50  }
  0x8b   :  { %1033 = vperm.xlu1 %5871, %v6273_v50  }
  0x8d   :  { %2046 = vperm.xlu0 %5874, %v6280_v55  }
  0x8f   :  { %v6291_v60 = vpop.permute.xlu0 %921  ;;  %1041 = vperm.xlu1 %5871, %v6280_v55  }
  0x91   :  { %5047 = vperm.xlu0 %5874, %v6186_v10   ;;  %v6295_v62 = vpop.permute.xlu1 %373  ;;  %v4752_v10 = vrot.slane %v4736_v2, %v6030_v11  ;;  %v4785_v2 = vrot.slane %v4771_v49, %v6030_v11 }
  0x93   :  { %v6303_v5 = vpop.permute.xlu0 %941  ;;  %5872 = vset.pattern.permute.xlu1 %v10980_v17  ;;  %v6321_v23 = vrot.slane %v4752_v10, %v6032_v12  ;;  %v6384_v1 = vrot.slane %v4785_v2, %v6030_v11 }
  0x94   :  { %1926 = vperm.xlu1 %5872, %v6047_v20  }
  0x95   :  { %5055 = vperm.xlu0 %5874, %v6298_v63   ;;  %v6308_v7 = vpop.permute.xlu1 %385  ;;  %11292 = vst [vmem:[#allocation16_spill] sm:$0xff] %v6321_v23  ;;  %11299 = vst [vmem:[#allocation23_spill] sm:$0xff] %v6384_v1 }
  0x97   :  { %v6314_v19 = vpop.permute.xlu0 %933 }
  0x98   :  { %1934 = vperm.xlu1 %5872, %v6055_v24   ;;  %v4768_v24 = vcombine.high %v4752_v10, %v4752_v10 }
  0x99   :  { %5059 = vperm.xlu0 %5874, %v6311_v9   ;;  %v6318_v14 = vpop.permute.xlu1 %401 }
  0x9b   :  { %v6324_v29 = vpop.permute.xlu0 %949 }
  0x9c   :  { %1938 = vperm.xlu1 %5872, %v6066_v28   ;;  %v6343_v28 = vrot.slane %v4768_v24, %v6032_v12  ;;  %v4787_v24 = vcombine.high %v4785_v2, %v4785_v2  ;;  %v6400_v2 = vrot.slane %v4827_v3, %v6030_v11 }
  0x9d   :  { %5063 = vperm.xlu0 %5874, %v6321_v23   ;;  %v6328_v34 = vpop.permute.xlu1 %377 }
  0x9e   :  { %11294 = vst [vmem:[#allocation18_spill] sm:$0xff] %v6343_v28  ;;  %v6381_v17 = vrot.slane %v4787_v24, %v6030_v11  ;;  %v4817_v24 = vcombine.high %v6384_v1, %v6384_v1  ;;  %11301 = vst [vmem:[#allocation25_spill] sm:$0xff] %v6400_v2 }
  0x9f   :  { %v6336_v41 = vpop.permute.xlu0 %957 }
  0xa0   :  { %1946 = vperm.xlu1 %5872, %v6058_v25   ;;  %v6353_v25 = vrot.slane %v4770_v46, %v6032_v12  ;;  %11298 = vst [vmem:[#allocation22_spill] sm:$0xff] %v6381_v17  ;;  %v4977_v1 = vrot.slane %v4817_v24, %v6032_v12 }
  0xa1   :  { %5067 = vperm.xlu0 %5874, %v6331_v35   ;;  %v6340_v43 = vpop.permute.xlu1 %393  ;;  %v4865_v35 = vcombine.high %v6400_v2, %v6400_v2 }
  0xa2   :  { %11295 = vst [vmem:[#allocation19_spill] sm:$0xff] %v6353_v25 }
  0xa3   :  { %v6346_v53 = vpop.permute.xlu0 %965  ;;  %v4993_v2 = vrot.slane %v4865_v35, %v6032_v12 }
  0xa4   :  { %1954 = vperm.xlu1 %5872, %v6074_v32  }
  0xa5   :  { %5071 = vperm.xlu0 %5874, %v6343_v28   ;;  %v6350_v56 = vpop.permute.xlu1 %409 }
  0xa7   :  { %v6359_v10 = vpop.permute.xlu0 %973 }
  0xa8   :  { %1962 = vperm.xlu1 %5872, %v6070_v31   ;;  %v4820_v31 = vcombine.high %v4716_v38, %v4716_v38  ;;  %v4835_v38 = vcombine.high %v4827_v3, %v4827_v3 }
  0xa9   :  { %5075 = vperm.xlu0 %5874, %v6353_v25   ;;  %v6363_v32 = vpop.permute.xlu1 %417  ;;  %v4973_v25 = vrot.slane %v6381_v17, %v6032_v12  ;;  %v2704_v17 = vcombine.high %v2600_v42, %v2600_v42 }
  0xaa   :  { %v6416_v3 = vrot.slane %v4835_v38, %v6030_v11 }
  0xab   :  { %v6373_v46 = vpop.permute.xlu0 %981 }
  0xac   :  { %1970 = vperm.xlu1 %5872, %v6089_v37   ;;  %v6391_v37 = vrot.slane %v4820_v31, %v6030_v11  ;;  %v2598_v31 = vld [vmem:[%s10974_s2] sm:$0xff]  ;;  %11303 = vst [vmem:[#allocation27_spill] sm:$0xff] %v6416_v3  ;;  %v4867_v9 = vcombine.high %v6416_v3, %v6416_v3 }
  0xad   :  { %5079 = vperm.xlu0 %5874, %v4953_v16   ;;  %v6376_v49 = vpop.permute.xlu1 %425  ;;  %v2613_v23 = vrot.slane %v2598_v31, %v6030_v11  ;;  %v2606_v63 = vcombine.high %v2598_v31, %v2598_v31 }
  0xae   :  { %11300 = vst [vmem:[#allocation24_spill] sm:$0xff] %v6391_v37  ;;  %v4997_v3 = vrot.slane %v4867_v9, %v6032_v12 }
  0xaf   :  { %v6387_v6 = vpop.permute.xlu0 %989  ;;  %v2621_v50 = vcombine.high %v2613_v23, %v2613_v23  ;;  %v6452_v35 = vrot.slane %v2613_v23, %v6030_v11  ;;  %v6458_v48 = vrot.slane %v2606_v63, %v6030_v11 }
  0xb0   :  { %1978 = vperm.xlu1 %5872, %v6098_v40   ;;  %v4836_v40 = vcombine.high %v6391_v37, %v6391_v37 }
  0xb1   :  { %5083 = vperm.xlu0 %5874, %v4957_v52   ;;  %v6393_v16 = vpop.permute.xlu1 %433  ;;  %11311 = vst [vmem:[#allocation35_spill] sm:$0xff] %v6452_v35  ;;  %v6472_v9 = vrot.slane %v2621_v50, %v6030_v11 }
  0xb3   :  { %v6402_v28 = vpop.permute.xlu0 %997 }
  0xb4   :  { %1986 = vperm.xlu1 %5872, %v6105_v44   ;;  %v6421_v44 = vld [vmem:[%s10975_s3 + $0x18] sm:$0xff] }
  0xb5   :  { %5099 = vperm.xlu0 %5874, %v4973_v25   ;;  %v6410_v52 = vpop.permute.xlu1 %441  ;;  %11304 = vst [vmem:[#allocation28_spill] sm:$0xff] %v6421_v44  ;;  %v6428_v25 = vrot.slane %v4836_v40, %v6030_v11  ;;  %v6432_v24 = vrot.slane %v6421_v44, %v6030_v11  ;;  %v6509_v44 = vrot.slane %v2600_v42, %v6030_v11 }
  0xb6   :  { %11302 = vst [vmem:[#allocation26_spill] sm:$0xff] %v6410_v52  ;;  %v6609_v52 = vld [vmem:[%s10972_s0 + $0x10] sm:$0xf] }
  0xb7   :  { %v6423_v37 = vpop.permute.xlu0 %1005  ;;  %11306 = vst [vmem:[#allocation30_spill] sm:$0xff] %v6428_v25  ;;  %11307 = vst [vmem:[#allocation31_spill] sm:$0xff] %v6432_v24  ;;  %v6449_v40 = vrot.slane %v6432_v24, %v6030_v11  ;;  %v2753_v24 = vcombine.high %v2601_v27, %v2601_v27 }
  0xb8   :  { %11305 = vst [vmem:[#allocation29_spill] sm:$0xff] %v6423_v37  ;;  %1994 = vperm.xlu1 %5872, %v6114_v47   ;;  %v2599_v47 = vld [vmem:[%s10974_s2 + $0x8] sm:$0xff]  ;;  %v6625_v37 = vmul.f32 %v6291_v60, %v6609_v52 }
  0xb9   :  { %5103 = vperm.xlu0 %5874, %v4977_v1   ;;  %v6434_v38 = vpop.permute.xlu1 %449  ;;  %v4868_v1 = vcombine.high %v6428_v25, %v6428_v25  ;;  %11310 = vst [vmem:[#allocation34_spill] sm:$0xff] %v6449_v40  ;;  %v2655_v45 = vcombine.high %v2599_v47, %v2599_v47  ;;  %v2651_v25 = vcombine.high %v6452_v35, %v6452_v35 }
  0xba   :  { %11308 = vst [vmem:[#allocation32_spill] sm:$0xff] %v6434_v38  ;;  %11330 = vst [vmem:[#allocation53_spill] sm:$0xff] %v6625_v37 }
  0xbb   :  { %v6439_v55 = vpop.permute.xlu0 %1013  ;;  %v5013_v63 = vrot.slane %v4868_v1, %v6032_v12  ;;  %v6492_v1 = vrot.slane %v2655_v45, %v6030_v11  ;;  %v6516_v57 = vrot.slane %v2651_v25, %v6032_v12 }
  0xbc   :  { %11309 = vst [vmem:[#allocation33_spill] sm:$0xff] %v6439_v55  ;;  %2002 = vperm.xlu1 %5872, %v6124_v51   ;;  %v6461_v51 = vrot.slane %v2599_v47, %v6030_v11  ;;  %v5017_v47 = vrot.slane %v6449_v40, %v6032_v12 }
  0xbd   :  { %5119 = vperm.xlu0 %5874, %v4993_v2   ;;  %v6454_v31 = vpop.permute.xlu1 %457 }
  0xbe   :  { %11312 = vst [vmem:[#allocation36_spill] sm:$0xff] %v6454_v31  ;;  %v6529_v31 = vrot.slane %v2704_v17, %v6030_v11 }
  0xbf   :  { %v6469_v2 = vpop.permute.xlu0 %1021 }
  0xc0   :  { %11313 = vst [vmem:[#allocation37_spill] sm:$0xff] %v6469_v2  ;;  %2010 = vperm.xlu1 %5872, %v6133_v54   ;;  %v6489_v54 = vrot.slane %v6458_v48, %v6030_v11  ;;  %v6562_v55 = vrot.slane %v6529_v31, %v6030_v11 }
  0xc1   :  { %5123 = vperm.xlu0 %5874, %v4997_v3   ;;  %v6483_v23 = vpop.permute.xlu1 %465  ;;  %v6500_v3 = vrot.slane %v6461_v51, %v6030_v11 }
  0xc2   :  { %11314 = vst [vmem:[#allocation38_spill] sm:$0xff] %v6483_v23  ;;  %v2652_v45 = vcombine.high %v6489_v54, %v6489_v54  ;;  %11322 = vst [vmem:[#allocation46_spill] sm:$0xff] %v6562_v55 }
  0xc3   :  { %v6502_v23 = vpop.permute.xlu0 %1029  ;;  %v2700_v40 = vcombine.high %v6500_v3, %v6500_v3 }
  0xc4   :  { %11315 = vst [vmem:[#allocation39_spill] sm:$0xff] %v6502_v23  ;;  %2018 = vperm.xlu1 %5872, %v6140_v58   ;;  %v6526_v23 = vrot.slane %v6492_v1, %v6030_v11  ;;  %v6532_v58 = vrot.slane %v2601_v27, %v6030_v11  ;;  %v6537_v2 = vrot.slane %v2652_v45, %v6032_v12 }
  0xc5   :  { %5139 = vperm.xlu0 %5874, %v5013_v63   ;;  %v6520_v50 = vpop.permute.xlu1 %473  ;;  %v6549_v17 = vrot.slane %v2700_v40, %v6032_v12  ;;  %v6552_v27 = vrot.slane %v2753_v24, %v6030_v11  ;;  %v2750_v63 = vcombine.high %v6562_v55, %v6562_v55 }
  0xc6   :  { %11316 = vst [vmem:[#allocation40_spill] sm:$0xff] %v6520_v50  ;;  %11317 = vst [vmem:[#allocation41_spill] sm:$0xff] %v6532_v58  ;;  %v2701_v42 = vcombine.high %v6526_v23, %v6526_v23  ;;  %v6545_v50 = vrot.slane %v6509_v44, %v6030_v11 }
  0xc7   :  { %v6534_v25 = vpop.permute.xlu0 %1037  ;;  %11320 = vst [vmem:[#allocation44_spill] sm:$0xff] %v6552_v27  ;;  %v6630_v36 = vrot.slane %v2750_v63, %v6032_v12 }
  0xc8   :  { %11318 = vst [vmem:[#allocation42_spill] sm:$0xff] %v6534_v25  ;;  %11319 = vst [vmem:[#allocation43_spill] sm:$0xff] %v6545_v50  ;;  %2026 = vperm.xlu1 %5872, %v6149_v61   ;;  %v2749_v25 = vcombine.high %v6545_v50, %v6545_v50  ;;  %v6566_v61 = vrot.slane %v6532_v58, %v6030_v11  ;;  %v6571_v24 = vrot.slane %v2701_v42, %v6032_v12  ;;  %v11327_v50 = vmov 0  }
  0xc9   :  { %5143 = vperm.xlu0 %5874, %v5017_v47   ;;  %v6554_v45 = vpop.permute.xlu1 %481  ;;  %v6587_v42 = vrot.slane %v6552_v27, %v6030_v11  ;;  %v6592_v47 = vld [vmem:[%s10972_s0 + $0x8] sm:$0xff]  ;;  %v2653_v27 = vcombine.high %v6472_v9, %v6472_v9  ;;  %11332 = vst [vmem:[#allocation55_spill] sm:$0xff] %v6630_v36 }
  0xca   :  { %11321 = vst [vmem:[#allocation45_spill] sm:$0xff] %v6554_v45  ;;  %11323 = vst [vmem:[#allocation47_spill] sm:$0xff] %v6566_v61  ;;  %v6580_v45 = vld [vmem:[%s10972_s0] sm:$0xff]  ;;  %v2798_v38 = vcombine.high %v6566_v61, %v6566_v61 }
  0xcb   :  { %v6568_v40 = vpop.permute.xlu0 %1045  ;;  %11325 = vst [vmem:[#allocation49_spill] sm:$0xff] %v6571_v24  ;;  %11326 = vst [vmem:[#allocation50_spill] sm:$0xff] %v6587_v42  ;;  %v6613_v24 = vmul.f32 %v6291_v60, %v6592_v47  ;;  %v6644_v63 = vrot.slane %v2653_v27, %v6032_v12 }
  0xcc   :  { %11324 = vst [vmem:[#allocation48_spill] sm:$0xff] %v6568_v40  ;;  %2034 = vperm.xlu1 %5872, %v6156_v0   ;;  %v6596_v40 = vmul.f32 %v6291_v60, %v6580_v45  ;;  %v6602_v0 = vrot.slane %v2749_v25, %v6032_v12  ;;  %v2622_v25 = vcombine.high %v6458_v48, %v6458_v48 }
  0xcd   :  { %5905 = vset.pattern.permute.xlu0 %v11327_v50  ;;  %v6599_v39 = vpop.permute.xlu1 %489  ;;  %v6636_v48 = vrot.slane %v2798_v38, %v6032_v12  ;;  %11334 = vst [vmem:[#allocation57_spill] sm:$0xff] %v6644_v63  ;;  %v1063_v38 = vmul.f32 %v6303_v5, %v6580_v45  ;;  %v6667_v63 = vmul.f32 %v6295_v62, %v6580_v45 }
  0xce   :  { %11328 = vst [vmem:[#allocation51_spill] sm:$0xff] %v6599_v39  ;;  %11329 = vst [vmem:[#allocation52_spill] sm:$0xff] %v6602_v0  ;;  %365 = vperm.xlu0 %5905, %v6047_v20   ;;  %v3250_v0 = vld [vmem:[%s10975_s3] sm:$0xff]  ;;  %v2799_v20 = vcombine.high %v6587_v42, %v6587_v42  ;;  %v6656_v39 = vmul.f32 %v6303_v5, %v6592_v47  ;;  %v6662_v27 = vrot.slane %v2622_v25, %v6030_v11 }
  0xcf   :  { %v6627_v58 = vpop.permute.xlu0 %4107  ;;  %11333 = vst [vmem:[#allocation56_spill] sm:$0xff] %v6636_v48  ;;  %v6649_v61 = vrot.slane %v3250_v0, %v6030_v11  ;;  %11338 = vst [vmem:[#allocation61_spill] sm:$0xff] %v6667_v63  ;;  %v6675_v42 = vmul.f32 %v6303_v5, %v6609_v52  ;;  %v1058_v25 = vmul.f32 %v6314_v19, %v6592_v47 }
  0xd0   :  { %11331 = vst [vmem:[#allocation54_spill] sm:$0xff] %v6627_v58  ;;  %2042 = vperm.xlu1 %5872, %v6167_v4   ;;  %11337 = vst [vmem:[#allocation60_spill] sm:$0xff] %v6662_v27  ;;  %v6671_v4 = vmul.f32 %v6295_v62, %v6592_v47  ;;  %v6683_v58 = vmul.f32 %v6314_v19, %v6609_v52  ;;  %v6692_v5 = vmul.f32 %v6295_v62, %v6609_v52 }
  0xd1   :  { %11335 = vst [vmem:[#allocation58_spill] sm:$0xff] %v6649_v61  ;;  %v6695_v63 = vrot.slane %v2799_v20, %v6032_v12  ;;  %v6699_v35 = vrot.slane %v6649_v61, %v6030_v11  ;;  %v6716_v48 = vmul.f32 %v6308_v7, %v6592_v47  ;;  %v6729_v62 = vmul.f32 %v6308_v7, %v6609_v52 }
  0xd2   :  { %369 = vperm.xlu0 %5905, %v6191_v13   ;;  %v6659_v60 = vpop.permute.xlu1 %925  ;;  %11339 = vst [vmem:[#allocation62_spill] sm:$0xff] %v6671_v4  ;;  %v1057_v13 = vmul.f32 %v6314_v19, %v6580_v45  ;;  %v2670_v4 = vcombine.high %v6461_v51, %v6461_v51  ;;  %11341 = vst [vmem:[#allocation64_spill] sm:$0xff] %v6692_v5  ;;  %v2654_v19 = vcombine.high %v6662_v27, %v6662_v27 }
  0xd3   :  { %11336 = vst [vmem:[#allocation59_spill] sm:$0xff] %v6659_v60  ;;  %11342 = vst [vmem:[#allocation65_spill] sm:$0xff] %v6695_v63  ;;  %v3258_v5 = vcombine.high %v3250_v0, %v3250_v0  ;;  %v6712_v63 = vmul.f32 %v6308_v7, %v6580_v45  ;;  %v6733_v20 = vmul.f32 %v6324_v29, %v6580_v45 }
  0xd4   :  { %v6685_v60 = vpop.permute.xlu0 %1930  ;;  %2050 = vperm.xlu1 %5872, %v6176_v8   ;;  %11343 = vst [vmem:[#allocation66_spill] sm:$0xff] %v6699_v35  ;;  %v1257_v8 = vrot.slane %v1058_v25, 1  ;;  %v6725_v0 = vrot.slane %v2670_v4, %v6030_v11  ;;  %v6745_v4 = vmul.f32 %v6324_v29, %v6592_v47  ;;  %v6749_v7 = vmul.f32 %v6324_v29, %v6609_v52 }
  0xd5   :  { %11340 = vst [vmem:[#allocation63_spill] sm:$0xff] %v6685_v60  ;;  %v1266_v60 = vrot.slane %v1063_v38, 1  ;;  %v3303_v38 = vcombine.high %v6699_v35, %v6699_v35  ;;  %v6764_v25 = vmul.f32 %v6318_v14, %v6580_v45  ;;  %v6768_v29 = vmul.f32 %v6318_v14, %v6592_v47 }
  0xd6   :  { %381 = vperm.xlu0 %5905, %v6201_v18   ;;  %v6705_v51 = vpop.permute.xlu1 %929  ;;  %v1256_v18 = vrot.slane %v1057_v13, 1  ;;  %11346 = vst [vmem:[#allocation69_spill] sm:$0xff] %v6725_v0  ;;  %v11347_v13 = vrot.slane %v6472_v9, %v6032_v12  ;;  %v6755_v9 = vrot.slane %v3258_v5, %v6030_v11 }
  0xd7   :  { %11344 = vst [vmem:[#allocation67_spill] sm:$0xff] %v6705_v51  ;;  %v6741_v51 = vrot.slane %v2654_v19, %v6032_v12  ;;  %v6775_v5 = vrot.slane %v3303_v38, %v6032_v12  ;;  %v6790_v38 = vmul.f32 %v6336_v41, %v6580_v45 }
  0xd8   :  { %v6721_v36 = vpop.permute.xlu0 %1942  ;;  %5873 = vset.pattern.permute.xlu1 %v11327_v50  ;;  %11350 = vst [vmem:[#allocation72_spill] sm:$0xff] %v6755_v9  ;;  %v1258_v35 = vsel %vm1240_vm0, %v1256_v18, %v1257_v8  ;;  %v2671_v18 = vcombine.high %v6492_v1, %v6492_v1  ;;  %v11361_v1 = vrot.slane %v6625_v37, 1  ;;  %v2719_v37 = vcombine.high %v6509_v44, %v6509_v44 }
  0xd9   :  { %11345 = vst [vmem:[#allocation68_spill] sm:$0xff] %v6721_v36  ;;  %2935 = vperm.xlu1 %5873, %v11347_v13   ;;  %11348 = vst [vmem:[#allocation70_spill] sm:$0xff] %v6741_v51  ;;  %v11351_v13 = vrot.slane %v6656_v39, 1  ;;  %v11358_v36 = vrot.slane %v6596_v40, 1  ;;  %v6906_v44 = vmul.f32 %v6359_v10, %v6592_v47 }
  0xda   :  { %389 = vperm.xlu0 %5905, %v6206_v21   ;;  %v6752_v50 = vpop.permute.xlu1 %937  ;;  %v6772_v21 = vmul.f32 %v6318_v14, %v6609_v52  ;;  %11352 = vst [vmem:[#allocation73_spill] sm:$0xff] %v6775_v5  ;;  %v6794_v5 = vmul.f32 %v6336_v41, %v6592_v47  ;;  %v501_v14 = vmul.f32 %v6328_v34, %v6580_v45 }
  0xdb   :  { %11349 = vst [vmem:[#allocation71_spill] sm:$0xff] %v6752_v50  ;;  %v6760_v19 = vsel %vm1240_vm0, %v1266_v60, %v11351_v13  ;;  %v2702_v13 = vcombine.high %v6725_v0, %v6725_v0  ;;  %v11354_v50 = vrot.slane %v6683_v58, 1  ;;  %v6798_v60 = vmul.f32 %v6336_v41, %v6609_v52 }
  0xdc   :  { %v6777_v51 = vpop.permute.xlu0 %1950  ;;  %v6815_v41 = vrot.slane %v6755_v9, %v6030_v11 }
  0xdd   :  { %11353 = vst [vmem:[#allocation74_spill] sm:$0xff] %v6777_v51  ;;  %v1260_v27 = vsel %vm1240_vm0, %v1257_v8, %v11354_v50  ;;  %2939 = vperm.xlu1 %5873, %v6516_v57   ;;  %v6804_v50 = vld [vmem:[%s10975_s3 + $0x8] sm:$0xff]  ;;  %v502_v57 = vmul.f32 %v6328_v34, %v6592_v47  ;;  %v503_v51 = vmul.f32 %v6328_v34, %v6609_v52  ;;  %v11357_v8 = vrot.slane %v6613_v24, 1 }
  0xde   :  { %397 = vperm.xlu0 %5905, %v6213_v22   ;;  %v6811_v0 = vpop.permute.xlu1 %945  ;;  %11356 = vst [vmem:[#allocation76_spill] sm:$0xff] %v6815_v41  ;;  %v6833_v9 = vrot.slane %v2702_v13, %v6032_v12  ;;  %v3304_v61 = vcombine.high %v6815_v41, %v6815_v41  ;;  %v6839_v34 = vrot.slane %v6804_v50, %v6030_v11 }
  0xdf   :  { %11355 = vst [vmem:[#allocation75_spill] sm:$0xff] %v6811_v0  ;;  %v6828_v22 = vsel %vm1240_vm0, %v11358_v36, %v11357_v8  ;;  %v11362_v55 = vmov %v11357_v8  ;;  %v6860_v24 = vmul.f32 %v6340_v43, %v6580_v45  ;;  %v6872_v13 = vmul.f32 %v6346_v53, %v6609_v52 }
  0xe0   :  { %11359 = vst [vmem:[#allocation77_spill] sm:$0xff] %v6828_v22  ;;  %v6830_v0 = vpop.permute.xlu0 %1958  ;;  %11360 = vst [vmem:[#allocation78_spill] sm:$0xff] %v6833_v9  ;;  %v6846_v40 = vsel %vm1240_vm0, %v11362_v55, %v11361_v1  ;;  %v6853_v22 = vmul.f32 %v6346_v53, %v6580_v45  ;;  %v11364_v9 = vrot.slane %v6489_v54, %v6032_v12 }
  0xe1   :  { %11363 = vst [vmem:[#allocation79_spill] sm:$0xff] %v6846_v40  ;;  %v6864_v55 = vmul.f32 %v6340_v43, %v6592_v47  ;;  %v6868_v1 = vmul.f32 %v6346_v53, %v6592_v47  ;;  %v6884_v8 = vrot.slane %v2671_v18, %v6030_v11  ;;  %v6890_v53 = vmul.f32 %v6359_v10, %v6580_v45 }
  0xe2   :  { %2947 = vperm.xlu1 %5873, %v11364_v9   ;;  %405 = vperm.xlu0 %5905, %v6218_v26   ;;  %v6875_v54 = vpop.permute.xlu1 %953  ;;  %v6879_v9 = vmul.f32 %v6340_v43, %v6609_v52  ;;  %v6895_v40 = vrot.slane %v3304_v61, %v6032_v12  ;;  %v6899_v43 = vrot.slane %v6839_v34, %v6030_v11 }
  0xe3   :  { %11365 = vst [vmem:[#allocation80_spill] sm:$0xff] %v6884_v8  ;;  %v6901_v36 = vadd.f32 %v1258_v35, %v501_v14  ;;  %v6910_v41 = vmul.f32 %v6359_v10, %v6609_v52  ;;  %v6913_v61 = vadd.f32 %v1260_v27, %v502_v57  ;;  %v6919_v35 = vmul.f32 %v6350_v56, %v6580_v45 }
  0xe4   :  { %v6892_v26 = vpop.permute.xlu0 %1966  ;;  %11367 = vst [vmem:[#allocation82_spill] sm:$0xff] %v6895_v40  ;;  %v6923_v14 = vmul.f32 %v6350_v56, %v6592_v47  ;;  %v2703_v57 = vcombine.high %v6884_v8, %v6884_v8  ;;  %v11375_v27 = vrot.slane %v6675_v42, 1  ;;  %v6996_v18 = vmul.f32 %v6387_v6, %v6580_v45 }
  0xe5   :  { %11366 = vst [vmem:[#allocation81_spill] sm:$0xff] %v6892_v26  ;;  %11368 = vst [vmem:[#allocation83_spill] sm:$0xff] %v6901_v36  ;;  %v6937_v26 = vrot.slane %v2719_v37, %v6030_v11  ;;  %v11376_v36 = vrot.slane %v6656_v39, 1  ;;  %v6970_v39 = vmul.f32 %v6363_v32, %v6592_v47 }
  0xe6   :  { %2955 = vperm.xlu1 %5873, %v6537_v2   ;;  %11369 = vst [vmem:[#allocation84_spill] sm:$0xff] %v6913_v61  ;;  %413 = vperm.xlu0 %5905, %v6225_v15   ;;  %v6926_v10 = vpop.permute.xlu1 %961  ;;  %v6930_v2 = vmul.f32 %v6350_v56, %v6609_v52  ;;  %v6944_v15 = vrot.slane %v6899_v43, %v6032_v12  ;;  %v11373_v56 = vrot.slane %v6683_v58, 1 }
  0xe7   :  { %11370 = vst [vmem:[#allocation85_spill] sm:$0xff] %v6937_v26  ;;  %v1270_v8 = vsel %vm1240_vm0, %v11376_v36, %v11375_v27  ;;  %v11377_v58 = vrot.slane %v6500_v3, %v6032_v12  ;;  %v6978_v36 = vmul.f32 %v6373_v46, %v6592_v47  ;;  %v6982_v27 = vmul.f32 %v6373_v46, %v6609_v52 }
  0xe8   :  { %v6940_v40 = vpop.permute.xlu0 %1974  ;;  %11372 = vst [vmem:[#allocation87_spill] sm:$0xff] %v6944_v15  ;;  %v6948_v61 = vadd.f32 %v11373_v56, %v503_v51  ;;  %v6963_v15 = vmul.f32 %v6373_v46, %v6580_v45  ;;  %v6974_v51 = vmul.f32 %v6363_v32, %v6609_v52  ;;  %v6988_v56 = vrot.slane %v2703_v57, %v6032_v12 }
  0xe9   :  { %11371 = vst [vmem:[#allocation86_spill] sm:$0xff] %v6940_v40  ;;  %v6959_v40 = vmul.f32 %v6363_v32, %v6580_v45  ;;  %v2720_v32 = vcombine.high %v6529_v31, %v6529_v31  ;;  %v7004_v46 = vadd.f32 %v6760_v19, %v6712_v63  ;;  %v7007_v57 = vadd.f32 %v1270_v8, %v6716_v48 }
  0xea   :  { %11374 = vst [vmem:[#allocation88_spill] sm:$0xff] %v6948_v61  ;;  %2963 = vperm.xlu1 %5873, %v11377_v58   ;;  %421 = vperm.xlu0 %5905, %v6230_v30   ;;  %v6985_v3 = vpop.permute.xlu1 %969  ;;  %v2751_v30 = vcombine.high %v6937_v26, %v6937_v26  ;;  %v7012_v31 = vmul.f32 %v6387_v6, %v6592_v47  ;;  %v11380_v26 = vrot.slane %v6675_v42, 1  ;;  %v11385_v19 = vrot.slane %v6733_v20, 1 }
  0xeb   :  { %11378 = vst [vmem:[#allocation89_spill] sm:$0xff] %v7004_v46  ;;  %11379 = vst [vmem:[#allocation90_spill] sm:$0xff] %v7007_v57  ;;  %v7016_v61 = vmul.f32 %v6387_v6, %v6609_v52  ;;  %v7028_v8 = vmul.f32 %v6376_v49, %v6580_v45  ;;  %v7032_v58 = vmul.f32 %v6376_v49, %v6592_v47 }
  0xec   :  { %v6998_v37 = vpop.permute.xlu0 %1982  ;;  %v7022_v63 = vadd.f32 %v11380_v26, %v6729_v62  ;;  %v7043_v42 = vrot.slane %v6289_v59, %v6032_v12  ;;  %v7046_v62 = vrot.slane %v2720_v32, %v6030_v11  ;;  %v11384_v26 = vrot.slane %v6745_v4, 1 }
  0xed   :  { %v7068_v20 = vmul.f32 %v6393_v16, %v6580_v45  ;;  %v7079_v4 = vmul.f32 %v6393_v16, %v6592_v47 }
  0xee   :  { %2971 = vperm.xlu1 %5873, %v6549_v17   ;;  %11381 = vst [vmem:[#allocation91_spill] sm:$0xff] %v7022_v63  ;;  %429 = vperm.xlu0 %5905, %v6237_v33   ;;  %v7035_v6 = vpop.permute.xlu1 %977  ;;  %v7039_v17 = vmul.f32 %v6376_v49, %v6609_v52  ;;  %11382 = vst [vmem:[#allocation92_spill] sm:$0xff] %v7043_v42  ;;  %v1278_v48 = vsel %vm1240_vm0, %v11385_v19, %v11384_v26  ;;  %v11388_v63 = vrot.slane %v6749_v7, 1  ;;  %v11392_v42 = vld [vmem:[#allocation7_spill] sm:$0xff]  ;;  %v11394_v33 = vld [vmem:[#allocation41_spill] sm:$0xff] }
  0xef   :  { %11383 = vst [vmem:[#allocation93_spill] sm:$0xff] %v7046_v62  ;;  %v7057_v49 = vrot.slane %v2751_v30, %v6032_v12  ;;  %v11389_v59 = vmov %v11384_v26  ;;  %v7072_v19 = vmul.f32 %v6402_v28, %v6580_v45  ;;  %v11390_v30 = vrot.slane %v6526_v23, %v6032_v12 }
  0xf0   :  { %v7054_v57 = vpop.permute.xlu0 %1990  ;;  %v1280_v32 = vsel %vm1240_vm0, %v11389_v59, %v11388_v63  ;;  %v7083_v63 = vmul.f32 %v6393_v16, %v6609_v52  ;;  %v7087_v26 = vmul.f32 %v6402_v28, %v6592_v47  ;;  %v7091_v59 = vmul.f32 %v6402_v28, %v6609_v52 }
  0xf1   :  { %11386 = vst [vmem:[#allocation94_spill] sm:$0xff] %v7054_v57  ;;  %11387 = vst [vmem:[#allocation95_spill] sm:$0xff] %v7057_v49  ;;  %v2768_v46 = vcombine.high %v11394_v33, %v11394_v33  ;;  %v7101_v16 = vadd.f32 %v1278_v48, %v6860_v24  ;;  %v7104_v49 = vadd.f32 %v1280_v32, %v6864_v55  ;;  %v11400_v33 = vrot.slane %v6790_v38, 1 }
  0xf2   :  { %2979 = vperm.xlu1 %5873, %v11390_v30   ;;  %11391 = vst [vmem:[#allocation96_spill] sm:$0xff] %v7091_v59  ;;  %437 = vperm.xlu0 %5905, %v11392_v42   ;;  %v7094_v23 = vpop.permute.xlu1 %985  ;;  %v2752_v28 = vcombine.high %v7046_v62, %v7046_v62  ;;  %v11397_v42 = vrot.slane %v6749_v7, 1  ;;  %v11399_v30 = vrot.slane %v6794_v5, 1  ;;  %v11401_v48 = vrot.slane %v6798_v60, 1 }
  0xf3   :  { %11393 = vst [vmem:[#allocation7_spill] sm:$0xff] %v7094_v23  ;;  %11395 = vst [vmem:[#allocation41_spill] sm:$0xff] %v7101_v16  ;;  %v11403_v16 = vld [vmem:[#allocation29_spill] sm:$0xff] }
  0xf4   :  { %11396 = vst [vmem:[#allocation97_spill] sm:$0xff] %v7104_v49  ;;  %v7106_v57 = vpop.permute.xlu0 %1998  ;;  %v7113_v23 = vadd.f32 %v11397_v42, %v6879_v9  ;;  %v1288_v24 = vsel %vm1240_vm0, %v11400_v33, %v11399_v30  ;;  %v11402_v55 = vmov %v11399_v30  ;;  %v7128_v62 = vmul.f32 %v11403_v16, %v6580_v45  ;;  %v11407_v9 = vld [vmem:[#allocation49_spill] sm:$0xff]  ;;  %v11408_v42 = vld [vmem:[#allocation26_spill] sm:$0xff] }
  0xf5   :  { %v1290_v32 = vsel %vm1240_vm0, %v11402_v55, %v11401_v48  ;;  %v7132_v7 = vmul.f32 %v11403_v16, %v6592_v47  ;;  %v7136_v38 = vmul.f32 %v11403_v16, %v6609_v52  ;;  %v7143_v33 = vmul.f32 %v11408_v42, %v6580_v45  ;;  %v11411_v55 = vld [vmem:[#allocation8_spill] sm:$0xff] }
  0xf6   :  { %11398 = vst [vmem:[#allocation98_spill] sm:$0xff] %v7113_v23  ;;  %11404 = vst [vmem:[#allocation29_spill] sm:$0xff] %v7128_v62  ;;  %2987 = vperm.xlu1 %5873, %v11407_v9   ;;  %v7147_v48 = vmul.f32 %v11408_v42, %v6592_v47  ;;  %445 = vperm.xlu0 %5905, %v11411_v55   ;;  %v7150_v49 = vpop.permute.xlu1 %993  ;;  %v7154_v16 = vmul.f32 %v11408_v42, %v6609_v52  ;;  %v11427_v55 = vld [vmem:[#allocation9_spill] sm:$0xff] }
  0xf7   :  { %11405 = vst [vmem:[#allocation99_spill] sm:$0xff] %v7132_v7  ;;  %11406 = vst [vmem:[#allocation100_spill] sm:$0xff] %v7136_v38  ;;  %v7157_v9 = vrot.slane %v2768_v46, %v6030_v11  ;;  %v7162_v5 = vrot.slane %v2752_v28, %v6032_v12  ;;  %v11418_v46 = vld [vmem:[#allocation32_spill] sm:$0xff]  ;;  %v11434_v7 = vld [vmem:[#allocation37_spill] sm:$0xff] }
  0xf8   :  { %11409 = vst [vmem:[#allocation49_spill] sm:$0xff] %v7143_v33  ;;  %11410 = vst [vmem:[#allocation26_spill] sm:$0xff] %v7147_v48  ;;  %v7159_v30 = vpop.permute.xlu0 %2006  ;;  %v7165_v33 = vadd.f32 %v1288_v24, %v6764_v25  ;;  %v7168_v48 = vadd.f32 %v1290_v32, %v6768_v29  ;;  %v7182_v25 = vmul.f32 %v11418_v46, %v6592_v47  ;;  %v11423_v29 = vld [vmem:[#allocation33_spill] sm:$0xff]  ;;  %v11431_v38 = vld [vmem:[#allocation44_spill] sm:$0xff] }
  0xf9   :  { %11412 = vst [vmem:[#allocation8_spill] sm:$0xff] %v7154_v16  ;;  %11413 = vst [vmem:[#allocation101_spill] sm:$0xff] %v7157_v9  ;;  %v7175_v16 = vmul.f32 %v11418_v46, %v6580_v45  ;;  %v7186_v24 = vmul.f32 %v11423_v29, %v6580_v45  ;;  %v7190_v32 = vmul.f32 %v11423_v29, %v6592_v47 }
  0xfa   :  { %11414 = vst [vmem:[#allocation102_spill] sm:$0xff] %v7159_v30  ;;  %11415 = vst [vmem:[#allocation103_spill] sm:$0xff] %v7162_v5  ;;  %v11420_v30 = vld [vmem:[#allocation43_spill] sm:$0xff]  ;;  %v7194_v42 = vmul.f32 %v11423_v29, %v6609_v52  ;;  %453 = vperm.xlu0 %5905, %v11427_v55   ;;  %v2769_v29 = vcombine.high %v11431_v38, %v11431_v38  ;;  %v11432_v55 = vrot.slane %v6798_v60, 1  ;;  %v11439_v38 = vrot.slane %v6868_v1, 1 }
  0xfb   :  { %11416 = vst [vmem:[#allocation104_spill] sm:$0xff] %v7165_v33  ;;  %11417 = vst [vmem:[#allocation105_spill] sm:$0xff] %v7168_v48  ;;  %v11421_v28 = vrot.slane %v11420_v30, %v6032_v12  ;;  %v7197_v30 = vpop.permute.xlu1 %1001  ;;  %v7222_v23 = vmul.f32 %v11434_v7, %v6592_v47  ;;  %v11438_v48 = vld [vmem:[#allocation52_spill] sm:$0xff]  ;;  %v11440_v60 = vrot.slane %v6853_v22, 1 }
  0xfc   :  { %11419 = vst [vmem:[#allocation32_spill] sm:$0xff] %v7175_v16  ;;  %11422 = vst [vmem:[#allocation43_spill] sm:$0xff] %v7182_v25  ;;  %v7205_v25 = vpop.permute.xlu0 %2014  ;;  %v2800_v16 = vcombine.high %v7157_v9, %v7157_v9  ;;  %v7214_v62 = vadd.f32 %v11432_v55, %v6772_v21  ;;  %v11441_v9 = vld [vmem:[#allocation10_spill] sm:$0xff]  ;;  %v11444_v22 = vld [vmem:[#allocation36_spill] sm:$0xff]  ;;  %v7263_v1 = vrot.slane %v2769_v29, %v6030_v11 }
  0xfd   :  { %2995 = vperm.xlu1 %5873, %v11421_v28   ;;  %11424 = vst [vmem:[#allocation33_spill] sm:$0xff] %v7186_v24  ;;  %11425 = vst [vmem:[#allocation106_spill] sm:$0xff] %v7190_v32  ;;  %v7201_v28 = vmul.f32 %v11418_v46, %v6609_v52  ;;  %v7218_v46 = vmul.f32 %v11434_v7, %v6580_v45  ;;  %v1298_v21 = vsel %vm1240_vm0, %v11440_v60, %v11439_v38  ;;  %v11453_v29 = vld [vmem:[#allocation38_spill] sm:$0xff]  ;;  %v11471_v32 = vld [vmem:[#allocation12_spill] sm:$0xff] }
  0xfe   :  { %11426 = vst [vmem:[#allocation107_spill] sm:$0xff] %v7194_v42  ;;  %11428 = vst [vmem:[#allocation9_spill] sm:$0xff] %v7197_v30  ;;  %461 = vperm.xlu0 %5905, %v11441_v9   ;;  %v7247_v30 = vmul.f32 %v11444_v22, %v6580_v45  ;;  %v7255_v60 = vmul.f32 %v11444_v22, %v6609_v52  ;;  %v7260_v33 = vrot.slane %v2800_v16, %v6032_v12 }
  0xff   :  { %11429 = vst [vmem:[#allocation108_spill] sm:$0xff] %v7201_v28  ;;  %11430 = vst [vmem:[#allocation109_spill] sm:$0xff] %v7205_v25  ;;  %v7226_v28 = vmul.f32 %v11434_v7, %v6609_v52  ;;  %v7238_v5 = vpop.permute.xlu1 %1009  ;;  %v11442_v7 = vrot.slane %v6872_v13, 1 }
 0x100   :  { %11433 = vst [vmem:[#allocation44_spill] sm:$0xff] %v7214_v62  ;;  %11435 = vst [vmem:[#allocation37_spill] sm:$0xff] %v7218_v46  ;;  %v7257_v9 = vpop.permute.xlu0 %2022  ;;  %v11463_v46 = vld [vmem:[#allocation58_spill] sm:$0xff] }
 0x101   :  { %11436 = vst [vmem:[#allocation110_spill] sm:$0xff] %v7222_v23  ;;  %11437 = vst [vmem:[#allocation111_spill] sm:$0xff] %v7226_v28  ;;  %3003 = vperm.xlu1 %5873, %v11438_v48   ;;  %v11443_v48 = vmov %v11439_v38  ;;  %v7251_v38 = vmul.f32 %v11444_v22, %v6592_v47  ;;  %v11449_v22 = vld [vmem:[#allocation39_spill] sm:$0xff]  ;;  %v3273_v23 = vcombine.high %v11463_v46, %v11463_v46 }
 0x102   :  { %v1300_v25 = vsel %vm1240_vm0, %v11443_v48, %v11442_v7  ;;  %11445 = vst [vmem:[#allocation52_spill] sm:$0xff] %v7247_v30  ;;  %11447 = vst [vmem:[#allocation36_spill] sm:$0xff] %v7255_v60  ;;  %v7266_v7 = vadd.f32 %v1298_v21, %v6919_v35  ;;  %v7273_v60 = vmul.f32 %v11449_v22, %v6580_v45  ;;  %v11458_v48 = vld [vmem:[#allocation11_spill] sm:$0xff] }
 0x103   :  { %11446 = vst [vmem:[#allocation10_spill] sm:$0xff] %v7251_v38  ;;  %v11451_v38 = vld [vmem:[#allocation46_spill] sm:$0xff]  ;;  %v7280_v30 = vmul.f32 %v11453_v29, %v6580_v45  ;;  %v7284_v35 = vmul.f32 %v11453_v29, %v6592_v47  ;;  %v7288_v21 = vmul.f32 %v11449_v22, %v6592_v47  ;;  %v7292_v62 = vmul.f32 %v11449_v22, %v6609_v52 }
 0x104   :  { %11448 = vst [vmem:[#allocation112_spill] sm:$0xff] %v7266_v7  ;;  %11450 = vst [vmem:[#allocation39_spill] sm:$0xff] %v7273_v60  ;;  %v11452_v16 = vrot.slane %v11451_v38, %v6032_v12  ;;  %469 = vperm.xlu0 %5905, %v11458_v48   ;;  %v7295_v38 = vpop.permute.xlu1 %1017  ;;  %v7302_v55 = vadd.f32 %v1300_v25, %v6923_v14  ;;  %v7308_v28 = vpop.permute.xlu0 %2030  ;;  %v2801_v48 = vcombine.high %v7263_v1, %v7263_v1 }
 0x105   :  { %11454 = vst [vmem:[#allocation46_spill] sm:$0xff] %v7280_v30  ;;  %11455 = vst [vmem:[#allocation38_spill] sm:$0xff] %v7284_v35  ;;  %v11461_v35 = vld [vmem:[#allocation42_spill] sm:$0xff]  ;;  %v11467_v22 = vrot.slane %v6872_v13, 1 }
 0x106   :  { %3011 = vperm.xlu1 %5873, %v11452_v16   ;;  %11456 = vst [vmem:[#allocation113_spill] sm:$0xff] %v7288_v21  ;;  %11457 = vst [vmem:[#allocation114_spill] sm:$0xff] %v7292_v62  ;;  %v7299_v16 = vmul.f32 %v11453_v29, %v6609_v52  ;;  %v7306_v30 = vmul.f32 %v11461_v35, %v6580_v45  ;;  %v7319_v14 = vmul.f32 %v11461_v35, %v6592_v47  ;;  %v11469_v29 = vld [vmem:[#allocation40_spill] sm:$0xff] }
 0x107   :  { %11460 = vst [vmem:[#allocation115_spill] sm:$0xff] %v7302_v55  ;;  %v7323_v25 = vmul.f32 %v11461_v35, %v6609_v52  ;;  %v7329_v42 = vadd.f32 %v11467_v22, %v6930_v2  ;;  %v7335_v60 = vmul.f32 %v11469_v29, %v6580_v45  ;;  %v7342_v35 = vmul.f32 %v11469_v29, %v6592_v47 }
 0x108   :  { %11459 = vst [vmem:[#allocation11_spill] sm:$0xff] %v7299_v16  ;;  %11462 = vst [vmem:[#allocation42_spill] sm:$0xff] %v7306_v30  ;;  %v11466_v16 = vld [vmem:[#allocation55_spill] sm:$0xff]  ;;  %477 = vperm.xlu0 %5905, %v11471_v32   ;;  %v7338_v55 = vpop.permute.xlu1 %1025  ;;  %v7346_v13 = vmul.f32 %v11469_v29, %v6609_v52  ;;  %v11474_v2 = vrot.slane %v6906_v44, 1  ;;  %v7354_v24 = vpop.permute.xlu0 %2038  ;;  %v7357_v32 = vrot.slane %v2801_v48, %v6032_v12  ;;  %v11480_v48 = vld [vmem:[#allocation48_spill] sm:$0xff] }
 0x109   :  { %11464 = vst [vmem:[#allocation58_spill] sm:$0xff] %v7319_v14  ;;  %11465 = vst [vmem:[#allocation116_spill] sm:$0xff] %v7323_v25  ;;  %v7375_v30 = vmul.f32 %v11480_v48, %v6580_v45 }
 0x10a   :  { %3019 = vperm.xlu1 %5873, %v11466_v16   ;;  %11468 = vst [vmem:[#allocation55_spill] sm:$0xff] %v7329_v42  ;;  %11470 = vst [vmem:[#allocation40_spill] sm:$0xff] %v7335_v60  ;;  %v11475_v16 = vrot.slane %v6890_v53, 1  ;;  %v7360_v60 = vrot.slane %v3273_v23, %v6030_v11  ;;  %v11477_v29 = vmov %v11474_v2  ;;  %v11482_v23 = vld [vmem:[#allocation47_spill] sm:$0xff] }
 0x10b   :  { %11472 = vst [vmem:[#allocation12_spill] sm:$0xff] %v7342_v35  ;;  %11473 = vst [vmem:[#allocation117_spill] sm:$0xff] %v7346_v13  ;;  %v11476_v35 = vrot.slane %v6910_v41, 1  ;;  %v11483_v62 = vrot.slane %v11482_v23, %v6032_v12  ;;  %v7397_v23 = vmul.f32 %v11480_v48, %v6609_v52 }
 0x10c   :  { %v1308_v22 = vsel %vm1240_vm0, %v11475_v16, %v11474_v2  ;;  %v11478_v16 = vld [vmem:[#allocation45_spill] sm:$0xff]  ;;  %11481 = vst [vmem:[#allocation48_spill] sm:$0xff] %v7375_v30  ;;  %v7393_v53 = vpop.permute.xlu1 %1033  ;;  %v7408_v25 = vpop.permute.xlu0 %2046 }
 0x10d   :  { %v1310_v13 = vsel %vm1240_vm0, %v11477_v29, %v11476_v35  ;;  %v7371_v46 = vmul.f32 %v11478_v16, %v6580_v45  ;;  %v7382_v44 = vmul.f32 %v11478_v16, %v6592_v47  ;;  %v7386_v35 = vmul.f32 %v11478_v16, %v6609_v52  ;;  %v11487_v2 = vld [vmem:[#allocation13_spill] sm:$0xff] }
 0x10e   :  { %3027 = vperm.xlu1 %5873, %v11483_v62   ;;  %v7390_v29 = vmul.f32 %v11480_v48, %v6592_v47  ;;  %485 = vperm.xlu0 %5905, %v11487_v2   ;;  %11488 = vst [vmem:[#allocation13_spill] sm:$0xff] %v7397_v23  ;;  %v3305_v62 = vcombine.high %v7360_v60, %v7360_v60  ;;  %v11489_v16 = vrot.slane %v6978_v36, 1 }
 0x10f   :  { %11479 = vst [vmem:[#allocation45_spill] sm:$0xff] %v7371_v46  ;;  %11484 = vst [vmem:[#allocation47_spill] sm:$0xff] %v7382_v44  ;;  %v3846_v44 = vcombine.high %v6839_v34, %v6839_v34  ;;  %v7413_v48 = vadd.f32 %v1308_v22, %v6959_v40  ;;  %v7416_v14 = vadd.f32 %v1310_v13, %v6970_v39  ;;  %v11493_v34 = vrot.slane %v6910_v41, 1  ;;  %v11498_v40 = vld [vmem:[#allocation56_spill] sm:$0xff]  ;;  %v11502_v22 = vld [vmem:[#allocation35_spill] sm:$0xff] }
 0x110   :  { %11485 = vst [vmem:[#allocation118_spill] sm:$0xff] %v7386_v35  ;;  %11486 = vst [vmem:[#allocation119_spill] sm:$0xff] %v7390_v29  ;;  %v11490_v35 = vrot.slane %v6963_v15, 1  ;;  %v11499_v39 = vrot.slane %v6982_v27, 1  ;;  %v11500_v13 = vrot.slane %v6978_v36, 1  ;;  %v7445_v15 = vpop.permute.xlu1 %1041 }
 0x111   :  { %11491 = vst [vmem:[#allocation120_spill] sm:$0xff] %v7413_v48  ;;  %11492 = vst [vmem:[#allocation121_spill] sm:$0xff] %v7416_v14  ;;  %v7421_v21 = vadd.f32 %v11493_v34, %v6974_v51  ;;  %v11503_v34 = vrot.slane %v11502_v22, %v6032_v12  ;;  %v7463_v22 = vrot.slane %v3846_v44, %v6030_v11  ;;  %v11515_v44 = vrot.slane %v7016_v61, 1 }
 0x112   :  { %v1318_v46 = vsel %vm1240_vm0, %v11490_v35, %v11489_v16  ;;  %v11495_v35 = vld [vmem:[#allocation51_spill] sm:$0xff]  ;;  %3035 = vperm.xlu1 %5873, %v11498_v40   ;;  %v1320_v41 = vsel %vm1240_vm0, %v11500_v13, %v11499_v39  ;;  %v11506_v36 = vmov %v11499_v39 }
 0x113   :  { %11494 = vst [vmem:[#allocation122_spill] sm:$0xff] %v7421_v21  ;;  %v7426_v16 = vmul.f32 %v11495_v35, %v6580_v45  ;;  %v7430_v2 = vmul.f32 %v11495_v35, %v6592_v47  ;;  %v7440_v51 = vmul.f32 %v11495_v35, %v6609_v52  ;;  %2931 = vperm.xlu0 %5905, %v11503_v34   ;;  %v11508_v35 = vld [vmem:[#allocation59_spill] sm:$0xff]  ;;  %v11510_v34 = vrot.slane %v7012_v31, 1 }
 0x114   :  { %v7450_v40 = vadd.f32 %v1318_v46, %v7028_v8  ;;  %v7455_v39 = vadd.f32 %v11506_v36, %v7039_v17  ;;  %v1051_v13 = vmul.f32 %v11508_v35, %v6580_v45  ;;  %v1052_v27 = vmul.f32 %v11508_v35, %v6592_v47  ;;  %v7476_v46 = vpop.permute.xlu0 %5047 }
 0x115   :  { %11496 = vst [vmem:[#allocation51_spill] sm:$0xff] %v7426_v16  ;;  %11497 = vst [vmem:[#allocation123_spill] sm:$0xff] %v7430_v2  ;;  %v11504_v16 = vld [vmem:[#allocation72_spill] sm:$0xff]  ;;  %v7474_v17 = vmul.f32 %v11508_v35, %v6609_v52  ;;  %v11516_v36 = vmov %v11510_v34  ;;  %v11518_v35 = vld [vmem:[#allocation67_spill] sm:$0xff] }
 0x116   :  { %11501 = vst [vmem:[#allocation56_spill] sm:$0xff] %v7440_v51  ;;  %v3274_v2 = vcombine.high %v11504_v16, %v11504_v16  ;;  %11505 = vst [vmem:[#allocation35_spill] sm:$0xff] %v7450_v40  ;;  %v7460_v51 = vrot.slane %v3305_v62, %v6032_v12  ;;  %v11511_v16 = vrot.slane %v6996_v18, 1  ;;  %v7479_v62 = vadd.f32 %v1320_v41, %v7032_v58 }
 0x117   :  { %11507 = vst [vmem:[#allocation72_spill] sm:$0xff] %v7455_v39  ;;  %11512 = vst [vmem:[#allocation124_spill] sm:$0xff] %v7474_v17  ;;  %v1330_v18 = vsel %vm1240_vm0, %v11516_v36, %v11515_v44  ;;  %v7492_v23 = vmul.f32 %v11518_v35, %v6609_v52  ;;  %v11522_v44 = vld [vmem:[#allocation57_spill] sm:$0xff]  ;;  %v11525_v39 = vrot.slane %v7016_v61, 1  ;;  %v1247_v61 = vrot.slane %v1052_v27, 1 }
 0x118   :  { %11509 = vst [vmem:[#allocation59_spill] sm:$0xff] %v7460_v51  ;;  %v1328_v8 = vsel %vm1240_vm0, %v11511_v16, %v11510_v34  ;;  %11513 = vst [vmem:[#allocation125_spill] sm:$0xff] %v7476_v46  ;;  %v11517_v34 = vld [vmem:[#allocation63_spill] sm:$0xff]  ;;  %v11519_v46 = vld [vmem:[#allocation50_spill] sm:$0xff]  ;;  %2943 = vperm.xlu0 %5905, %v11522_v44   ;;  %v7505_v36 = vrot.slane %v3274_v2, %v6030_v11  ;;  %v7522_v44 = vadd.f32 %v1330_v18, %v7079_v4  ;;  %v7538_v41 = vpop.permute.xlu0 %5055 }
 0x119   :  { %11514 = vst [vmem:[#allocation126_spill] sm:$0xff] %v7479_v62  ;;  %v2056_v16 = vmul.f32 %v11517_v34, %v6580_v45  ;;  %v2057_v30 = vmul.f32 %v11517_v34, %v6592_v47  ;;  %v11520_v58 = vrot.slane %v11519_v46, %v6032_v12  ;;  %v7501_v31 = vmul.f32 %v11517_v34, %v6609_v52  ;;  %v7515_v62 = vpop.permute.xlu1 %1926 }
 0x11a   :  { %11523 = vst [vmem:[#allocation67_spill] sm:$0xff] %v7505_v36  ;;  %v7508_v29 = vadd.f32 %v1328_v8, %v7068_v20  ;;  %v7513_v46 = vadd.f32 %v11525_v39, %v7083_v63  ;;  %v7519_v34 = vrot.slane %v7463_v22, %v6032_v12  ;;  %11528 = vst [vmem:[#allocation128_spill] sm:$0xff] %v7522_v44  ;;  %v11529_v2 = vrot.slane %v7087_v26, 1 }
 0x11b   :  { %3043 = vperm.xlu1 %5873, %v11520_v58   ;;  %11521 = vst [vmem:[#allocation63_spill] sm:$0xff] %v7501_v31  ;;  %v1246_v58 = vrot.slane %v1051_v13, 1  ;;  %v11530_v20 = vrot.slane %v7072_v19, 1  ;;  %v1054_v39 = vmul.f32 %v11518_v35, %v6580_v45  ;;  %v7536_v13 = vmul.f32 %v11518_v35, %v6592_v47  ;;  %11532 = vst [vmem:[#allocation130_spill] sm:$0xff] %v7538_v41  ;;  %v11533_v19 = vld [vmem:[#allocation65_spill] sm:$0xff] }
 0x11c   :  { %11524 = vst [vmem:[#allocation50_spill] sm:$0xff] %v7508_v29  ;;  %11526 = vst [vmem:[#allocation57_spill] sm:$0xff] %v7513_v46  ;;  %v2251_v4 = vrot.slane %v2056_v16, 2  ;;  %v2252_v18 = vrot.slane %v2057_v30, 2  ;;  %v3876_v27 = vcombine.high %v6899_v43, %v6899_v43  ;;  %v11537_v16 = vrot.slane %v7091_v59, 1  ;;  %v11546_v29 = vld [vmem:[#allocation64_spill] sm:$0xff] }
 0x11d   :  { %11527 = vst [vmem:[#allocation127_spill] sm:$0xff] %v7519_v34  ;;  %v7529_v8 = vsel %vm1240_vm0, %v11530_v20, %v11529_v2  ;;  %v11534_v20 = vld [vmem:[#allocation68_spill] sm:$0xff]  ;;  %v7573_v41 = vpop.permute.xlu1 %1934  ;;  %v1251_v26 = vrot.slane %v1054_v39, 1  ;;  %v7579_v59 = vsel %vm1240_vm0, %v1246_v58, %v1247_v61  ;;  %v11547_v46 = vrot.slane %v7492_v23, 1 }
 0x11e   :  { %11531 = vst [vmem:[#allocation129_spill] sm:$0xff] %v7529_v8  ;;  %v7547_v63 = vmul.f32 %v11534_v20, %v6580_v45  ;;  %v11535_v8 = vld [vmem:[#allocation60_spill] sm:$0xff]  ;;  %v7563_v43 = vmul.f32 %v11534_v20, %v6592_v47  ;;  %v7599_v58 = vrot.slane %v3876_v27, %v6032_v12  ;;  %v11563_v27 = vld [vmem:[#allocation73_spill] sm:$0xff]  ;;  %v3306_v21 = vcombine.high %v7505_v36, %v7505_v36 }
 0x11f   :  { %3051 = vperm.xlu1 %5873, %v11533_v19   ;;  %v11536_v35 = vrot.slane %v11535_v8, %v6032_v12  ;;  %v11538_v19 = vmov %v11529_v2  ;;  %v7567_v2 = vmul.f32 %v11534_v20, %v6609_v52  ;;  %v11541_v8 = vld [vmem:[#allocation71_spill] sm:$0xff]  ;;  %v7589_v40 = vadd.f32 %v11547_v46, %v11546_v29 }
 0x120   :  { %v7559_v44 = vsel %vm1240_vm0, %v11538_v19, %v11537_v16  ;;  %v1061_v30 = vmul.f32 %v11541_v8, %v6592_v47  ;;  %v1252_v16 = vrot.slane %v7536_v13, 1  ;;  %v7576_v19 = vpop.permute.xlu0 %5059  ;;  %11543 = vst [vmem:[#allocation71_spill] sm:$0xff] %v7579_v59  ;;  %v7593_v39 = vmul.f32 %v11541_v8, %v6609_v52  ;;  %v11550_v13 = vld [vmem:[#allocation66_spill] sm:$0xff] }
 0x121   :  { %2951 = vperm.xlu0 %5905, %v11536_v35   ;;  %11539 = vst [vmem:[#allocation65_spill] sm:$0xff] %v7559_v44  ;;  %11540 = vst [vmem:[#allocation68_spill] sm:$0xff] %v7567_v2  ;;  %v1060_v35 = vmul.f32 %v11541_v8, %v6580_v45  ;;  %v11544_v44 = vrot.slane %v7474_v17, 1  ;;  %v7602_v17 = vsel %vm2245_vm1, %v2251_v4, %v2252_v18 }
 0x122   :  { %11542 = vst [vmem:[#allocation60_spill] sm:$0xff] %v7576_v19  ;;  %11548 = vst [vmem:[#allocation64_spill] sm:$0xff] %v7589_v40  ;;  %v11551_v19 = vrot.slane %v11550_v13, %v6032_v12  ;;  %v11577_v40 = vld [vmem:[#allocation81_spill] sm:$0xff] }
 0x123   :  { %v7584_v20 = vsel %vm1240_vm0, %v1247_v61, %v11544_v44  ;;  %11549 = vst [vmem:[#allocation132_spill] sm:$0xff] %v7593_v39  ;;  %11552 = vst [vmem:[#allocation66_spill] sm:$0xff] %v7599_v58  ;;  %v11554_v61 = vld [vmem:[#allocation74_spill] sm:$0xff]  ;;  %v1261_v13 = vrot.slane %v1060_v35, 1  ;;  %v1262_v44 = vrot.slane %v1061_v30, 1  ;;  %v7640_v35 = vmul.f32 %v6830_v0, %v6580_v45  ;;  %v11564_v30 = vld [vmem:[#allocation69_spill] sm:$0xff] }
 0x124   :  { %11545 = vst [vmem:[#allocation131_spill] sm:$0xff] %v7584_v20  ;;  %3583 = vperm.xlu1 %5873, %v11551_v19   ;;  %11553 = vst [vmem:[#allocation133_spill] sm:$0xff] %v7602_v17  ;;  %v7607_v29 = vmul.f32 %v11554_v61, %v6580_v45  ;;  %v7611_v46 = vmul.f32 %v11554_v61, %v6592_v47  ;;  %v7615_v8 = vmul.f32 %v11554_v61, %v6609_v52  ;;  %v11556_v19 = vld [vmem:[#allocation70_spill] sm:$0xff]  ;;  %v7620_v17 = vpop.permute.xlu1 %1938  ;;  %v11558_v20 = vld [vmem:[#allocation75_spill] sm:$0xff]  ;;  %v7630_v48 = vpop.permute.xlu0 %5063 }
 0x125   :  { %2959 = vperm.xlu0 %5905, %v11556_v19   ;;  %11557 = vst [vmem:[#allocation70_spill] sm:$0xff] %v7620_v17  ;;  %v1066_v59 = vmul.f32 %v11558_v20, %v6580_v45  ;;  %v1067_v14 = vmul.f32 %v11558_v20, %v6592_v47  ;;  %v7628_v61 = vmul.f32 %v11558_v20, %v6609_v52  ;;  %11560 = vst [vmem:[#allocation134_spill] sm:$0xff] %v7630_v48  ;;  %v11571_v58 = vld [vmem:[#allocation76_spill] sm:$0xff] }
 0x126   :  { %11555 = vst [vmem:[#allocation74_spill] sm:$0xff] %v7615_v8  ;;  %v11561_v19 = vrot.slane %v7501_v31, 2  ;;  %v1253_v20 = vsel %vm1240_vm0, %v1251_v26, %v1252_v16  ;;  %v1072_v26 = vmul.f32 %v6875_v54, %v6580_v45  ;;  %v1073_v48 = vmul.f32 %v6875_v54, %v6592_v47 }
 0x127   :  { %11559 = vst [vmem:[#allocation75_spill] sm:$0xff] %v7628_v61  ;;  %v1271_v42 = vrot.slane %v1066_v59, 1  ;;  %v1272_v7 = vrot.slane %v1067_v14, 1  ;;  %v11572_v17 = vrot.slane %v11571_v58, %v6032_v12  ;;  %v7686_v59 = vrot.slane %v3306_v21, %v6032_v12  ;;  %v11579_v21 = vld [vmem:[#allocation78_spill] sm:$0xff] }
 0x128   :  { %v7635_v4 = vsel %vm2245_vm1, %v2252_v18, %v11561_v19  ;;  %3591 = vperm.xlu1 %5873, %v11563_v27   ;;  %v7651_v19 = vmul.f32 %v6830_v0, %v6592_v47  ;;  %v7658_v27 = vmul.f32 %v6830_v0, %v6609_v52  ;;  %v7664_v31 = vpop.permute.xlu1 %1946  ;;  %v7667_v18 = vsel %vm1240_vm0, %v1261_v13, %v1262_v44  ;;  %v7674_v0 = vpop.permute.xlu0 %5067 }
 0x129   :  { %11562 = vst [vmem:[#allocation135_spill] sm:$0xff] %v7635_v4  ;;  %v11565_v4 = vrot.slane %v11564_v30, %v6032_v12  ;;  %11567 = vst [vmem:[#allocation69_spill] sm:$0xff] %v7664_v31  ;;  %v11573_v31 = vrot.slane %v7593_v39, 1  ;;  %v11576_v14 = vrot.slane %v7492_v23, 1  ;;  %v1281_v58 = vrot.slane %v1072_v26, 1  ;;  %v11586_v23 = vld [vmem:[#allocation82_spill] sm:$0xff] }
 0x12a   :  { %11566 = vst [vmem:[#allocation73_spill] sm:$0xff] %v7658_v27  ;;  %11568 = vst [vmem:[#allocation136_spill] sm:$0xff] %v7667_v18  ;;  %v7711_v30 = vmul.f32 %v6926_v10, %v6580_v45  ;;  %v7729_v26 = vmul.f32 %v6926_v10, %v6609_v52 }
 0x12b   :  { %2967 = vperm.xlu0 %5905, %v11565_v4   ;;  %v7672_v4 = vmul.f32 %v6875_v54, %v6609_v52  ;;  %11570 = vst [vmem:[#allocation138_spill] sm:$0xff] %v7674_v0  ;;  %v7683_v13 = vsel %vm1240_vm0, %v1262_v44, %v11573_v31  ;;  %11575 = vst [vmem:[#allocation139_spill] sm:$0xff] %v7686_v59  ;;  %v1255_v54 = vsel %vm1240_vm0, %v1252_v16, %v11576_v14  ;;  %v11587_v14 = vld [vmem:[#allocation61_spill] sm:$0xff] }
 0x12c   :  { %3599 = vperm.xlu1 %5873, %v11572_v17   ;;  %11574 = vst [vmem:[#allocation76_spill] sm:$0xff] %v7683_v13  ;;  %v7694_v0 = vmul.f32 %v11577_v40, %v6580_v45  ;;  %v7698_v17 = vmul.f32 %v11577_v40, %v6592_v47  ;;  %v7702_v31 = vmul.f32 %v11577_v40, %v6609_v52  ;;  %v1282_v16 = vrot.slane %v1073_v48, 1  ;;  %v7706_v44 = vpop.permute.xlu1 %1954  ;;  %v7713_v39 = vpop.permute.xlu0 %5071 }
 0x12d   :  { %11569 = vst [vmem:[#allocation137_spill] sm:$0xff] %v7672_v4  ;;  %11580 = vst [vmem:[#allocation78_spill] sm:$0xff] %v7706_v44  ;;  %v7716_v13 = vsel %vm1240_vm0, %v1271_v42, %v1272_v7  ;;  %v11583_v40 = vrot.slane %v7628_v61, 1  ;;  %v7725_v48 = vmul.f32 %v6926_v10, %v6592_v47  ;;  %v11589_v42 = vld [vmem:[#allocation62_spill] sm:$0xff]  ;;  %v11592_v10 = vld [vmem:[#allocation80_spill] sm:$0xff] }
 0x12e   :  { %11578 = vst [vmem:[#allocation81_spill] sm:$0xff] %v7702_v31  ;;  %11581 = vst [vmem:[#allocation140_spill] sm:$0xff] %v7713_v39  ;;  %v7733_v39 = vadd.f32 %v1253_v20, %v11587_v14  ;;  %v11593_v44 = vrot.slane %v11592_v10, %v6032_v12  ;;  %v7759_v14 = vsel %vm1240_vm0, %v1281_v58, %v1282_v16 }
 0x12f   :  { %2975 = vperm.xlu0 %5905, %v11579_v21   ;;  %11582 = vst [vmem:[#allocation141_spill] sm:$0xff] %v7716_v13  ;;  %v7721_v21 = vsel %vm1240_vm0, %v1272_v7, %v11583_v40  ;;  %11585 = vst [vmem:[#allocation143_spill] sm:$0xff] %v7729_v26  ;;  %v7736_v13 = vadd.f32 %v1255_v54, %v11589_v42  ;;  %v1291_v42 = vrot.slane %v7711_v30, 1  ;;  %v1292_v58 = vrot.slane %v7725_v48, 1 }
 0x130   :  { %11584 = vst [vmem:[#allocation142_spill] sm:$0xff] %v7721_v21  ;;  %3607 = vperm.xlu1 %5873, %v11586_v23   ;;  %11588 = vst [vmem:[#allocation82_spill] sm:$0xff] %v7733_v39  ;;  %v11591_v21 = vld [vmem:[#allocation86_spill] sm:$0xff]  ;;  %v7756_v23 = vpop.permute.xlu1 %1962  ;;  %v7764_v40 = vmul.f32 %v6985_v3, %v6580_v45  ;;  %v7770_v10 = vpop.permute.xlu0 %5075  ;;  %v7781_v30 = vmul.f32 %v6985_v3, %v6609_v52  ;;  %v7794_v48 = vmul.f32 %v6998_v37, %v6580_v45  ;;  %v11620_v39 = vld [vmem:[#allocation92_spill] sm:$0xff] }
 0x131   :  { %11590 = vst [vmem:[#allocation61_spill] sm:$0xff] %v7736_v13  ;;  %v7743_v18 = vmul.f32 %v11591_v21, %v6580_v45  ;;  %v7750_v20 = vmul.f32 %v11591_v21, %v6592_v47  ;;  %v7754_v54 = vmul.f32 %v11591_v21, %v6609_v52  ;;  %11595 = vst [vmem:[#allocation86_spill] sm:$0xff] %v7756_v23  ;;  %v11598_v21 = vrot.slane %v7672_v4, 1 }
 0x132   :  { %11596 = vst [vmem:[#allocation80_spill] sm:$0xff] %v7759_v14  ;;  %11597 = vst [vmem:[#allocation144_spill] sm:$0xff] %v7770_v10  ;;  %v11601_v14 = vld [vmem:[#allocation87_spill] sm:$0xff]  ;;  %v11602_v23 = vrot.slane %v7563_v43, 2  ;;  %v11603_v13 = vrot.slane %v7547_v63, 2  ;;  %v11609_v7 = vrot.slane %v7567_v2, 2  ;;  %v7822_v63 = vmul.f32 %v7035_v6, %v6580_v45 }
 0x133   :  { %2983 = vperm.xlu0 %5905, %v11593_v44   ;;  %11594 = vst [vmem:[#allocation62_spill] sm:$0xff] %v7754_v54  ;;  %v7768_v44 = vmul.f32 %v6985_v3, %v6592_v47  ;;  %v7775_v61 = vsel %vm1240_vm0, %v1282_v16, %v11598_v21  ;;  %11600 = vst [vmem:[#allocation146_spill] sm:$0xff] %v7781_v30  ;;  %v7798_v21 = vmul.f32 %v6998_v37, %v6592_v47  ;;  %v11617_v2 = vld [vmem:[#allocation94_spill] sm:$0xff] }
 0x134   :  { %11599 = vst [vmem:[#allocation145_spill] sm:$0xff] %v7775_v61  ;;  %3615 = vperm.xlu1 %5873, %v11601_v14   ;;  %v7789_v10 = vsel %vm2245_vm1, %v11603_v13, %v11602_v23  ;;  %11605 = vst [vmem:[#allocation147_spill] sm:$0xff] %v7794_v48  ;;  %v7802_v3 = vmul.f32 %v6998_v37, %v6609_v52  ;;  %v7807_v23 = vpop.permute.xlu1 %1970  ;;  %v3354_v16 = vcombine.high %v7463_v22, %v7463_v22  ;;  %v7828_v22 = vpop.permute.xlu0 %5079 }
 0x135   :  { %11604 = vst [vmem:[#allocation87_spill] sm:$0xff] %v7789_v10  ;;  %11606 = vst [vmem:[#allocation148_spill] sm:$0xff] %v7798_v21  ;;  %v11610_v4 = vrot.slane %v7563_v43, 2  ;;  %v7826_v13 = vmul.f32 %v7035_v6, %v6592_v47  ;;  %v7833_v43 = vmul.f32 %v7035_v6, %v6609_v52  ;;  %v7847_v10 = vmul.f32 %v11617_v2, %v6580_v45  ;;  %v11618_v6 = vld [vmem:[#allocation85_spill] sm:$0xff] }
 0x136   :  { %11607 = vst [vmem:[#allocation149_spill] sm:$0xff] %v7802_v3  ;;  %11608 = vst [vmem:[#allocation150_spill] sm:$0xff] %v7807_v23  ;;  %v11619_v23 = vrot.slane %v11618_v6, %v6032_v12  ;;  %v7868_v59 = vrot.slane %v3354_v16, %v6032_v12  ;;  %v7889_v16 = vld [vmem:[%s10972_s0] sm:$0xff]  ;;  %v7911_v6 = vmul.f32 %v7106_v57, %v6609_v52 }
 0x137   :  { %2991 = vperm.xlu0 %5905, %v6988_v56   ;;  %v7816_v61 = vsel %vm2245_vm1, %v11610_v4, %v11609_v7  ;;  %11612 = vst [vmem:[#allocation152_spill] sm:$0xff] %v7828_v22  ;;  %11613 = vst [vmem:[#allocation153_spill] sm:$0xff] %v7833_v43  ;;  %v11614_v4 = vmov 1   ;;  %v11615_v7 = vcombine.high %v6804_v50, %v6804_v50  ;;  %v7855_v50 = vmul.f32 %v11617_v2, %v6592_v47  ;;  %v11622_v22 = vld [vmem:[#allocation7_spill] sm:$0xff] }
 0x138   :  { %11611 = vst [vmem:[#allocation151_spill] sm:$0xff] %v7816_v61  ;;  %5875 = vset.pattern.permute.xlu1 %v11614_v4  ;;  %v7863_v56 = vmul.f32 %v11622_v22, %v6580_v45  ;;  %v7865_v61 = vpop.permute.xlu1 %1978  ;;  %11624 = vst [vmem:[#allocation92_spill] sm:$0xff] %v7868_v59  ;;  %v7874_v36 = vmul.f32 %v11622_v22, %v6592_v47  ;;  %v7876_v3 = vpop.permute.xlu0 %5083  ;;  %v7893_v47 = vmul.f32 %v7889_v16, %v7106_v57 }
 0x139   :  { %v7840_v37 = vrot.slane %v11615_v7, %v6030_v11  ;;  %4111 = vperm.xlu1 %5875, %v11620_v39   ;;  %v7859_v7 = vmul.f32 %v11617_v2, %v6609_v52  ;;  %11623 = vst [vmem:[#allocation85_spill] sm:$0xff] %v7865_v61  ;;  %11625 = vst [vmem:[#allocation7_spill] sm:$0xff] %v7876_v3  ;;  %v7879_v2 = vsel %vm1240_vm0, %v1291_v42, %v1292_v58  ;;  %v11632_v3 = vld [vmem:[#allocation95_spill] sm:$0xff] }
 0x13a   :  { %11626 = vst [vmem:[#allocation155_spill] sm:$0xff] %v7879_v2  ;;  %v7884_v61 = vmul.f32 %v11622_v22, %v6609_v52  ;;  %11628 = vst [vmem:[#allocation157_spill] sm:$0xff] %v7893_v47  ;;  %v7903_v22 = vld [vmem:[%s10972_s0 + $0x8] sm:$0xff]  ;;  %v11633_v2 = vld [vmem:[#allocation14_spill] sm:$0xff]  ;;  %v11634_v59 = vrot.slane %v7729_v26, 1 }
 0x13b   :  { %11616 = vst [vmem:[#allocation154_spill] sm:$0xff] %v7840_v37  ;;  %2999 = vperm.xlu0 %5905, %v11619_v23   ;;  %11621 = vst [vmem:[#allocation94_spill] sm:$0xff] %v7859_v7  ;;  %v7897_v23 = vrot.slane %v7840_v37, %v6030_v11  ;;  %v7907_v45 = vmul.f32 %v7903_v22, %v7106_v57  ;;  %v11637_v52 = vld [vmem:[#allocation20_spill] sm:$0xff]  ;;  %v7943_v21 = vmul.f32 %v7903_v22, %v7150_v49 }
 0x13c   :  { %11627 = vst [vmem:[#allocation156_spill] sm:$0xff] %v7884_v61  ;;  %11631 = vst [vmem:[#allocation160_spill] sm:$0xff] %v7911_v6  ;;  %v7918_v42 = vsel %vm1240_vm0, %v1292_v58, %v11634_v59  ;;  %v7923_v51 = vpop.permute.xlu1 %1986  ;;  %v11638_v57 = vcombine.high %v11637_v52, %v11637_v52  ;;  %v7939_v58 = vmul.f32 %v7889_v16, %v7150_v49  ;;  %v7948_v52 = vld [vmem:[%s10972_s0 + $0x10] sm:$0xf]  ;;  %v7954_v48 = vpop.permute.xlu0 %5099  ;;  %v11648_v59 = vmov 2  }
 0x13d   :  { %11629 = vst [vmem:[#allocation158_spill] sm:$0xff] %v7897_v23  ;;  %11630 = vst [vmem:[#allocation159_spill] sm:$0xff] %v7907_v45  ;;  %4115 = vperm.xlu1 %5875, %v11633_v2   ;;  %v7934_v2 = vld [vmem:[%s10975_s3 + $0x10] sm:$0xff]  ;;  %v7960_v26 = vrot.slane %v7897_v23, %v6032_v12  ;;  %v11649_v23 = vrot.slane %v7615_v8, 2  ;;  %v11663_v8 = vld [vmem:[#allocation103_spill] sm:$0xff] }
 0x13e   :  { %11635 = vst [vmem:[#allocation95_spill] sm:$0xff] %v7918_v42  ;;  %11636 = vst [vmem:[#allocation14_spill] sm:$0xff] %v7923_v51  ;;  %v11643_v42 = vrot.slane %v7611_v46, 2  ;;  %v11644_v51 = vrot.slane %v7607_v29, 2  ;;  %v11652_v29 = vld [vmem:[#allocation102_spill] sm:$0xff]  ;;  %v11671_v45 = vld [vmem:[#allocation15_spill] sm:$0xff] }
 0x13f   :  { %3007 = vperm.xlu0 %5905, %v11632_v3   ;;  %v7929_v3 = vrot.slane %v11638_v57, %v6032_v12  ;;  %v7952_v57 = vmul.f32 %v7948_v52, %v7150_v49  ;;  %11641 = vst [vmem:[#allocation162_spill] sm:$0xff] %v7954_v48  ;;  %11642 = vst [vmem:[#allocation163_spill] sm:$0xff] %v7960_v26  ;;  %v11646_v48 = vld [vmem:[#allocation93_spill] sm:$0xff] }
 0x140   :  { %v11647_v34 = vrot.slane %v11646_v48, %v6032_v12  ;;  %v11650_v26 = vmov %v11643_v42  ;;  %v7990_v48 = vmul.f32 %v7903_v22, %v11652_v29  ;;  %v7997_v46 = vpop.permute.xlu1 %1994 }
 0x141   :  { %11639 = vst [vmem:[#allocation20_spill] sm:$0xff] %v7929_v3  ;;  %11640 = vst [vmem:[#allocation161_spill] sm:$0xff] %v7952_v57  ;;  %v7967_v3 = vsel %vm2245_vm1, %v11644_v51, %v11643_v42  ;;  %5876 = vset.pattern.permute.xlu1 %v11648_v59  ;;  %v7980_v47 = vsel %vm2245_vm1, %v11650_v26, %v11649_v23  ;;  %v3363_v51 = vrot.slane %v7934_v2, %v6030_v11 }
 0x142   :  { %11645 = vst [vmem:[#allocation164_spill] sm:$0xff] %v7967_v3  ;;  %11651 = vst [vmem:[#allocation93_spill] sm:$0xff] %v7980_v47  ;;  %v7986_v42 = vmul.f32 %v7889_v16, %v11652_v29  ;;  %5051 = vperm.xlu1 %5876, %v11620_v39   ;;  %v11655_v26 = vrot.slane %v7768_v44, 1  ;;  %v11656_v23 = vrot.slane %v7764_v40, 1  ;;  %v11658_v3 = vld [vmem:[#allocation9_spill] sm:$0xff]  ;;  %v8013_v39 = vpop.permute.xlu0 %5103  ;;  %v8065_v57 = vmul.f32 %v7948_v52, %v7238_v5 }
 0x143   :  { %3015 = vperm.xlu0 %5905, %v11647_v34   ;;  %v7994_v34 = vmul.f32 %v7948_v52, %v11652_v29  ;;  %11654 = vst [vmem:[#allocation165_spill] sm:$0xff] %v7997_v46  ;;  %v8011_v29 = vmul.f32 %v7889_v16, %v11658_v3  ;;  %11659 = vst [vmem:[#allocation9_spill] sm:$0xff] %v8013_v39  ;;  %v8017_v46 = vmul.f32 %v7903_v22, %v11658_v3 }
 0x144   :  { %v8004_v37 = vsel %vm1240_vm0, %v11656_v23, %v11655_v26  ;;  %v8021_v40 = vmul.f32 %v7948_v52, %v11658_v3  ;;  %v11661_v26 = vld [vmem:[#allocation109_spill] sm:$0xff]  ;;  %v11664_v39 = vrot.slane %v7781_v30, 1  ;;  %v8044_v59 = vrot.slane %v3363_v51, %v6030_v11  ;;  %11669 = vst [vmem:[#allocation170_spill] sm:$0xff] %v8065_v57 }
 0x145   :  { %11653 = vst [vmem:[#allocation102_spill] sm:$0xff] %v7994_v34  ;;  %11657 = vst [vmem:[#allocation166_spill] sm:$0xff] %v8004_v37  ;;  %v8025_v23 = vmul.f32 %v7889_v16, %v11661_v26  ;;  %v8029_v47 = vmul.f32 %v7903_v22, %v11661_v26  ;;  %v8033_v49 = vmul.f32 %v7948_v52, %v11661_v26  ;;  %v11665_v37 = vrot.slane %v7768_v44, 1  ;;  %v8050_v26 = vpop.permute.xlu1 %2002 }
 0x146   :  { %11660 = vst [vmem:[#allocation167_spill] sm:$0xff] %v8021_v40  ;;  %11667 = vst [vmem:[#allocation168_spill] sm:$0xff] %v8044_v59  ;;  %5877 = vset.pattern.permute.xlu1 %v11614_v4  ;;  %v8067_v6 = vpop.permute.xlu0 %5119  ;;  %v11672_v4 = vld [vmem:[#allocation101_spill] sm:$0xff]  ;;  %v8088_v30 = vmul.f32 %v7903_v22, %v7257_v9  ;;  %v11685_v44 = vrot.slane %v7651_v19, 2 }
 0x147   :  { %11662 = vst [vmem:[#allocation109_spill] sm:$0xff] %v8033_v49  ;;  %3023 = vperm.xlu0 %5905, %v11663_v8   ;;  %v8041_v3 = vsel %vm1240_vm0, %v11665_v37, %v11664_v39  ;;  %11668 = vst [vmem:[#allocation169_spill] sm:$0xff] %v8050_v26  ;;  %v8057_v37 = vmul.f32 %v7889_v16, %v7238_v5  ;;  %v8061_v39 = vmul.f32 %v7903_v22, %v7238_v5 }
 0x148   :  { %11666 = vst [vmem:[#allocation103_spill] sm:$0xff] %v8041_v3  ;;  %11670 = vst [vmem:[#allocation171_spill] sm:$0xff] %v8067_v6  ;;  %4119 = vperm.xlu1 %5877, %v11671_v45   ;;  %v11673_v34 = vrot.slane %v11672_v4, %v6032_v12  ;;  %v8080_v5 = vrot.slane %v8044_v59, %v6032_v12  ;;  %v3371_v6 = vcombine.high %v3363_v51, %v3363_v51 }
 0x149   :  { %v8084_v45 = vmul.f32 %v7889_v16, %v7257_v9  ;;  %v8092_v26 = vmul.f32 %v7948_v52, %v7257_v9  ;;  %v8094_v3 = vpop.permute.xlu1 %2010  ;;  %v11678_v4 = vrot.slane %v7651_v19, 2  ;;  %v11684_v59 = vrot.slane %v7658_v27, 2 }
 0x14a   :  { %11674 = vst [vmem:[#allocation15_spill] sm:$0xff] %v8080_v5  ;;  %11677 = vst [vmem:[#allocation173_spill] sm:$0xff] %v8094_v3  ;;  %v8108_v5 = vmul.f32 %v7889_v16, %v7295_v38  ;;  %v8110_v9 = vpop.permute.xlu0 %5123  ;;  %v11682_v3 = vld [vmem:[#allocation16_spill] sm:$0xff]  ;;  %v8149_v19 = vrot.slane %v3371_v6, %v6030_v11  ;;  %v8167_v6 = vmul.f32 %v7948_v52, %v7338_v55 }
 0x14b   :  { %3031 = vperm.xlu0 %5905, %v11673_v34   ;;  %11675 = vst [vmem:[#allocation101_spill] sm:$0xff] %v8084_v45  ;;  %11676 = vst [vmem:[#allocation172_spill] sm:$0xff] %v8092_v26  ;;  %v11679_v34 = vrot.slane %v7640_v35, 2  ;;  %v8115_v35 = vmul.f32 %v7903_v22, %v7295_v38  ;;  %v8130_v8 = vsel %vm2245_vm1, %v11685_v44, %v11684_v59  ;;  %v11695_v59 = vld [vmem:[#allocation17_spill] sm:$0xff]  ;;  %v11697_v44 = vrot.slane %v7826_v13, 1 }
 0x14c   :  { %11681 = vst [vmem:[#allocation175_spill] sm:$0xff] %v8110_v9  ;;  %4123 = vperm.xlu1 %5877, %v11682_v3   ;;  %11686 = vst [vmem:[#allocation176_spill] sm:$0xff] %v8130_v8  ;;  %v8134_v3 = vmul.f32 %v7903_v22, %v7308_v28  ;;  %v8138_v9 = vmul.f32 %v7948_v52, %v7308_v28  ;;  %v11696_v8 = vrot.slane %v7833_v43, 1 }
 0x14d   :  { %v8101_v51 = vsel %vm2245_vm1, %v11679_v34, %v11678_v4  ;;  %v8119_v4 = vmul.f32 %v7948_v52, %v7295_v38  ;;  %v8123_v34 = vmul.f32 %v7889_v16, %v7308_v28  ;;  %v11688_v38 = vrot.slane %v7826_v13, 1  ;;  %11691 = vst [vmem:[#allocation179_spill] sm:$0xff] %v8149_v19  ;;  %11693 = vst [vmem:[#allocation181_spill] sm:$0xff] %v8167_v6 }
 0x14e   :  { %11680 = vst [vmem:[#allocation174_spill] sm:$0xff] %v8101_v51  ;;  %11687 = vst [vmem:[#allocation177_spill] sm:$0xff] %v8138_v9  ;;  %v11689_v51 = vrot.slane %v7822_v63, 1  ;;  %v8156_v28 = vmul.f32 %v7889_v16, %v7338_v55  ;;  %v8192_v13 = vmul.f32 %v7889_v16, %v7354_v24  ;;  %v8208_v43 = vmul.f32 %v7948_v52, %v7354_v24 }
 0x14f   :  { %11683 = vst [vmem:[#allocation16_spill] sm:$0xff] %v8119_v4  ;;  %3039 = vperm.xlu0 %5905, %v7260_v33   ;;  %v8158_v33 = vpop.permute.xlu1 %2018 }
 0x150   :  { %v8146_v27 = vsel %vm1240_vm0, %v11689_v51, %v11688_v38  ;;  %11692 = vst [vmem:[#allocation180_spill] sm:$0xff] %v8158_v33  ;;  %v8163_v51 = vmul.f32 %v7903_v22, %v7338_v55  ;;  %v8169_v38 = vpop.permute.xlu0 %5139  ;;  %4127 = vperm.xlu1 %5877, %v11695_v59   ;;  %v11699_v55 = vld [vmem:[#allocation21_spill] sm:$0xff]  ;;  %11703 = vst [vmem:[#allocation183_spill] sm:$0xff] %v8208_v43  ;;  %v11705_v59 = vrot.slane %v7698_v17, 2  ;;  %v11715_v17 = vrot.slane %v7874_v36, 1 }
 0x151   :  { %11690 = vst [vmem:[#allocation178_spill] sm:$0xff] %v8146_v27  ;;  %11694 = vst [vmem:[#allocation182_spill] sm:$0xff] %v8169_v38  ;;  %v8177_v27 = vsel %vm1240_vm0, %v11697_v44, %v11696_v8  ;;  %v11700_v45 = vcombine.high %v11699_v55, %v11699_v55  ;;  %v11702_v8 = vrot.slane %v7263_v1, %v6032_v12  ;;  %v11706_v1 = vrot.slane %v7694_v0, 2 }
 0x152   :  { %11698 = vst [vmem:[#allocation17_spill] sm:$0xff] %v8177_v27  ;;  %v8199_v44 = vrot.slane %v8149_v19, %v6032_v12  ;;  %v11709_v27 = vld [vmem:[#allocation18_spill] sm:$0xff]  ;;  %v11711_v19 = vmov %v11705_v59  ;;  %v11713_v0 = vcombine.high %v7934_v2, %v7934_v2  ;;  %v8241_v55 = vmul.f32 %v7903_v22, %v7393_v53 }
 0x153   :  { %v8186_v38 = vrot.slane %v11700_v45, %v6032_v12  ;;  %3047 = vperm.xlu0 %5905, %v11702_v8   ;;  %v8204_v45 = vmul.f32 %v7903_v22, %v7354_v24  ;;  %v8210_v26 = vpop.permute.xlu1 %2026  ;;  %v8217_v8 = vsel %vm2245_vm1, %v11706_v1, %v11705_v59  ;;  %v11710_v24 = vrot.slane %v7702_v31, 2  ;;  %v11721_v31 = vld [vmem:[#allocation19_spill] sm:$0xff] }
 0x154   :  { %11704 = vst [vmem:[#allocation184_spill] sm:$0xff] %v8210_v26  ;;  %11707 = vst [vmem:[#allocation185_spill] sm:$0xff] %v8217_v8  ;;  %v8221_v63 = vpop.permute.xlu0 %5143  ;;  %4131 = vperm.xlu1 %5877, %v11709_v27   ;;  %v3370_v59 = vrot.slane %v11713_v0, %v6030_v11  ;;  %v8237_v1 = vmul.f32 %v7889_v16, %v7393_v53  ;;  %v8245_v27 = vmul.f32 %v7948_v52, %v7393_v53 }
 0x155   :  { %11701 = vst [vmem:[#allocation21_spill] sm:$0xff] %v8186_v38  ;;  %11708 = vst [vmem:[#allocation186_spill] sm:$0xff] %v8221_v63  ;;  %v8229_v26 = vsel %vm2245_vm1, %v11711_v19, %v11710_v24  ;;  %v11716_v19 = vrot.slane %v7863_v56, 1  ;;  %v8257_v0 = vmul.f32 %v7889_v16, %v7408_v25  ;;  %v8261_v33 = vmul.f32 %v7903_v22, %v7408_v25 }
 0x156   :  { %11712 = vst [vmem:[#allocation18_spill] sm:$0xff] %v8229_v26  ;;  %11714 = vst [vmem:[#allocation187_spill] sm:$0xff] %v8245_v27  ;;  %v8265_v53 = vmul.f32 %v7948_v52, %v7408_v25  ;;  %v8276_v2 = vmul.f32 %v7903_v22, %v7445_v15  ;;  %v8282_v25 = vmul.f32 %v7948_v52, %v7445_v15  ;;  %v11725_v26 = vrot.slane %v7847_v10, 2 }
 0x157   :  { %v8252_v24 = vsel %vm1240_vm0, %v11716_v19, %v11715_v17  ;;  %3055 = vperm.xlu0 %5905, %v7357_v32   ;;  %v8272_v19 = vmul.f32 %v7889_v16, %v7445_v15  ;;  %v8278_v63 = vpop.permute.xlu1 %2034  ;;  %v11722_v32 = vrot.slane %v7884_v61, 1  ;;  %v11728_v10 = vrot.slane %v7360_v60, %v6032_v12 }
 0x158   :  { %11717 = vst [vmem:[#allocation188_spill] sm:$0xff] %v8252_v24  ;;  %11718 = vst [vmem:[#allocation189_spill] sm:$0xff] %v8265_v53  ;;  %4135 = vperm.xlu1 %5877, %v11721_v31   ;;  %v11724_v24 = vrot.slane %v7855_v50, 2  ;;  %v8302_v61 = vpop.permute.xlu0 %365  ;;  %v8334_v50 = vld [vmem:[%s10975_s3 + $0x18] sm:$0xff]  ;;  %v11740_v31 = vrot.slane %v7939_v58, 1  ;;  %v8369_v58 = vmul.f32 %v7903_v22, %v7515_v62 }
 0x159   :  { %11719 = vst [vmem:[#allocation190_spill] sm:$0xff] %v8278_v63  ;;  %11720 = vst [vmem:[#allocation191_spill] sm:$0xff] %v8282_v25  ;;  %v8290_v56 = vsel %vm1240_vm0, %v11715_v17, %v11722_v32  ;;  %v3372_v63 = vcombine.high %v3370_v59, %v3370_v59  ;;  %v11732_v17 = vrot.slane %v7750_v20, 2  ;;  %v11733_v32 = vrot.slane %v7743_v18, 2 }
 0x15a   :  { %11723 = vst [vmem:[#allocation19_spill] sm:$0xff] %v8290_v56  ;;  %v8297_v8 = vsel %vm2245_vm1, %v11725_v26, %v11724_v24  ;;  %11727 = vst [vmem:[#allocation193_spill] sm:$0xff] %v8302_v61  ;;  %v11729_v26 = vrot.slane %v7859_v7, 2  ;;  %v11737_v18 = vrot.slane %v7754_v54, 2  ;;  %v2060_v20 = vmul.f32 %v7903_v22, %v7573_v41 }
 0x15b   :  { %11726 = vst [vmem:[#allocation192_spill] sm:$0xff] %v8297_v8  ;;  %3587 = vperm.xlu0 %5905, %v11728_v10   ;;  %v8319_v36 = vpop.permute.xlu1 %2042  ;;  %v8326_v60 = vsel %vm2245_vm1, %v11733_v32, %v11732_v17  ;;  %v8329_v10 = vrot.slane %v3370_v59, %v6030_v11  ;;  %v11739_v59 = vrot.slane %v7943_v21, 1  ;;  %v11752_v8 = vld [vmem:[#allocation157_spill] sm:$0xff] }
 0x15c   :  { %v8315_v15 = vsel %vm2245_vm1, %v11724_v24, %v11729_v26  ;;  %11731 = vst [vmem:[#allocation195_spill] sm:$0xff] %v8319_v36  ;;  %11734 = vst [vmem:[#allocation196_spill] sm:$0xff] %v8326_v60  ;;  %4139 = vperm.xlu1 %5877, %v11601_v14   ;;  %v8339_v24 = vrot.slane %v3372_v63, %v6030_v11  ;;  %v8346_v32 = vsel %vm2245_vm1, %v11732_v17, %v11737_v18  ;;  %v8363_v26 = vpop.permute.xlu0 %369  ;;  %v11743_v18 = vld [vmem:[#allocation154_spill] sm:$0xff]  ;;  %v11745_v36 = vld [vmem:[#allocation161_spill] sm:$0xff] }
 0x15d   :  { %11730 = vst [vmem:[#allocation194_spill] sm:$0xff] %v8315_v15  ;;  %11735 = vst [vmem:[#allocation197_spill] sm:$0xff] %v8329_v10  ;;  %v8353_v38 = vsel %vm1240_vm0, %v11740_v31, %v11739_v59  ;;  %v8357_v14 = vmul.f32 %v7889_v16, %v7515_v62  ;;  %v2059_v63 = vmul.f32 %v7889_v16, %v7573_v41  ;;  %v11744_v59 = vld [vmem:[#allocation59_spill] sm:$0xff]  ;;  %v11746_v54 = vrot.slane %v11745_v36, 1  ;;  %v11755_v36 = vld [vmem:[#allocation160_spill] sm:$0xff] }
 0x15e   :  { %11736 = vst [vmem:[#allocation198_spill] sm:$0xff] %v8339_v24  ;;  %11738 = vst [vmem:[#allocation199_spill] sm:$0xff] %v8346_v32  ;;  %v3847_v17 = vcombine.high %v11743_v18, %v11743_v18  ;;  %v8373_v31 = vmul.f32 %v7948_v52, %v7515_v62  ;;  %v3412_v18 = vrot.slane %v8334_v50, %v6030_v11  ;;  %v11750_v15 = vld [vmem:[#allocation159_spill] sm:$0xff]  ;;  %v11753_v56 = vrot.slane %v11752_v8, 2  ;;  %v11761_v8 = vld [vmem:[#allocation148_spill] sm:$0xff] }
 0x15f   :  { %11741 = vst [vmem:[#allocation200_spill] sm:$0xff] %v8353_v38  ;;  %11742 = vst [vmem:[#allocation201_spill] sm:$0xff] %v8363_v26  ;;  %3595 = vperm.xlu0 %5905, %v11744_v59   ;;  %v11747_v38 = vrot.slane %v7943_v21, 1  ;;  %v2061_v32 = vmul.f32 %v7948_v52, %v7573_v41  ;;  %v8387_v60 = vpop.permute.xlu1 %2050  ;;  %v11751_v62 = vrot.slane %v11750_v15, 2  ;;  %v11756_v21 = vrot.slane %v11755_v36, 2  ;;  %v11759_v41 = vld [vmem:[#allocation127_spill] sm:$0xff] }
 0x160   :  { %11749 = vst [vmem:[#allocation59_spill] sm:$0xff] %v8387_v60  ;;  %4143 = vperm.xlu1 %5877, %v11759_v41   ;;  %v8408_v60 = vrot.slane %v8339_v24, %v6032_v12  ;;  %v11762_v61 = vrot.slane %v11761_v8, 2  ;;  %v11766_v15 = vld [vmem:[#allocation149_spill] sm:$0xff] }
 0x161   :  { %v8381_v7 = vsel %vm1240_vm0, %v11747_v38, %v11746_v54  ;;  %v8394_v59 = vsel %vm2245_vm1, %v11753_v56, %v11751_v62  ;;  %v11757_v54 = vmov %v11751_v62  ;;  %v11763_v56 = vld [vmem:[#allocation147_spill] sm:$0xff] }
 0x162   :  { %11748 = vst [vmem:[#allocation154_spill] sm:$0xff] %v8381_v7  ;;  %11754 = vst [vmem:[#allocation159_spill] sm:$0xff] %v8394_v59  ;;  %v8401_v38 = vsel %vm2245_vm1, %v11757_v54, %v11756_v21  ;;  %v3402_v7 = vcombine.high %v8329_v10, %v8329_v10  ;;  %v11764_v62 = vrot.slane %v11763_v56, 2  ;;  %v11767_v59 = vrot.slane %v11766_v15, 2 }
 0x163   :  { %11758 = vst [vmem:[#allocation157_spill] sm:$0xff] %v8401_v38  ;;  %11760 = vst [vmem:[#allocation127_spill] sm:$0xff] %v8408_v60  ;;  %v11768_v21 = vmov %v11762_v61  ;;  %v11770_v38 = vrot.slane %v8017_v46, 1  ;;  %v11771_v10 = vrot.slane %v8011_v29, 1  ;;  %v2256_v56 = vrot.slane %v2059_v63, 2 }
 0x164   :  { %v8415_v36 = vsel %vm2245_vm1, %v11764_v62, %v11762_v61  ;;  %v8422_v54 = vsel %vm2245_vm1, %v11768_v21, %v11767_v59  ;;  %v2257_v60 = vrot.slane %v2060_v20, 2  ;;  %v8432_v61 = vpop.permute.xlu0 %381  ;;  %v8435_v62 = vrot.slane %v3847_v17, %v6030_v11  ;;  %v11773_v21 = vld [vmem:[#allocation67_spill] sm:$0xff]  ;;  %v11779_v59 = vld [vmem:[#allocation70_spill] sm:$0xff] }
 0x165   :  { %11765 = vst [vmem:[#allocation148_spill] sm:$0xff] %v8415_v36  ;;  %11769 = vst [vmem:[#allocation147_spill] sm:$0xff] %v8422_v54  ;;  %v8429_v24 = vsel %vm1240_vm0, %v11771_v10, %v11770_v38  ;;  %v11774_v15 = vrot.slane %v11773_v21, %v6032_v12  ;;  %v8443_v29 = vrot.slane %v3412_v18, %v6030_v11  ;;  %v2259_v38 = vrot.slane %v2061_v32, 2  ;;  %v8464_v32 = vpop.permute.xlu1 %2935 }
 0x166   :  { %11772 = vst [vmem:[#allocation202_spill] sm:$0xff] %v8429_v24  ;;  %v3420_v10 = vcombine.high %v3412_v18, %v3412_v18  ;;  %v8446_v63 = vrot.slane %v3402_v7, %v6032_v12  ;;  %v11776_v20 = vrot.slane %v8021_v40, 1  ;;  %v11777_v17 = vrot.slane %v8017_v46, 1  ;;  %v11780_v18 = vld [vmem:[#allocation66_spill] sm:$0xff]  ;;  %11781 = vst [vmem:[#allocation70_spill] sm:$0xff] %v8464_v32 }
 0x167   :  { %3603 = vperm.xlu0 %5905, %v11774_v15   ;;  %11775 = vst [vmem:[#allocation67_spill] sm:$0xff] %v8443_v29  ;;  %v8457_v8 = vmul.f32 %v7889_v16, %v11779_v59  ;;  %v8461_v15 = vmul.f32 %v7903_v22, %v11779_v59  ;;  %4147 = vperm.xlu1 %5877, %v11780_v18   ;;  %v11782_v7 = vrot.slane %v7990_v48, 2  ;;  %v11783_v21 = vrot.slane %v7986_v42, 2 }
 0x168   :  { %v8453_v26 = vsel %vm1240_vm0, %v11777_v17, %v11776_v20  ;;  %v11785_v20 = vld [vmem:[#allocation102_spill] sm:$0xff]  ;;  %v8482_v24 = vmul.f32 %v7948_v52, %v11779_v59  ;;  %v8484_v54 = vpop.permute.xlu0 %389  ;;  %v2258_v36 = vsel %vm2245_vm1, %v2256_v56, %v2257_v60  ;;  %v8489_v42 = vrot.slane %v8435_v62, %v6032_v12 }
 0x169   :  { %11778 = vst [vmem:[#allocation203_spill] sm:$0xff] %v8453_v26  ;;  %v8471_v46 = vsel %vm2245_vm1, %v11783_v21, %v11782_v7  ;;  %v11786_v17 = vrot.slane %v11785_v20, 2  ;;  %v11787_v40 = vmov %v11782_v7  ;;  %v11789_v7 = vld [vmem:[#allocation23_spill] sm:$0xff]  ;;  %v3450_v48 = vcombine.high %v8443_v29, %v8443_v29 }
 0x16a   :  { %11784 = vst [vmem:[#allocation66_spill] sm:$0xff] %v8471_v46  ;;  %v11790_v20 = vld [vmem:[#allocation139_spill] sm:$0xff]  ;;  %v11792_v59 = vrot.slane %v8057_v37, 1  ;;  %v11794_v56 = vrot.slane %v8065_v57, 1  ;;  %v8511_v21 = vrot.slane %v3420_v10, %v6030_v11  ;;  %v11798_v29 = vrot.slane %v8029_v47, 2 }
 0x16b   :  { %v8478_v26 = vsel %vm2245_vm1, %v11787_v40, %v11786_v17  ;;  %3611 = vperm.xlu0 %5905, %v11790_v20   ;;  %v11791_v40 = vrot.slane %v8061_v39, 1  ;;  %v2260_v20 = vsel %vm2245_vm1, %v2257_v60, %v2259_v38  ;;  %v11799_v32 = vrot.slane %v8025_v23, 2  ;;  %v8533_v23 = vpop.permute.xlu1 %2939 }
 0x16c   :  { %11788 = vst [vmem:[#allocation204_spill] sm:$0xff] %v8478_v26  ;;  %11797 = vst [vmem:[#allocation205_spill] sm:$0xff] %v8511_v21  ;;  %v11805_v57 = vmov 0   ;;  %v8554_v60 = vpop.permute.xlu0 %397  ;;  %v3452_v47 = vcombine.high %v8511_v21, %v8511_v21 }
 0x16d   :  { %v8501_v17 = vsel %vm1240_vm0, %v11792_v59, %v11791_v40  ;;  %v11795_v26 = vmov %v11791_v40  ;;  %v8519_v37 = vsel %vm2245_vm1, %v11799_v32, %v11798_v29  ;;  %v11801_v40 = vrot.slane %v8033_v49, 2  ;;  %5878 = vset.pattern.permute.xlu1 %v11805_v57  ;;  %v11807_v49 = vld [vmem:[#allocation64_spill] sm:$0xff] }
 0x16e   :  { %11793 = vst [vmem:[#allocation23_spill] sm:$0xff] %v8501_v17  ;;  %v8508_v46 = vsel %vm1240_vm0, %v11795_v26, %v11794_v56  ;;  %11800 = vst [vmem:[#allocation206_spill] sm:$0xff] %v8519_v37  ;;  %v11802_v59 = vmov %v11798_v29  ;;  %v11804_v26 = vld [vmem:[#allocation158_spill] sm:$0xff]  ;;  %v2261_v56 = vrot.slane %v8457_v8, 2  ;;  %v8539_v37 = vadd.f32 %v2259_v38, %v11807_v49  ;;  %3619 = vperm.xlu1 %5878, %v11759_v41   ;;  %v11811_v49 = vld [vmem:[#allocation61_spill] sm:$0xff] }
 0x16f   :  { %11796 = vst [vmem:[#allocation139_spill] sm:$0xff] %v8508_v46  ;;  %v8526_v39 = vsel %vm2245_vm1, %v11802_v59, %v11801_v40  ;;  %v3877_v10 = vcombine.high %v11804_v26, %v11804_v26  ;;  %v11806_v29 = vld [vmem:[#allocation82_spill] sm:$0xff]  ;;  %v11809_v40 = vld [vmem:[#allocation69_spill] sm:$0xff]  ;;  %v11813_v38 = vld [vmem:[#allocation92_spill] sm:$0xff]  ;;  %v11815_v46 = vrot.slane %v8108_v5, 1  ;;  %v11822_v5 = vrot.slane %v8088_v30, 2 }
 0x170   :  { %11803 = vst [vmem:[#allocation207_spill] sm:$0xff] %v8526_v39  ;;  %v8536_v32 = vadd.f32 %v2258_v36, %v11806_v29  ;;  %11808 = vst [vmem:[#allocation158_spill] sm:$0xff] %v8539_v37  ;;  %v8544_v59 = vmul.f32 %v7889_v16, %v11809_v40  ;;  %v8548_v8 = vmul.f32 %v7903_v22, %v11809_v40  ;;  %3627 = vperm.xlu0 %5905, %v11813_v38   ;;  %v11820_v17 = vld [vmem:[#allocation78_spill] sm:$0xff]  ;;  %v8591_v37 = vpop.permute.xlu1 %2947 }
 0x171   :  { %v8552_v26 = vmul.f32 %v7948_v52, %v11809_v40  ;;  %11810 = vst [vmem:[#allocation82_spill] sm:$0xff] %v8554_v60  ;;  %v8558_v36 = vadd.f32 %v2260_v20, %v11811_v49  ;;  %v8562_v29 = vrot.slane %v3450_v48, %v6032_v12  ;;  %v8567_v39 = vrot.slane %v3877_v10, %v6032_v12 }
 0x172   :  { %v11814_v40 = vrot.slane %v8115_v35, 1  ;;  %v11817_v20 = vrot.slane %v8119_v4, 1  ;;  %v8585_v21 = vmul.f32 %v7889_v16, %v11820_v17  ;;  %v8589_v10 = vmul.f32 %v7903_v22, %v11820_v17  ;;  %11821 = vst [vmem:[#allocation92_spill] sm:$0xff] %v8591_v37  ;;  %v11826_v35 = vld [vmem:[#allocation172_spill] sm:$0xff] }
 0x173   :  { %11812 = vst [vmem:[#allocation64_spill] sm:$0xff] %v8558_v36  ;;  %v2272_v36 = vrot.slane %v8548_v8, 2  ;;  %v8612_v60 = vmul.f32 %v7948_v52, %v11820_v17  ;;  %v8619_v30 = vrot.slane %v3452_v47, %v6032_v12  ;;  %v11840_v47 = vrot.slane %v8123_v34, 2 }
 0x174   :  { %v8574_v41 = vsel %vm1240_vm0, %v11815_v46, %v11814_v40  ;;  %v11818_v49 = vmov %v11814_v40  ;;  %v11823_v46 = vld [vmem:[#allocation101_spill] sm:$0xff] }
 0x175   :  { %11816 = vst [vmem:[#allocation69_spill] sm:$0xff] %v8574_v41  ;;  %v8581_v48 = vsel %vm1240_vm0, %v11818_v49, %v11817_v20  ;;  %v11824_v40 = vrot.slane %v11823_v46, 2  ;;  %v11827_v20 = vrot.slane %v11826_v35, 2  ;;  %v11828_v49 = vmov %v11822_v5  ;;  %v8614_v46 = vpop.permute.xlu0 %405  ;;  %v11838_v35 = vld [vmem:[#allocation20_spill] sm:$0xff] }
 0x176   :  { %11819 = vst [vmem:[#allocation61_spill] sm:$0xff] %v8581_v48  ;;  %v2271_v41 = vrot.slane %v8544_v59, 2  ;;  %v11833_v59 = vrot.slane %v8156_v28, 1  ;;  %v11842_v28 = vrot.slane %v8138_v9, 2  ;;  %v3879_v9 = vcombine.high %v8435_v62, %v8435_v62 }
 0x177   :  { %v8598_v4 = vsel %vm2245_vm1, %v11824_v40, %v11822_v5  ;;  %v8605_v48 = vsel %vm2245_vm1, %v11828_v49, %v11827_v20  ;;  %v11830_v5 = vmov 2   ;;  %v11831_v40 = vld [vmem:[#allocation163_spill] sm:$0xff]  ;;  %v11832_v20 = vrot.slane %v8163_v51, 1 }
 0x178   :  { %11825 = vst [vmem:[#allocation78_spill] sm:$0xff] %v8598_v4  ;;  %11829 = vst [vmem:[#allocation101_spill] sm:$0xff] %v8605_v48  ;;  %5879 = vset.pattern.permute.xlu1 %v11830_v5  ;;  %3631 = vperm.xlu0 %5905, %v11831_v40   ;;  %v11835_v49 = vrot.slane %v8167_v6, 1  ;;  %v11839_v48 = vrot.slane %v8134_v3, 2  ;;  %v2281_v51 = vrot.slane %v8585_v21, 2  ;;  %v11846_v21 = vrot.slane %v8241_v55, 1 }
 0x179   :  { %v8626_v8 = vsel %vm1240_vm0, %v11833_v59, %v11832_v20  ;;  %v11836_v17 = vmov %v11832_v20  ;;  %5087 = vperm.xlu1 %5879, %v11838_v35   ;;  %v11853_v6 = vrot.slane %v8204_v45, 2  ;;  %v11859_v55 = vrot.slane %v8276_v2, 1 }
 0x17a   :  { %11834 = vst [vmem:[#allocation163_spill] sm:$0xff] %v8626_v8  ;;  %v8633_v37 = vsel %vm1240_vm0, %v11836_v17, %v11835_v49  ;;  %v8641_v4 = vsel %vm2245_vm1, %v11840_v47, %v11839_v48  ;;  %v11843_v20 = vmov %v11839_v48  ;;  %v2282_v49 = vrot.slane %v8589_v10, 2  ;;  %v11845_v17 = vld [vmem:[#allocation86_spill] sm:$0xff]  ;;  %v8660_v48 = vpop.permute.xlu1 %2955 }
 0x17b   :  { %11837 = vst [vmem:[#allocation208_spill] sm:$0xff] %v8633_v37  ;;  %11841 = vst [vmem:[#allocation20_spill] sm:$0xff] %v8641_v4  ;;  %v8648_v59 = vsel %vm2245_vm1, %v11843_v20, %v11842_v28  ;;  %v8654_v35 = vmul.f32 %v7889_v16, %v11845_v17  ;;  %v8658_v34 = vmul.f32 %v7903_v22, %v11845_v17  ;;  %v8667_v28 = vpop.permute.xlu0 %413  ;;  %v11847_v10 = vrot.slane %v8237_v1, 1 }
 0x17c   :  { %11844 = vst [vmem:[#allocation209_spill] sm:$0xff] %v8648_v59  ;;  %v8665_v3 = vmul.f32 %v7948_v52, %v11845_v17  ;;  %v11849_v59 = vld [vmem:[#allocation15_spill] sm:$0xff]  ;;  %v11850_v47 = vrot.slane %v8245_v27, 1  ;;  %v11851_v4 = vmov %v11846_v21  ;;  %v11854_v37 = vrot.slane %v8192_v13, 2 }
 0x17d   :  { %v8674_v20 = vsel %vm1240_vm0, %v11847_v10, %v11846_v21  ;;  %3647 = vperm.xlu0 %5905, %v11849_v59   ;;  %v11856_v21 = vrot.slane %v8208_v43, 2  ;;  %v11857_v62 = vmov %v11853_v6  ;;  %5880 = vset.pattern.permute.xlu1 %v11805_v57  ;;  %v11862_v13 = vrot.slane %v8282_v25, 1 }
 0x17e   :  { %11848 = vst [vmem:[#allocation86_spill] sm:$0xff] %v8674_v20  ;;  %v8684_v17 = vsel %vm1240_vm0, %v11851_v4, %v11850_v47  ;;  %v8691_v1 = vsel %vm2245_vm1, %v11854_v37, %v11853_v6  ;;  %v11860_v4 = vrot.slane %v8272_v19, 1  ;;  %v11863_v6 = vmov %v11859_v55  ;;  %3623 = vperm.xlu1 %5880, %v11780_v18   ;;  %v11891_v20 = vld [vmem:[#allocation84_spill] sm:$0xff] }
 0x17f   :  { %11852 = vst [vmem:[#allocation15_spill] sm:$0xff] %v8684_v17  ;;  %11855 = vst [vmem:[#allocation210_spill] sm:$0xff] %v8691_v1  ;;  %v8698_v10 = vsel %vm2245_vm1, %v11857_v62, %v11856_v21  ;;  %v8713_v37 = vsel %vm1240_vm0, %v11863_v6, %v11862_v13  ;;  %v11865_v45 = vrot.slane %v8261_v33, 2  ;;  %v11866_v21 = vrot.slane %v8257_v0, 2 }
 0x180   :  { %11858 = vst [vmem:[#allocation211_spill] sm:$0xff] %v8698_v10  ;;  %v8706_v47 = vsel %vm1240_vm0, %v11860_v4, %v11859_v55  ;;  %11864 = vst [vmem:[#allocation213_spill] sm:$0xff] %v8713_v37  ;;  %v2291_v43 = vrot.slane %v8654_v35, 2  ;;  %v2292_v19 = vrot.slane %v8658_v34, 2  ;;  %v8725_v55 = vpop.permute.xlu1 %2963  ;;  %v11868_v2 = vrot.slane %v8265_v53, 2  ;;  %v11872_v35 = vld [vmem:[#allocation150_spill] sm:$0xff] }
 0x181   :  { %11861 = vst [vmem:[#allocation212_spill] sm:$0xff] %v8706_v47  ;;  %v8720_v62 = vsel %vm2245_vm1, %v11866_v21, %v11865_v45  ;;  %v11869_v4 = vmov %v11865_v45  ;;  %v11871_v0 = vrot.slane %v8461_v15, 2  ;;  %v2294_v45 = vrot.slane %v8665_v3, 2  ;;  %v8740_v21 = vpop.permute.xlu0 %421  ;;  %3651 = vperm.xlu0 %5905, %v8199_v44   ;;  %v11881_v37 = vld [vmem:[#allocation83_spill] sm:$0xff] }
 0x182   :  { %11867 = vst [vmem:[#allocation214_spill] sm:$0xff] %v8720_v62  ;;  %v8732_v13 = vsel %vm2245_vm1, %v11869_v4, %v11868_v2  ;;  %v2086_v34 = vmul.f32 %v7889_v16, %v11872_v35  ;;  %v8743_v18 = vrot.slane %v3879_v9, %v6032_v12  ;;  %v11873_v53 = vrot.slane %v8369_v58, 2  ;;  %5881 = vset.pattern.permute.xlu1 %v11830_v5 }
 0x183   :  { %11870 = vst [vmem:[#allocation215_spill] sm:$0xff] %v8732_v13  ;;  %v2263_v6 = vsel %vm2245_vm1, %v2261_v56, %v11871_v0  ;;  %v11874_v33 = vrot.slane %v8357_v14, 2  ;;  %v2087_v56 = vmul.f32 %v7903_v22, %v11872_v35  ;;  %v8756_v3 = vmul.f32 %v7948_v52, %v11872_v35  ;;  %v11877_v14 = vld [vmem:[#allocation22_spill] sm:$0xff] }
 0x184   :  { %v11875_v4 = vrot.slane %v8373_v31, 2  ;;  %v11876_v9 = vmov %v11873_v53  ;;  %v11879_v35 = vrot.slane %v8482_v24, 2  ;;  %v11880_v62 = vrot.slane %v8461_v15, 2 }
 0x185   :  { %v8750_v2 = vsel %vm2245_vm1, %v11874_v33, %v11873_v53  ;;  %v3929_v53 = vcombine.high %v8334_v50, %v8334_v50  ;;  %v11878_v33 = vcombine.high %v11877_v14, %v11877_v14  ;;  %v8780_v58 = vadd.f32 %v2263_v6, %v11881_v37  ;;  %v8791_v14 = vpop.permute.xlu1 %2971  ;;  %v11884_v37 = vld [vmem:[#allocation21_spill] sm:$0xff]  ;;  %v8799_v6 = vpop.permute.xlu0 %429 }
 0x186   :  { %v8764_v0 = vsel %vm2245_vm1, %v11876_v9, %v11875_v4  ;;  %v2265_v25 = vsel %vm2245_vm1, %v11880_v62, %v11879_v35  ;;  %v11883_v4 = vld [vmem:[#allocation85_spill] sm:$0xff]  ;;  %v2301_v15 = vrot.slane %v2086_v34, 2  ;;  %5091 = vperm.xlu1 %5881, %v11884_v37   ;;  %v11885_v35 = vld [vmem:[#allocation88_spill] sm:$0xff]  ;;  %v11886_v47 = vrot.slane %v8482_v24, 2  ;;  %v11889_v34 = vld [vmem:[#allocation127_spill] sm:$0xff] }
 0x187   :  { %v8772_v13 = vrot.slane %v11878_v33, %v6032_v12  ;;  %11882 = vst [vmem:[#allocation150_spill] sm:$0xff] %v8780_v58  ;;  %v8784_v9 = vmul.f32 %v7889_v16, %v11883_v4  ;;  %v8788_v50 = vmul.f32 %v7903_v22, %v11883_v4  ;;  %v2273_v33 = vsel %vm2245_vm1, %v2271_v41, %v2272_v36  ;;  %v11893_v24 = vld [vmem:[#allocation89_spill] sm:$0xff] }
 0x188   :  { %v8796_v62 = vmul.f32 %v7948_v52, %v11883_v4  ;;  %v8804_v10 = vadd.f32 %v11886_v47, %v11885_v35  ;;  %v11888_v1 = vrot.slane %v8552_v26, 2  ;;  %v2302_v17 = vrot.slane %v2087_v56, 2  ;;  %3667 = vperm.xlu0 %5905, %v11889_v34   ;;  %v11895_v35 = vld [vmem:[#allocation91_spill] sm:$0xff] }
 0x189   :  { %v2304_v41 = vrot.slane %v8756_v3, 2  ;;  %v2283_v4 = vsel %vm2245_vm1, %v2281_v51, %v2282_v49  ;;  %v8813_v37 = vrot.slane %v3929_v53, %v6030_v11  ;;  %v8816_v8 = vadd.f32 %v2265_v25, %v11891_v20  ;;  %v8831_v53 = vpop.permute.xlu1 %2979  ;;  %v11900_v25 = vld [vmem:[#allocation90_spill] sm:$0xff] }
 0x18a   :  { %11887 = vst [vmem:[#allocation22_spill] sm:$0xff] %v8804_v10  ;;  %v2275_v27 = vsel %vm2245_vm1, %v2272_v36, %v11888_v1  ;;  %v8819_v47 = vadd.f32 %v2273_v33, %v11893_v24  ;;  %v11896_v10 = vmov %v11888_v1  ;;  %v11898_v1 = vrot.slane %v8612_v60, 2  ;;  %11899 = vst [vmem:[#allocation127_spill] sm:$0xff] %v8831_v53  ;;  %v11902_v24 = vld [vmem:[#allocation14_spill] sm:$0xff]  ;;  %v11921_v53 = vld [vmem:[#allocation28_spill] sm:$0xff] }
 0x18b   :  { %11890 = vst [vmem:[#allocation83_spill] sm:$0xff] %v8813_v37  ;;  %11892 = vst [vmem:[#allocation85_spill] sm:$0xff] %v8816_v8  ;;  %v8824_v36 = vadd.f32 %v11896_v10, %v11895_v35  ;;  %v2311_v51 = vrot.slane %v8784_v9, 2  ;;  %v2312_v3 = vrot.slane %v8788_v50, 2  ;;  %v8834_v20 = vadd.f32 %v2275_v27, %v11900_v25  ;;  %v8840_v35 = vpop.permute.xlu0 %437 }
 0x18c   :  { %11894 = vst [vmem:[#allocation21_spill] sm:$0xff] %v8819_v47  ;;  %v2285_v56 = vsel %vm2245_vm1, %v2282_v49, %v11898_v1  ;;  %v2314_v33 = vrot.slane %v8796_v62, 2  ;;  %v2098_v26 = vmul.f32 %v7889_v16, %v11902_v24  ;;  %v11903_v10 = vmov 1   ;;  %11904 = vst [vmem:[#allocation89_spill] sm:$0xff] %v8840_v35  ;;  %v11907_v62 = vld [vmem:[#allocation97_spill] sm:$0xff]  ;;  %3671 = vperm.xlu0 %5905, %v8446_v63   ;;  %v11913_v47 = vld [vmem:[#allocation168_spill] sm:$0xff] }
 0x18d   :  { %11897 = vst [vmem:[#allocation88_spill] sm:$0xff] %v8824_v36  ;;  %11901 = vst [vmem:[#allocation84_spill] sm:$0xff] %v8834_v20  ;;  %5882 = vset.pattern.permute.xlu1 %v11903_v10  ;;  %v11905_v36 = vld [vmem:[#allocation41_spill] sm:$0xff]  ;;  %v2293_v9 = vsel %vm2245_vm1, %v2291_v43, %v2292_v19  ;;  %v8848_v50 = vmul.f32 %v7903_v22, %v11902_v24  ;;  %v8852_v27 = vmul.f32 %v7948_v52, %v11902_v24 }
 0x18e   :  { %v8843_v49 = vadd.f32 %v2283_v4, %v11905_v36  ;;  %4159 = vperm.xlu1 %5882, %v8489_v42   ;;  %v8856_v1 = vadd.f32 %v2285_v56, %v11907_v62  ;;  %v3945_v25 = vcombine.high %v8813_v37, %v8813_v37  ;;  %v11909_v4 = vld [vmem:[#allocation98_spill] sm:$0xff]  ;;  %v11910_v43 = vrot.slane %v8612_v60, 2  ;;  %v11914_v56 = vld [vmem:[#allocation165_spill] sm:$0xff]  ;;  %v8875_v37 = vpop.permute.xlu1 %2987  ;;  %v11918_v60 = vld [vmem:[#allocation44_spill] sm:$0xff] }
 0x18f   :  { %v2295_v24 = vsel %vm2245_vm1, %v2292_v19, %v2294_v45  ;;  %v3925_v8 = vcombine.high %v11913_v47, %v11913_v47  ;;  %v8873_v62 = vmul.f32 %v7889_v16, %v11914_v56  ;;  %11915 = vst [vmem:[#allocation41_spill] sm:$0xff] %v8875_v37  ;;  %v2321_v20 = vrot.slane %v2098_v26, 2  ;;  %v8888_v47 = vpop.permute.xlu0 %445 }
 0x190   :  { %11906 = vst [vmem:[#allocation91_spill] sm:$0xff] %v8843_v49  ;;  %11908 = vst [vmem:[#allocation90_spill] sm:$0xff] %v8856_v1  ;;  %v8864_v36 = vadd.f32 %v11910_v43, %v11909_v4  ;;  %v11912_v49 = vld [vmem:[#allocation25_spill] sm:$0xff]  ;;  %v11916_v1 = vld [vmem:[#allocation104_spill] sm:$0xff]  ;;  %v8881_v4 = vadd.f32 %v2294_v45, %v11918_v60  ;;  %v2303_v43 = vsel %vm2245_vm1, %v2301_v15, %v2302_v17  ;;  %v2324_v45 = vrot.slane %v8852_v27, 2 }
 0x191   :  { %v8878_v58 = vadd.f32 %v2293_v9, %v11916_v1  ;;  %v8886_v19 = vmul.f32 %v7903_v22, %v11914_v56  ;;  %11920 = vst [vmem:[#allocation25_spill] sm:$0xff] %v8888_v47  ;;  %v11922_v37 = vcombine.high %v11921_v53, %v11921_v53  ;;  %v2322_v1 = vrot.slane %v8848_v50, 2  ;;  %v11923_v15 = vld [vmem:[#allocation105_spill] sm:$0xff]  ;;  %3687 = vperm.xlu0 %5905, %v8562_v29   ;;  %v11938_v47 = vld [vmem:[#allocation122_spill] sm:$0xff] }
 0x192   :  { %11911 = vst [vmem:[#allocation14_spill] sm:$0xff] %v8864_v36  ;;  %11919 = vst [vmem:[#allocation98_spill] sm:$0xff] %v8881_v4  ;;  %v2305_v36 = vsel %vm2245_vm1, %v2302_v17, %v2304_v41  ;;  %5883 = vset.pattern.permute.xlu1 %v11830_v5  ;;  %v8899_v26 = vadd.f32 %v2295_v24, %v11923_v15  ;;  %v8902_v60 = vrot.slane %v3945_v25, %v6030_v11  ;;  %v8917_v25 = vpop.permute.xlu1 %2995  ;;  %v11930_v15 = vld [vmem:[#allocation115_spill] sm:$0xff] }
 0x193   :  { %11917 = vst [vmem:[#allocation97_spill] sm:$0xff] %v8878_v58  ;;  %v4883_v9 = vrot.slane %v11922_v37, %v6030_v11  ;;  %v2106_v17 = vmul.f32 %v7948_v52, %v11914_v56  ;;  %v8908_v53 = vrot.slane %v3925_v8, %v6032_v12  ;;  %v11926_v37 = vld [vmem:[#allocation112_spill] sm:$0xff]  ;;  %v2331_v4 = vrot.slane %v8873_v62, 2  ;;  %11929 = vst [vmem:[#allocation44_spill] sm:$0xff] %v8917_v25  ;;  %v11932_v56 = vld [vmem:[#allocation55_spill] sm:$0xff] }
 0x194   :  { %11924 = vst [vmem:[#allocation168_spill] sm:$0xff] %v8899_v26  ;;  %11925 = vst [vmem:[#allocation165_spill] sm:$0xff] %v8902_v60  ;;  %v8911_v50 = vadd.f32 %v2303_v43, %v11926_v37  ;;  %v11928_v24 = vrot.slane %v11789_v7, %v6032_v12  ;;  %v8920_v26 = vadd.f32 %v2305_v36, %v11930_v15  ;;  %v11934_v8 = vld [vmem:[#allocation27_spill] sm:$0xff]  ;;  %v2332_v43 = vrot.slane %v8886_v19, 2  ;;  %v11935_v37 = vld [vmem:[#allocation169_spill] sm:$0xff] }
 0x195   :  { %v4885_v27 = vcombine.high %v4883_v9, %v4883_v9  ;;  %v8923_v58 = vadd.f32 %v2304_v41, %v11932_v56  ;;  %v2110_v62 = vmul.f32 %v7889_v16, %v11935_v37  ;;  %v2313_v7 = vsel %vm2245_vm1, %v2311_v51, %v2312_v3  ;;  %3691 = vperm.xlu0 %5905, %v8619_v30  }
 0x196   :  { %11927 = vst [vmem:[#allocation104_spill] sm:$0xff] %v8911_v50  ;;  %5095 = vperm.xlu1 %5883, %v11928_v24   ;;  %11931 = vst [vmem:[#allocation28_spill] sm:$0xff] %v8920_v26  ;;  %v8930_v50 = vpop.permute.xlu0 %453  ;;  %v2315_v24 = vsel %vm2245_vm1, %v2312_v3, %v2314_v33  ;;  %v2111_v36 = vmul.f32 %v7903_v22, %v11935_v37  ;;  %v8938_v41 = vmul.f32 %v7948_v52, %v11935_v37  ;;  %v11942_v37 = vld [vmem:[#allocation173_spill] sm:$0xff] }
 0x197   :  { %11933 = vst [vmem:[#allocation105_spill] sm:$0xff] %v8923_v58  ;;  %11936 = vst [vmem:[#allocation112_spill] sm:$0xff] %v8930_v50  ;;  %v3977_v15 = vcombine.high %v8902_v60, %v8902_v60  ;;  %v8943_v19 = vrot.slane %v4883_v9, %v6030_v11  ;;  %v2334_v56 = vrot.slane %v2106_v17, 2  ;;  %v8947_v51 = vadd.f32 %v2314_v33, %v11938_v47  ;;  %v11941_v50 = vld [vmem:[#allocation179_spill] sm:$0xff]  ;;  %v8963_v17 = vpop.permute.xlu1 %3003  ;;  %v11944_v33 = vld [vmem:[#allocation120_spill] sm:$0xff] }
 0x198   :  { %v8950_v3 = vrot.slane %v4885_v27, %v6030_v11  ;;  %v3927_v25 = vcombine.high %v11941_v50, %v11941_v50  ;;  %v8956_v58 = vmul.f32 %v7889_v16, %v11942_v37  ;;  %v8960_v9 = vmul.f32 %v7903_v22, %v11942_v37  ;;  %11943 = vst [vmem:[#allocation169_spill] sm:$0xff] %v8963_v17  ;;  %v11947_v26 = vld [vmem:[#allocation121_spill] sm:$0xff] }
 0x199   :  { %11937 = vst [vmem:[#allocation115_spill] sm:$0xff] %v8943_v19  ;;  %11939 = vst [vmem:[#allocation55_spill] sm:$0xff] %v8947_v51  ;;  %v8966_v47 = vadd.f32 %v2313_v7, %v11944_v33  ;;  %v2323_v27 = vsel %vm2245_vm1, %v2321_v20, %v2322_v1  ;;  %v2341_v60 = vrot.slane %v2110_v62, 2  ;;  %v8971_v50 = vmul.f32 %v7948_v52, %v11942_v37  ;;  %v11953_v20 = vld [vmem:[#allocation126_spill] sm:$0xff] }
 0x19a   :  { %11940 = vst [vmem:[#allocation27_spill] sm:$0xff] %v8950_v3  ;;  %5884 = vset.pattern.permute.xlu1 %v11903_v10  ;;  %v8974_v51 = vpop.permute.xlu0 %461  ;;  %v8977_v11 = vadd.f32 %v2315_v24, %v11947_v26  ;;  %v2325_v35 = vsel %vm2245_vm1, %v2322_v1, %v2324_v45  ;;  %v2342_v17 = vrot.slane %v2111_v36, 2  ;;  %v2344_v7 = vrot.slane %v8938_v41, 2  ;;  %5912 = vset.pattern.permute.xlu0 %v11903_v10  ;;  %v11950_v26 = vld [vmem:[#allocation35_spill] sm:$0xff] }
 0x19b   :  { %11945 = vst [vmem:[#allocation122_spill] sm:$0xff] %v8966_v47  ;;  %4163 = vperm.xlu1 %5884, %v8567_v39   ;;  %11946 = vst [vmem:[#allocation179_spill] sm:$0xff] %v8974_v51  ;;  %v8982_v33 = vrot.slane %v3977_v15, %v6032_v12  ;;  %v8990_v37 = vrot.slane %v3927_v25, %v6032_v12  ;;  %v8993_v24 = vadd.f32 %v2323_v27, %v11950_v26  ;;  %v9000_v15 = vpop.permute.xlu1 %3011  ;;  %v11956_v26 = vld [vmem:[#allocation72_spill] sm:$0xff] }
 0x19c   :  { %11948 = vst [vmem:[#allocation173_spill] sm:$0xff] %v8977_v11  ;;  %v4917_v1 = vcombine.high %v8950_v3, %v8950_v3  ;;  %v2351_v36 = vrot.slane %v8956_v58, 2  ;;  %v2352_v41 = vrot.slane %v8960_v9, 2  ;;  %4151 = vperm.xlu0 %5912, %v11813_v38   ;;  %11952 = vst [vmem:[#allocation35_spill] sm:$0xff] %v9000_v15  ;;  %v9003_v51 = vadd.f32 %v2325_v35, %v11953_v20  ;;  %v11958_v9 = vld [vmem:[#allocation180_spill] sm:$0xff]  ;;  %v11973_v15 = vld [vmem:[#allocation26_spill] sm:$0xff] }
 0x19d   :  { %11949 = vst [vmem:[#allocation120_spill] sm:$0xff] %v8990_v37  ;;  %11951 = vst [vmem:[#allocation121_spill] sm:$0xff] %v8993_v24  ;;  %v2333_v25 = vsel %vm2245_vm1, %v2331_v4, %v2332_v43  ;;  %v2354_v62 = vrot.slane %v8971_v50, 2  ;;  %v9011_v24 = vadd.f32 %v2324_v45, %v11956_v26  ;;  %v2335_v58 = vsel %vm2245_vm1, %v2332_v43, %v2334_v56  ;;  %v11962_v50 = vld [vmem:[#allocation57_spill] sm:$0xff]  ;;  %v12002_v37 = vld [vmem:[#allocation79_spill] sm:$0xff] }
 0x19e   :  { %11954 = vst [vmem:[#allocation126_spill] sm:$0xff] %v9003_v51  ;;  %v9008_v27 = vpop.permute.xlu0 %469  ;;  %v9016_v38 = vmul.f32 %v7889_v16, %v11958_v9  ;;  %v9020_v35 = vmul.f32 %v7903_v22, %v11958_v9  ;;  %v9024_v4 = vmul.f32 %v7948_v52, %v11958_v9  ;;  %v9028_v20 = vadd.f32 %v2334_v56, %v11962_v50  ;;  %v11964_v45 = vld [vmem:[#allocation201_spill] sm:$0xff] }
 0x19f   :  { %5885 = vset.pattern.permute.xlu1 %v11805_v57  ;;  %11955 = vst [vmem:[#allocation216_spill] sm:$0xff] %v9008_v27  ;;  %11957 = vst [vmem:[#allocation72_spill] sm:$0xff] %v9011_v24  ;;  %v495_v43 = vmul.f32 %v7889_v16, %v11964_v45  ;;  %v9033_v26 = vrot.slane %v4917_v1, %v6032_v12  ;;  %v11966_v27 = vld [vmem:[#allocation50_spill] sm:$0xff]  ;;  %v9040_v9 = vpop.permute.xlu1 %3019  ;;  %v11971_v56 = vld [vmem:[#allocation49_spill] sm:$0xff]  ;;  %v2345_v1 = vsel %vm2245_vm1, %v2342_v17, %v2344_v7 }
 0x1a0   :  { %11959 = vst [vmem:[#allocation180_spill] sm:$0xff] %v9016_v38  ;;  %11960 = vst [vmem:[#allocation217_spill] sm:$0xff] %v9020_v35  ;;  %3635 = vperm.xlu1 %5885, %v8489_v42   ;;  %v9036_v38 = vadd.f32 %v2333_v25, %v11966_v27  ;;  %v2343_v35 = vsel %vm2245_vm1, %v2341_v60, %v2342_v17  ;;  %4155 = vperm.xlu0 %5912, %v11831_v40   ;;  %v11972_v50 = vld [vmem:[#allocation129_spill] sm:$0xff]  ;;  %v11976_v25 = vld [vmem:[#allocation8_spill] sm:$0xff] }
 0x1a1   :  { %11961 = vst [vmem:[#allocation218_spill] sm:$0xff] %v9024_v4  ;;  %11963 = vst [vmem:[#allocation57_spill] sm:$0xff] %v9028_v20  ;;  %v11969_v4 = vld [vmem:[#allocation128_spill] sm:$0xff]  ;;  %v1554_v20 = vadd.f32 %v11972_v50, %v11971_v56  ;;  %v11974_v24 = vld [vmem:[#allocation65_spill] sm:$0xff]  ;;  %v496_v50 = vmul.f32 %v7903_v22, %v11964_v45 }
 0x1a2   :  { %11965 = vst [vmem:[#allocation201_spill] sm:$0xff] %v9033_v26  ;;  %11967 = vst [vmem:[#allocation50_spill] sm:$0xff] %v9036_v38  ;;  %v9043_v42 = vadd.f32 %v2335_v58, %v11969_v4  ;;  %v1555_v51 = vadd.f32 %v11974_v24, %v11973_v15  ;;  %v9050_v11 = vpop.permute.xlu0 %477  ;;  %v11977_v27 = vld [vmem:[#allocation96_spill] sm:$0xff]  ;;  %v11979_v40 = vld [vmem:[#allocation99_spill] sm:$0xff] }
 0x1a3   :  { %11968 = vst [vmem:[#allocation219_spill] sm:$0xff] %v9040_v9  ;;  %11975 = vst [vmem:[#allocation49_spill] sm:$0xff] %v9050_v11  ;;  %v11978_v60 = vrot.slane %v11977_v27, 1  ;;  %v11980_v47 = vrot.slane %v11979_v40, 1  ;;  %v11981_v9 = vld [vmem:[#allocation29_spill] sm:$0xff]  ;;  %v11983_v4 = vld [vmem:[#allocation100_spill] sm:$0xff]  ;;  %v504_v40 = vmul.f32 %v7889_v16, %v8432_v61 }
 0x1a4   :  { %11970 = vst [vmem:[#allocation128_spill] sm:$0xff] %v9043_v42  ;;  %v11982_v26 = vrot.slane %v11981_v9, 1  ;;  %v11984_v42 = vrot.slane %v11983_v4, 1  ;;  %v11986_v15 = vld [vmem:[#allocation193_spill] sm:$0xff]  ;;  %5886 = vset.pattern.permute.xlu1 %v11903_v10  ;;  %v9072_v9 = vadd.f32 %v2343_v35, %v1554_v20  ;;  %4171 = vperm.xlu0 %5912, %v11849_v59   ;;  %v11992_v35 = vld [vmem:[#allocation32_spill] sm:$0xff] }
 0x1a5   :  { %v1556_v38 = vadd.f32 %v11978_v60, %v11976_v25  ;;  %v11985_v56 = vmov %v11980_v47  ;;  %v492_v17 = vmul.f32 %v7889_v16, %v11986_v15  ;;  %v497_v25 = vmul.f32 %v7948_v52, %v11964_v45  ;;  %4167 = vperm.xlu1 %5886, %v8743_v18   ;;  %v9085_v45 = vpop.permute.xlu1 %3027 }
 0x1a6   :  { %v1348_v58 = vsel %vm1240_vm0, %v11982_v26, %v11980_v47  ;;  %v1350_v24 = vsel %vm1240_vm0, %v11985_v56, %v11984_v42  ;;  %11987 = vst [vmem:[#allocation129_spill] sm:$0xff] %v9072_v9  ;;  %v493_v47 = vmul.f32 %v7903_v22, %v11986_v15  ;;  %v11988_v26 = vld [vmem:[#allocation71_spill] sm:$0xff]  ;;  %v9078_v42 = vadd.f32 %v2345_v1, %v1555_v51 }
 0x1a7   :  { %v1500_v27 = vadd.f32 %v11988_v26, %v495_v43  ;;  %v9080_v60 = vadd.f32 %v2344_v7, %v1556_v38  ;;  %11991 = vst [vmem:[#allocation8_spill] sm:$0xff] %v9085_v45  ;;  %v1560_v20 = vadd.f32 %v1348_v58, %v11992_v35  ;;  %v11993_v56 = vld [vmem:[#allocation43_spill] sm:$0xff]  ;;  %v2353_v9 = vsel %vm2245_vm1, %v2351_v36, %v2352_v41  ;;  %v9094_v7 = vpop.permute.xlu0 %485  ;;  %v11996_v26 = vld [vmem:[#allocation124_spill] sm:$0xff]  ;;  %v11998_v58 = vld [vmem:[#allocation77_spill] sm:$0xff] }
 0x1a8   :  { %11989 = vst [vmem:[#allocation26_spill] sm:$0xff] %v9078_v42  ;;  %v1561_v11 = vadd.f32 %v1350_v24, %v11993_v56  ;;  %v494_v43 = vmul.f32 %v7948_v52, %v11986_v15  ;;  %v505_v51 = vmul.f32 %v7903_v22, %v8432_v61  ;;  %11994 = vst [vmem:[#allocation96_spill] sm:$0xff] %v9094_v7  ;;  %v11995_v1 = vld [vmem:[#allocation131_spill] sm:$0xff]  ;;  %v11997_v45 = vrot.slane %v11996_v26, 1  ;;  %v11999_v24 = vld [vmem:[#allocation108_spill] sm:$0xff] }
 0x1a9   :  { %11990 = vst [vmem:[#allocation65_spill] sm:$0xff] %v9080_v60  ;;  %v2355_v38 = vsel %vm2245_vm1, %v2352_v41, %v2354_v62  ;;  %v1501_v59 = vadd.f32 %v11995_v1, %v496_v50  ;;  %v1497_v35 = vadd.f32 %v11998_v58, %v492_v17  ;;  %v12000_v36 = vrot.slane %v11983_v4, 1  ;;  %v12001_v42 = vld [vmem:[#allocation133_spill] sm:$0xff]  ;;  %5887 = vset.pattern.permute.xlu1 %v11805_v57  ;;  %v9117_v4 = vpop.permute.xlu1 %3035 }
 0x1aa   :  { %v1502_v60 = vadd.f32 %v11997_v45, %v497_v25  ;;  %v2505_v15 = vadd.f32 %v12001_v42, %v1500_v27  ;;  %v1498_v3 = vadd.f32 %v12002_v37, %v493_v47  ;;  %v12003_v7 = vld [vmem:[#allocation197_spill] sm:$0xff]  ;;  %v9111_v50 = vadd.f32 %v2353_v9, %v1560_v20  ;;  %v12006_v45 = vld [vmem:[#allocation136_spill] sm:$0xff]  ;;  %3639 = vperm.xlu1 %5887, %v8567_v39  }
 0x1ab   :  { %v1562_v56 = vadd.f32 %v12000_v36, %v11999_v24  ;;  %v9109_v41 = vrot.slane %v12003_v7, %v6032_v12  ;;  %v1509_v17 = vadd.f32 %v12006_v45, %v504_v40  ;;  %4175 = vperm.xlu0 %5912, %v8199_v44   ;;  %12007 = vst [vmem:[#allocation29_spill] sm:$0xff] %v9117_v4  ;;  %v12010_v37 = vld [vmem:[#allocation76_spill] sm:$0xff]  ;;  %v9126_v20 = vpop.permute.xlu0 %2931  ;;  %v12011_v7 = vld [vmem:[#allocation53_spill] sm:$0xff]  ;;  %v12013_v44 = vld [vmem:[#allocation135_spill] sm:$0xff] }
 0x1ac   :  { %12004 = vst [vmem:[#allocation99_spill] sm:$0xff] %v9111_v50  ;;  %v9119_v27 = vadd.f32 %v2355_v38, %v1561_v11  ;;  %v1510_v47 = vadd.f32 %v12010_v37, %v505_v51  ;;  %v510_v9 = vmul.f32 %v7889_v16, %v8484_v54  ;;  %v12012_v26 = vrot.slane %v12011_v7, 1  ;;  %v12014_v24 = vld [vmem:[#allocation63_spill] sm:$0xff]  ;;  %v12016_v51 = vld [vmem:[#allocation70_spill] sm:$0xff] }
 0x1ad   :  { %v9121_v42 = vadd.f32 %v2354_v62, %v1562_v56  ;;  %v506_v39 = vmul.f32 %v7948_v52, %v8432_v61  ;;  %v2506_v58 = vadd.f32 %v12013_v44, %v1501_v59  ;;  %v12015_v11 = vrot.slane %v12014_v24, 2  ;;  %v12023_v44 = vld [vmem:[#allocation158_spill] sm:$0xff]  ;;  %v12059_v50 = vld [vmem:[#allocation143_spill] sm:$0xff] }
 0x1ae   :  { %12008 = vst [vmem:[#allocation100_spill] sm:$0xff] %v9119_v27  ;;  %v1499_v40 = vadd.f32 %v12012_v26, %v494_v43  ;;  %v9136_v62 = vadd.f32 %v8750_v2, %v1497_v35  ;;  %v3061_v36 = vadd.f32 %v12016_v51, %v2505_v15  ;;  %v511_v56 = vmul.f32 %v7903_v22, %v8484_v54  ;;  %v12019_v35 = vld [vmem:[#allocation87_spill] sm:$0xff]  ;;  %v9154_v15 = vpop.permute.xlu1 %3043 }
 0x1af   :  { %12009 = vst [vmem:[#allocation193_spill] sm:$0xff] %v9121_v42  ;;  %v2507_v38 = vadd.f32 %v12015_v11, %v1502_v60  ;;  %v512_v45 = vmul.f32 %v7948_v52, %v8484_v54  ;;  %v9144_v43 = vadd.f32 %v8764_v0, %v1498_v3  ;;  %v3064_v59 = vadd.f32 %v8533_v23, %v8536_v32  ;;  %v12018_v60 = vld [vmem:[#allocation82_spill] sm:$0xff]  ;;  %v12021_v54 = vld [vmem:[#allocation141_spill] sm:$0xff]  ;;  %v12022_v0 = vld [vmem:[#allocation64_spill] sm:$0xff] }
 0x1b0   :  { %v516_v2 = vmul.f32 %v7889_v16, %v12018_v60  ;;  %v2514_v7 = vadd.f32 %v12019_v35, %v1509_v17  ;;  %5888 = vset.pattern.permute.xlu1 %v11830_v5  ;;  %4191 = vperm.xlu0 %5912, %v11889_v34   ;;  %12020 = vst [vmem:[#allocation71_spill] sm:$0xff] %v9154_v15  ;;  %v12024_v32 = vld [vmem:[#allocation151_spill] sm:$0xff]  ;;  %v9165_v16 = vpop.permute.xlu0 %2943  ;;  %v12025_v17 = vld [vmem:[#allocation132_spill] sm:$0xff] }
 0x1b1   :  { %v1515_v26 = vadd.f32 %v12021_v54, %v510_v9  ;;  %v3065_v3 = vadd.f32 %v8533_v23, %v12022_v0  ;;  %v9161_v24 = vadd.f32 %v8533_v23, %v12023_v44  ;;  %v2515_v11 = vadd.f32 %v12024_v32, %v1510_v47  ;;  %5107 = vperm.xlu1 %5888, %v8772_v13   ;;  %v12028_v0 = vld [vmem:[#allocation142_spill] sm:$0xff]  ;;  %v12029_v44 = vld [vmem:[#allocation92_spill] sm:$0xff]  ;;  %v12058_v42 = vld [vmem:[#allocation95_spill] sm:$0xff] }
 0x1b2   :  { %v12026_v35 = vrot.slane %v12025_v17, 1  ;;  %v3062_v37 = vadd.f32 %v12016_v51, %v2506_v58  ;;  %v9171_v9 = vadd.f32 %v12016_v51, %v2507_v38  ;;  %v517_v54 = vmul.f32 %v7903_v22, %v12018_v60  ;;  %v12031_v17 = vld [vmem:[#allocation75_spill] sm:$0xff]  ;;  %v12033_v51 = vld [vmem:[#allocation80_spill] sm:$0xff] }
 0x1b3   :  { %v1516_v23 = vadd.f32 %v12028_v0, %v511_v56  ;;  %v3070_v25 = vadd.f32 %v12029_v44, %v2514_v7  ;;  %v3071_v47 = vadd.f32 %v12029_v44, %v2515_v11  ;;  %v12030_v13 = vrot.slane %v8373_v31, 2  ;;  %v9190_v56 = vpop.permute.xlu1 %3051 }
 0x1b4   :  { %v1511_v34 = vadd.f32 %v12026_v35, %v506_v39  ;;  %12027 = vst [vmem:[#allocation32_spill] sm:$0xff] %v9171_v9  ;;  %v12032_v39 = vrot.slane %v12031_v17, 1  ;;  %v9184_v58 = vmax.f32 %v3064_v59, 0.0  ;;  %v518_v38 = vmul.f32 %v7948_v52, %v12018_v60  ;;  %4195 = vperm.xlu0 %5912, %v8446_v63   ;;  %12034 = vst [vmem:[#allocation43_spill] sm:$0xff] %v9190_v56  ;;  %v12037_v60 = vld [vmem:[#allocation145_spill] sm:$0xff] }
 0x1b5   :  { %v9180_v32 = vadd.f32 %v12030_v13, %v1499_v40  ;;  %v1521_v22 = vadd.f32 %v12033_v51, %v516_v2  ;;  %v9192_v7 = vmax.f32 %v3061_v36, 0.0  ;;  %v9194_v11 = vmax.f32 %v3065_v3, 0.0  ;;  %v12035_v40 = vld [vmem:[#allocation164_spill] sm:$0xff]  ;;  %5889 = vset.pattern.permute.xlu1 %v11805_v57  ;;  %v12043_v52 = vld [vmem:[#allocation137_spill] sm:$0xff] }
 0x1b6   :  { %v1517_v35 = vadd.f32 %v12032_v39, %v512_v45  ;;  %v2520_v0 = vadd.f32 %v12035_v40, %v1515_v26  ;;  %v9199_v45 = vpop.permute.xlu0 %2951  ;;  %v9201_v59 = vmax.f32 %v3062_v37, 0.0  ;;  %v1522_v63 = vadd.f32 %v12037_v60, %v517_v54  ;;  %v12038_v2 = vld [vmem:[#allocation68_spill] sm:$0xff]  ;;  %3643 = vperm.xlu1 %5889, %v8743_v18   ;;  %v12040_v26 = vld [vmem:[#allocation93_spill] sm:$0xff]  ;;  %v12041_v37 = vld [vmem:[#allocation130_spill] sm:$0xff] }
 0x1b7   :  { %v12039_v13 = vrot.slane %v12038_v2, 2  ;;  %v9208_v3 = vmax.f32 %v3070_v25, 0.0  ;;  %v9210_v17 = vmax.f32 %v3071_v47, 0.0  ;;  %v2521_v39 = vadd.f32 %v12040_v26, %v1516_v23  ;;  %v12045_v60 = vld [vmem:[#allocation74_spill] sm:$0xff]  ;;  %v9224_v25 = vpop.permute.xlu1 %3583 }
 0x1b8   :  { %12036 = vst [vmem:[#allocation131_spill] sm:$0xff] %v9201_v59  ;;  %v3076_v51 = vadd.f32 %v8660_v48, %v2520_v0  ;;  %v9216_v40 = vmul.f32 %v12041_v37, %v9184_v58  ;;  %v12044_v31 = vrot.slane %v12043_v52, 1  ;;  %v12046_v2 = vrot.slane %v12045_v60, 2  ;;  %4211 = vperm.xlu0 %5912, %v8562_v29   ;;  %v9255_v26 = vld [vmem:[%s10972_s0 + $0x10] sm:$0xf]  ;;  %v12051_v60 = vld [vmem:[#allocation176_spill] sm:$0xff] }
 0x1b9   :  { %v2516_v36 = vadd.f32 %v12039_v13, %v1511_v34  ;;  %v12047_v13 = vld [vmem:[#allocation174_spill] sm:$0xff]  ;;  %v9228_v23 = vmul.f32 %v12041_v37, %v9194_v11  ;;  %v12049_v47 = vmax.f32 %v9161_v24, 0.0  ;;  %v3077_v29 = vadd.f32 %v8660_v48, %v2521_v39 }
 0x1ba   :  { %12042 = vst [vmem:[#allocation124_spill] sm:$0xff] %v9216_v40  ;;  %v1523_v54 = vadd.f32 %v12044_v31, %v518_v38  ;;  %v2522_v34 = vadd.f32 %v12046_v2, %v1517_v35  ;;  %v2526_v18 = vadd.f32 %v12047_v13, %v1521_v22  ;;  %v9238_v38 = vld [vmem:[%s10972_s0] sm:$0xff]  ;;  %v9243_v22 = vpop.permute.xlu0 %2959  ;;  %v9248_v31 = vld [vmem:[%s10972_s0 + $0x8] sm:$0xff]  ;;  %v2527_v39 = vadd.f32 %v12051_v60, %v1522_v63 }
 0x1bb   :  { %12048 = vst [vmem:[#allocation77_spill] sm:$0xff] %v9228_v23  ;;  %v9233_v0 = vmul.f32 %v12041_v37, %v12049_v47  ;;  %v522_v35 = vmul.f32 %v9238_v38, %v8614_v46  ;;  %v523_v52 = vmul.f32 %v9248_v31, %v8614_v46  ;;  %v524_v37 = vmul.f32 %v9255_v26, %v8614_v46  ;;  %v12052_v47 = vld [vmem:[#allocation134_spill] sm:$0xff]  ;;  %v9285_v60 = vpop.permute.xlu1 %3591 }
 0x1bc   :  { %v3082_v2 = vadd.f32 %v8725_v55, %v2526_v18  ;;  %5890 = vset.pattern.permute.xlu1 %v11830_v5  ;;  %v9263_v13 = vadd.f32 %v12029_v44, %v2516_v36  ;;  %v9267_v61 = vmul.f32 %v12052_v47, %v9208_v3  ;;  %v9271_v1 = vmul.f32 %v12052_v47, %v9210_v17 }
 0x1bd   :  { %12050 = vst [vmem:[#allocation108_spill] sm:$0xff] %v9233_v0  ;;  %v9273_v56 = vmax.f32 %v3076_v51, 0.0  ;;  %v12055_v46 = vrot.slane %v11912_v49, %v6032_v12  ;;  %v528_v44 = vmul.f32 %v9238_v38, %v8667_v28  ;;  %v529_v36 = vmul.f32 %v9248_v31, %v8667_v28  ;;  %4215 = vperm.xlu0 %5912, %v8619_v30   ;;  %v12056_v49 = vld [vmem:[#allocation155_spill] sm:$0xff] }
 0x1be   :  { %12053 = vst [vmem:[#allocation133_spill] sm:$0xff] %v9267_v61  ;;  %12054 = vst [vmem:[#allocation79_spill] sm:$0xff] %v9271_v1  ;;  %v3083_v18 = vadd.f32 %v8725_v55, %v2527_v39  ;;  %v9290_v4 = vmax.f32 %v3077_v29, 0.0  ;;  %v9292_v63 = vpop.permute.xlu0 %2967  ;;  %v1528_v27 = vadd.f32 %v12058_v42, %v523_v52  ;;  %v12060_v40 = vrot.slane %v12059_v50, 1  ;;  %v12064_v50 = vld [vmem:[#allocation166_spill] sm:$0xff] }
 0x1bf   :  { %5111 = vperm.xlu1 %5890, %v12055_v46   ;;  %v1527_v46 = vadd.f32 %v12056_v49, %v522_v35  ;;  %v9298_v39 = vadd.f32 %v8660_v48, %v2522_v34  ;;  %v9300_v30 = vmax.f32 %v3082_v2, 0.0  ;;  %v12062_v35 = vld [vmem:[#allocation140_spill] sm:$0xff]  ;;  %v530_v49 = vmul.f32 %v9255_v26, %v8667_v28  ;;  %v12066_v28 = vld [vmem:[#allocation73_spill] sm:$0xff] }
 0x1c0   :  { %12057 = vst [vmem:[#allocation197_spill] sm:$0xff] %v9290_v4  ;;  %v1529_v47 = vadd.f32 %v12060_v40, %v524_v37  ;;  %v9306_v29 = vmul.f32 %v12062_v35, %v9273_v56  ;;  %v1533_v42 = vadd.f32 %v12064_v50, %v528_v44  ;;  %v12065_v40 = vld [vmem:[#allocation103_spill] sm:$0xff]  ;;  %v9313_v34 = vmax.f32 %v3083_v18, 0.0  ;;  %v9318_v37 = vpop.permute.xlu1 %3599  ;;  %v12068_v50 = vld [vmem:[#allocation152_spill] sm:$0xff] }
 0x1c1   :  { %12061 = vst [vmem:[#allocation136_spill] sm:$0xff] %v9300_v30  ;;  %v1534_v48 = vadd.f32 %v12065_v40, %v529_v36  ;;  %v540_v52 = vmul.f32 %v9238_v38, %v8799_v6  ;;  %v9322_v2 = vmul.f32 %v12062_v35, %v9290_v4  ;;  %v12067_v51 = vrot.slane %v12066_v28, 2  ;;  %4231 = vperm.xlu0 %5912, %v8982_v33   ;;  %v12071_v35 = vld [vmem:[#allocation146_spill] sm:$0xff] }
 0x1c2   :  { %12063 = vst [vmem:[#allocation76_spill] sm:$0xff] %v9306_v29  ;;  %v534_v44 = vmul.f32 %v9238_v38, %v8740_v21  ;;  %v541_v36 = vmul.f32 %v9248_v31, %v8799_v6  ;;  %v9331_v18 = vpop.permute.xlu0 %2975  ;;  %v9335_v40 = vmul.f32 %v12068_v50, %v9300_v30  ;;  %v535_v0 = vmul.f32 %v9248_v31, %v8740_v21  ;;  %v12075_v4 = vld [vmem:[#allocation18_spill] sm:$0xff] }
 0x1c3   :  { %5891 = vset.pattern.permute.xlu1 %v11903_v10  ;;  %v2528_v15 = vadd.f32 %v12067_v51, %v1523_v54  ;;  %v536_v54 = vmul.f32 %v9255_v26, %v8740_v21  ;;  %v12070_v51 = vld [vmem:[#allocation185_spill] sm:$0xff]  ;;  %v12072_v61 = vrot.slane %v12071_v35, 1  ;;  %v542_v30 = vmul.f32 %v9255_v26, %v8799_v6 }
 0x1c4   :  { %4179 = vperm.xlu1 %5891, %v8908_v53   ;;  %12069 = vst [vmem:[#allocation53_spill] sm:$0xff] %v9335_v40  ;;  %v2532_v28 = vadd.f32 %v12070_v51, %v1527_v46  ;;  %v9352_v9 = vmul.f32 %v12068_v50, %v9313_v34  ;;  %v2533_v59 = vadd.f32 %v12075_v4, %v1528_v27  ;;  %v12076_v46 = vld [vmem:[#allocation188_spill] sm:$0xff]  ;;  %v9358_v35 = vpop.permute.xlu1 %3607  ;;  %v12116_v40 = vld [vmem:[#allocation41_spill] sm:$0xff] }
 0x1c5   :  { %v1535_v1 = vadd.f32 %v12072_v61, %v530_v49  ;;  %v9346_v33 = vadd.f32 %v8725_v55, %v2528_v15  ;;  %v1545_v51 = vadd.f32 %v12076_v46, %v540_v52  ;;  %v12077_v61 = vld [vmem:[#allocation178_spill] sm:$0xff]  ;;  %v12078_v49 = vld [vmem:[#allocation81_spill] sm:$0xff]  ;;  %5917 = vset.pattern.permute.xlu0 %v11830_v5  ;;  %v12081_v4 = vrot.slane %v11934_v8, %v6032_v12  ;;  %v12088_v8 = vld [vmem:[#allocation156_spill] sm:$0xff] }
 0x1c6   :  { %12074 = vst [vmem:[#allocation63_spill] sm:$0xff] %v9352_v9  ;;  %v3088_v21 = vadd.f32 %v8791_v14, %v2532_v28  ;;  %v1539_v15 = vadd.f32 %v12077_v61, %v534_v44  ;;  %v12079_v6 = vrot.slane %v12078_v49, 2  ;;  %v9369_v27 = vpop.permute.xlu0 %2983  ;;  %v12083_v28 = vld [vmem:[#allocation17_spill] sm:$0xff]  ;;  %v3089_v61 = vadd.f32 %v8791_v14, %v2533_v59  ;;  %v12092_v59 = vld [vmem:[#allocation192_spill] sm:$0xff] }
 0x1c7   :  { %12073 = vst [vmem:[#allocation135_spill] sm:$0xff] %v9346_v33  ;;  %v12080_v33 = vld [vmem:[#allocation19_spill] sm:$0xff]  ;;  %12082 = vst [vmem:[#allocation70_spill] sm:$0xff] %v9369_v27  ;;  %v1540_v46 = vadd.f32 %v12083_v28, %v535_v0  ;;  %v12084_v55 = vld [vmem:[#allocation153_spill] sm:$0xff] }
 0x1c8   :  { %5892 = vset.pattern.permute.xlu1 %v11830_v5  ;;  %v2534_v23 = vadd.f32 %v12079_v6, %v1529_v47  ;;  %v1546_v50 = vadd.f32 %v12080_v33, %v541_v36  ;;  %v12085_v29 = vrot.slane %v12084_v55, 1  ;;  %v12086_v47 = vrot.slane %v8943_v19, %v6032_v12  ;;  %v12090_v6 = vld [vmem:[#allocation89_spill] sm:$0xff]  ;;  %v12094_v28 = vld [vmem:[#allocation194_spill] sm:$0xff] }
 0x1c9   :  { %5115 = vperm.xlu1 %5892, %v12081_v4   ;;  %v12089_v33 = vrot.slane %v12088_v8, 1  ;;  %v546_v4 = vmul.f32 %v9238_v38, %v12090_v6  ;;  %v547_v0 = vmul.f32 %v9248_v31, %v12090_v6  ;;  %v9392_v55 = vadd.f32 %v12092_v59, %v1545_v51 }
 0x1ca   :  { %v1541_v44 = vadd.f32 %v12085_v29, %v536_v54  ;;  %5159 = vperm.xlu0 %5917, %v12086_v47   ;;  %v9380_v36 = vadd.f32 %v8791_v14, %v2534_v23  ;;  %v9389_v54 = vmax.f32 %v3088_v21, 0.0  ;;  %v548_v14 = vmul.f32 %v9255_v26, %v12090_v6  ;;  %v9396_v23 = vpop.permute.xlu1 %3615  ;;  %v12096_v47 = vld [vmem:[#allocation196_spill] sm:$0xff]  ;;  %v9407_v51 = vpop.permute.xlu0 %2991  ;;  %v12099_v6 = vld [vmem:[#allocation199_spill] sm:$0xff] }
 0x1cb   :  { %v1547_v49 = vadd.f32 %v12089_v33, %v542_v30  ;;  %12093 = vst [vmem:[#allocation141_spill] sm:$0xff] %v9392_v55  ;;  %v9399_v30 = vadd.f32 %v12094_v28, %v1546_v50  ;;  %v2538_v8 = vadd.f32 %v12096_v47, %v1533_v42  ;;  %v3058_v33 = vadd.f32 %v9126_v20, %v9136_v62  ;;  %v12100_v29 = vld [vmem:[#allocation148_spill] sm:$0xff]  ;;  %v12101_v42 = vld [vmem:[#allocation27_spill] sm:$0xff] }
 0x1cc   :  { %12087 = vst [vmem:[#allocation82_spill] sm:$0xff] %v9380_v36  ;;  %12091 = vst [vmem:[#allocation87_spill] sm:$0xff] %v9389_v54  ;;  %v3059_v21 = vadd.f32 %v9126_v20, %v9144_v43  ;;  %v9409_v59 = vmax.f32 %v3089_v61, 0.0  ;;  %v2539_v52 = vadd.f32 %v12099_v6, %v1534_v48  ;;  %v2544_v19 = vadd.f32 %v12100_v29, %v1539_v15  ;;  %v12103_v62 = vld [vmem:[#allocation120_spill] sm:$0xff]  ;;  %v12104_v43 = vld [vmem:[#allocation94_spill] sm:$0xff] }
 0x1cd   :  { %12095 = vst [vmem:[#allocation64_spill] sm:$0xff] %v9399_v30  ;;  %5893 = vset.pattern.permute.xlu1 %v11903_v10  ;;  %12097 = vst [vmem:[#allocation158_spill] sm:$0xff] %v9407_v51  ;;  %v3060_v50 = vadd.f32 %v9126_v20, %v9180_v32  ;;  %v12102_v28 = vrot.slane %v12101_v42, %v6032_v12  ;;  %v12105_v47 = vrot.slane %v12104_v43, 2  ;;  %v12107_v55 = vld [vmem:[#allocation200_spill] sm:$0xff]  ;;  %v12108_v51 = vld [vmem:[#allocation154_spill] sm:$0xff] }
 0x1ce   :  { %12098 = vst [vmem:[#allocation151_spill] sm:$0xff] %v9409_v59  ;;  %4183 = vperm.xlu1 %5893, %v12103_v62   ;;  %v1551_v61 = vadd.f32 %v12107_v55, %v546_v4  ;;  %v1552_v59 = vadd.f32 %v12108_v51, %v547_v0  ;;  %v12109_v48 = vld [vmem:[#allocation147_spill] sm:$0xff]  ;;  %v12110_v15 = vld [vmem:[#allocation62_spill] sm:$0xff]  ;;  %v12114_v42 = vld [vmem:[#allocation161_spill] sm:$0xff]  ;;  %v3100_v9 = vadd.f32 %v12116_v40, %v2544_v19  ;;  %v3154_v55 = vmax.f32 %v3058_v33, 0.0  ;;  %v9438_v51 = vpop.permute.xlu0 %2999 }
 0x1cf   :  { %5163 = vperm.xlu0 %5917, %v12102_v28   ;;  %v9421_v30 = vadd.f32 %v12105_v47, %v1547_v49  ;;  %v2545_v6 = vadd.f32 %v12109_v48, %v1540_v46  ;;  %v12111_v29 = vrot.slane %v12110_v15, 2  ;;  %v12112_v20 = vld [vmem:[#allocation127_spill] sm:$0xff]  ;;  %v12115_v28 = vrot.slane %v12114_v42, 1  ;;  %12118 = vst [vmem:[#allocation75_spill] sm:$0xff] %v9438_v51  ;;  %v9440_v46 = vpop.permute.xlu1 %4111  ;;  %v12122_v48 = vld [vmem:[#allocation150_spill] sm:$0xff] }
 0x1d0   :  { %v9429_v32 = vadd.f32 %v12112_v20, %v2538_v8  ;;  %v9435_v49 = vadd.f32 %v12112_v20, %v2539_v52  ;;  %v3155_v0 = vmax.f32 %v3059_v21, 0.0  ;;  %v12120_v8 = vld [vmem:[#allocation149_spill] sm:$0xff]  ;;  %v3067_v19 = vadd.f32 %v9165_v16, %v12122_v48  ;;  %v12124_v33 = vld [vmem:[#allocation159_spill] sm:$0xff] }
 0x1d1   :  { %12106 = vst [vmem:[#allocation132_spill] sm:$0xff] %v9421_v30  ;;  %v2540_v54 = vadd.f32 %v12111_v29, %v1535_v1  ;;  %v1553_v36 = vadd.f32 %v12115_v28, %v548_v14  ;;  %v3101_v4 = vadd.f32 %v12116_v40, %v2545_v6  ;;  %v12121_v43 = vrot.slane %v12120_v8, 2  ;;  %v12123_v52 = vld [vmem:[#allocation201_spill] sm:$0xff]  ;;  %v12136_v8 = vld [vmem:[#allocation24_spill] sm:$0xff] }
 0x1d2   :  { %12113 = vst [vmem:[#allocation142_spill] sm:$0xff] %v9429_v32  ;;  %12117 = vst [vmem:[#allocation92_spill] sm:$0xff] %v9435_v49  ;;  %v3156_v14 = vmax.f32 %v3060_v50, 0.0  ;;  %5894 = vset.pattern.permute.xlu1 %v11805_v57  ;;  %v9452_v21 = vadd.f32 %v12124_v33, %v1551_v61  ;;  %v12126_v6 = vld [vmem:[#allocation157_spill] sm:$0xff]  ;;  %v12130_v50 = vld [vmem:[#allocation160_spill] sm:$0xff]  ;;  %v9471_v61 = vmax.f32 %v3100_v9, 0.0 }
 0x1d3   :  { %v9443_v1 = vadd.f32 %v12112_v20, %v2540_v54  ;;  %v2546_v47 = vadd.f32 %v12121_v43, %v1541_v44  ;;  %5171 = vperm.xlu0 %5917, %v12123_v52   ;;  %v9455_v15 = vadd.f32 %v12126_v6, %v1552_v59  ;;  %v12128_v29 = vld [vmem:[#allocation25_spill] sm:$0xff]  ;;  %3655 = vperm.xlu1 %5894, %v8908_v53   ;;  %v12131_v20 = vrot.slane %v12130_v50, 2  ;;  %v12135_v59 = vld [vmem:[#allocation6_spill] sm:$0xff]  ;;  %v9485_v52 = vpop.permute.xlu0 %3007 }
 0x1d4   :  { %12125 = vst [vmem:[#allocation164_spill] sm:$0xff] %v9452_v21  ;;  %v552_v54 = vmul.f32 %v9238_v38, %v12128_v29  ;;  %v9461_v44 = vmul.f32 %v9248_v31, %v12128_v29  ;;  %12134 = vst [vmem:[#allocation137_spill] sm:$0xff] %v9471_v61  ;;  %v9475_v43 = vrot.slane %v12136_v8, %v12135_v59  ;;  %v9477_v38 = vmax.f32 %v3101_v4, 0.0  ;;  %v12139_v53 = vld [vmem:[#allocation54_spill] sm:$0xff]  ;;  %v12157_v49 = vld [vmem:[#allocation97_spill] sm:$0xff] }
 0x1d5   :  { %12119 = vst [vmem:[#allocation80_spill] sm:$0xff] %v9443_v1  ;;  %12127 = vst [vmem:[#allocation145_spill] sm:$0xff] %v9455_v15  ;;  %v9466_v42 = vadd.f32 %v12131_v20, %v1553_v36  ;;  %v9469_v28 = vadd.f32 %v12116_v40, %v2546_v47  ;;  %v9481_v31 = vmul.f32 %v9255_v26, %v12128_v29  ;;  %v9487_v40 = vpop.permute.xlu1 %4115  ;;  %v12141_v47 = vld [vmem:[#allocation85_spill] sm:$0xff]  ;;  %v12142_v6 = vld [vmem:[#allocation22_spill] sm:$0xff]  ;;  %v9496_v50 = vmax.f32 %v3067_v19, 0.0 }
 0x1d6   :  { %12129 = vst [vmem:[#allocation68_spill] sm:$0xff] %v9461_v44  ;;  %12137 = vst [vmem:[#allocation74_spill] sm:$0xff] %v9477_v38  ;;  %v4234_v48 = vmul.f32 %v12139_v53, %v3154_v55  ;;  %v4235_v36 = vmul.f32 %v12139_v53, %v3155_v0  ;;  %v4236_v9 = vmul.f32 %v12139_v53, %v3156_v14  ;;  %v12143_v26 = vld [vmem:[#allocation202_spill] sm:$0xff]  ;;  %v12145_v20 = vld [vmem:[#allocation125_spill] sm:$0xff] }
 0x1d7   :  { %12132 = vst [vmem:[#allocation93_spill] sm:$0xff] %v9466_v42  ;;  %12133 = vst [vmem:[#allocation130_spill] sm:$0xff] %v9469_v28  ;;  %v3068_v33 = vadd.f32 %v9165_v16, %v12141_v47  ;;  %v9494_v4 = vadd.f32 %v9165_v16, %v12142_v6  ;;  %5920 = vset.pattern.permute.xlu0 %v11805_v57  ;;  %v9500_v29 = vadd.f32 %v12143_v26, %v552_v54  ;;  %v12147_v53 = vld [vmem:[#allocation84_spill] sm:$0xff] }
 0x1d8   :  { %12138 = vst [vmem:[#allocation174_spill] sm:$0xff] %v9481_v31  ;;  %12140 = vst [vmem:[#allocation176_spill] sm:$0xff] %v9485_v52  ;;  %v5174_v8 = vmul.f32 %v12145_v20, %v3154_v55  ;;  %v12146_v52 = vld [vmem:[#allocation21_spill] sm:$0xff]  ;;  %v3074_v42 = vadd.f32 %v9199_v45, %v12147_v53  ;;  %5895 = vset.pattern.permute.xlu1 %v11903_v10  ;;  %v5175_v16 = vmul.f32 %v12145_v20, %v3155_v0  ;;  %v9518_v53 = vpop.permute.xlu0 %3015 }
 0x1d9   :  { %12144 = vst [vmem:[#allocation155_spill] sm:$0xff] %v9500_v29  ;;  %v3073_v51 = vadd.f32 %v9199_v45, %v12146_v52  ;;  %v5176_v19 = vmul.f32 %v12145_v20, %v3156_v14  ;;  %4187 = vperm.xlu1 %5895, %v9109_v41   ;;  %v5001_v54 = vrot.slane %v9475_v43, %v6032_v12  ;;  %v4426_v6 = vrot.slane %v4234_v48, 1  ;;  %v12148_v29 = vld [vmem:[#allocation88_spill] sm:$0xff]  ;;  %v9528_v47 = vpop.permute.xlu1 %5051  ;;  %v12156_v14 = vld [vmem:[#allocation14_spill] sm:$0xff] }
 0x1da   :  { %v4427_v26 = vrot.slane %v4235_v36, 1  ;;  %v9516_v52 = vadd.f32 %v9199_v45, %v12148_v29  ;;  %12149 = vst [vmem:[#allocation95_spill] sm:$0xff] %v9518_v53  ;;  %v4429_v31 = vrot.slane %v4236_v9, 1  ;;  %v9521_v15 = vmax.f32 %v3068_v33, 0.0  ;;  %v12150_v20 = vld [vmem:[#allocation60_spill] sm:$0xff]  ;;  %v12154_v29 = vld [vmem:[#allocation91_spill] sm:$0xff] }
 0x1db   :  { %v9526_v21 = vmul.f32 %v12150_v20, %v9496_v50  ;;  %v5366_v48 = vrot.slane %v5174_v8, 2  ;;  %v9530_v36 = vmax.f32 %v3073_v51, 0.0  ;;  %v9532_v45 = vmax.f32 %v3074_v42, 0.0  ;;  %v12155_v33 = vld [vmem:[#allocation90_spill] sm:$0xff] }
 0x1dc   :  { %v3079_v53 = vadd.f32 %v9243_v22, %v12154_v29  ;;  %v5367_v30 = vrot.slane %v5175_v16, 2  ;;  %v5369_v9 = vrot.slane %v5176_v19, 2  ;;  %v3080_v28 = vadd.f32 %v9243_v22, %v12155_v33  ;;  %v9549_v16 = vpop.permute.xlu0 %3023  ;;  %v12161_v33 = vld [vmem:[#allocation168_spill] sm:$0xff] }
 0x1dd   :  { %12151 = vst [vmem:[#allocation143_spill] sm:$0xff] %v9526_v21  ;;  %12152 = vst [vmem:[#allocation166_spill] sm:$0xff] %v9530_v36  ;;  %v9540_v1 = vadd.f32 %v9243_v22, %v12156_v14  ;;  %5896 = vset.pattern.permute.xlu1 %v11805_v57  ;;  %v3710_v51 = vmul.f32 %v9224_v25, %v3154_v55  ;;  %v3711_v42 = vmul.f32 %v9224_v25, %v3155_v0 }
 0x1de   :  { %12153 = vst [vmem:[#allocation103_spill] sm:$0xff] %v9532_v45  ;;  %v3085_v29 = vadd.f32 %v9292_v63, %v12157_v49  ;;  %3659 = vperm.xlu1 %5896, %v12103_v62   ;;  %12158 = vst [vmem:[#allocation73_spill] sm:$0xff] %v9549_v16  ;;  %v9553_v19 = vmul.f32 %v12150_v20, %v9521_v15  ;;  %v12159_v22 = vmax.f32 %v9494_v4, 0.0  ;;  %v12162_v49 = vld [vmem:[#allocation138_spill] sm:$0xff]  ;;  %v9571_v8 = vmax.f32 %v3079_v53, 0.0 }
 0x1df   :  { %v3086_v25 = vadd.f32 %v9292_v63, %v12161_v33  ;;  %v9565_v0 = vmul.f32 %v12162_v49, %v9530_v36  ;;  %v9569_v62 = vmul.f32 %v12162_v49, %v9532_v45  ;;  %v12165_v16 = vld [vmem:[#allocation98_spill] sm:$0xff]  ;;  %v4430_v33 = vsel %vm1240_vm0, %v4427_v26, %v4429_v31 }
 0x1e0   :  { %v9558_v14 = vmul.f32 %v12150_v20, %v12159_v22  ;;  %v9575_v38 = vadd.f32 %v9292_v63, %v12165_v16  ;;  %v9577_v20 = vpop.permute.xlu1 %4119  ;;  %v4428_v22 = vsel %vm1240_vm0, %v4426_v6, %v4427_v26  ;;  %v9581_v55 = vmax.f32 %v3080_v28, 0.0  ;;  %v9592_v63 = vpop.permute.xlu0 %3031 }
 0x1e1   :  { %12163 = vst [vmem:[#allocation146_spill] sm:$0xff] %v9565_v0  ;;  %12164 = vst [vmem:[#allocation18_spill] sm:$0xff] %v9569_v62  ;;  %v11247_v32 = vmax.f32 %v9540_v1, 0.0  ;;  %v12167_v44 = vmax.f32 %v9516_v52, 0.0  ;;  %v4650_v53 = vadd.f32 %v4428_v22, %v3710_v51  ;;  %v4651_v59 = vadd.f32 %v4430_v33, %v3711_v42  ;;  %v12172_v42 = vld [vmem:[#allocation144_spill] sm:$0xff]  ;;  %v12203_v62 = vld [vmem:[#allocation30_spill] sm:$0xff] }
 0x1e2   :  { %12160 = vst [vmem:[#allocation185_spill] sm:$0xff] %v9558_v14  ;;  %12166 = vst [vmem:[#allocation188_spill] sm:$0xff] %v9575_v38  ;;  %v9589_v21 = vmax.f32 %v3085_v29, 0.0  ;;  %5897 = vset.pattern.permute.xlu1 %v11830_v5  ;;  %v5368_v31 = vsel %vm2245_vm1, %v5366_v48, %v5367_v30  ;;  %v9597_v26 = vmax.f32 %v3086_v25, 0.0  ;;  %v9603_v29 = vmul.f32 %v12172_v42, %v9571_v8  ;;  %v12176_v48 = vld [vmem:[#allocation104_spill] sm:$0xff] }
 0x1e3   :  { %v9587_v61 = vmul.f32 %v12162_v49, %v12167_v44  ;;  %12170 = vst [vmem:[#allocation19_spill] sm:$0xff] %v9592_v63  ;;  %5127 = vperm.xlu1 %5897, %v5001_v54   ;;  %v5370_v22 = vsel %vm2245_vm1, %v5367_v30, %v5369_v9  ;;  %v9609_v33 = vmul.f32 %v12172_v42, %v9581_v55  ;;  %v12177_v30 = vld [vmem:[#allocation7_spill] sm:$0xff]  ;;  %v12183_v44 = vld [vmem:[#allocation28_spill] sm:$0xff] }
 0x1e4   :  { %12169 = vst [vmem:[#allocation81_spill] sm:$0xff] %v9589_v21  ;;  %12171 = vst [vmem:[#allocation17_spill] sm:$0xff] %v9597_v26  ;;  %v4124_v49 = vpop.permute.xlu1 %4123  ;;  %v9614_v54 = vmul.f32 %v12172_v42, %v11247_v32  ;;  %v3091_v25 = vadd.f32 %v9331_v18, %v12176_v48  ;;  %v9619_v51 = vadd.f32 %v5368_v31, %v4650_v53  ;;  %v9627_v6 = vpop.permute.xlu0 %3039  ;;  %v12199_v0 = vld [vmem:[#allocation136_spill] sm:$0xff] }
 0x1e5   :  { %12168 = vst [vmem:[#allocation178_spill] sm:$0xff] %v9587_v61  ;;  %12173 = vst [vmem:[#allocation153_spill] sm:$0xff] %v9603_v29  ;;  %v9621_v28 = vadd.f32 %v5370_v22, %v4651_v59  ;;  %v9625_v9 = vmul.f32 %v12177_v30, %v9589_v21  ;;  %v9631_v16 = vmul.f32 %v9285_v60, %v9184_v58  ;;  %v12181_v22 = vmax.f32 %v9575_v38, 0.0  ;;  %v12185_v61 = vld [vmem:[#allocation105_spill] sm:$0xff] }
 0x1e6   :  { %12174 = vst [vmem:[#allocation156_spill] sm:$0xff] %v9609_v33  ;;  %12175 = vst [vmem:[#allocation89_spill] sm:$0xff] %v9614_v54  ;;  %v9635_v42 = vmul.f32 %v9285_v60, %v9194_v11  ;;  %v9639_v53 = vmul.f32 %v12177_v30, %v9597_v26  ;;  %v9643_v59 = vmul.f32 %v9318_v37, %v9208_v3  ;;  %v9666_v29 = vmax.f32 %v3091_v25, 0.0  ;;  %v12211_v26 = vld [vmem:[#allocation140_spill] sm:$0xff] }
 0x1e7   :  { %12178 = vst [vmem:[#allocation192_spill] sm:$0xff] %v9625_v9  ;;  %12179 = vst [vmem:[#allocation194_spill] sm:$0xff] %v9627_v6  ;;  %5898 = vset.pattern.permute.xlu1 %v11805_v57  ;;  %v9650_v48 = vmul.f32 %v12177_v30, %v12181_v22  ;;  %v9654_v60 = vmul.f32 %v9318_v37, %v9210_v17  ;;  %v9658_v32 = vadd.f32 %v9331_v18, %v12183_v44  ;;  %v12190_v30 = vld [vmem:[#allocation131_spill] sm:$0xff] }
 0x1e8   :  { %12180 = vst [vmem:[#allocation196_spill] sm:$0xff] %v9639_v53  ;;  %v4128_v6 = vpop.permute.xlu1 %4127  ;;  %v9664_v31 = vadd.f32 %v9331_v18, %v12185_v61  ;;  %12187 = vst [vmem:[#allocation120_spill] sm:$0xff] %v9666_v29  ;;  %v4240_v37 = vmul.f32 %v9487_v40, %v9184_v58  ;;  %v4241_v44 = vmul.f32 %v9487_v40, %v9194_v11  ;;  %v9673_v22 = vpop.permute.xlu0 %3047  ;;  %v12189_v18 = vmax.f32 %v9161_v24, 0.0  ;;  %v12194_v53 = vld [vmem:[#allocation32_spill] sm:$0xff] }
 0x1e9   :  { %12182 = vst [vmem:[#allocation199_spill] sm:$0xff] %v9650_v48  ;;  %12184 = vst [vmem:[#allocation148_spill] sm:$0xff] %v9658_v32  ;;  %v9678_v57 = vmul.f32 %v9358_v35, %v9273_v56  ;;  %v9684_v25 = vmul.f32 %v4128_v6, %v9530_v36  ;;  %v9689_v11 = vmul.f32 %v9440_v46, %v9192_v7  ;;  %3663 = vperm.xlu1 %5898, %v9109_v41   ;;  %v12193_v48 = vld [vmem:[#allocation197_spill] sm:$0xff] }
 0x1ea   :  { %12186 = vst [vmem:[#allocation27_spill] sm:$0xff] %v9664_v31  ;;  %12188 = vst [vmem:[#allocation94_spill] sm:$0xff] %v9673_v22  ;;  %v4242_v61 = vmul.f32 %v9487_v40, %v12189_v18  ;;  %v9693_v63 = vmul.f32 %v9440_v46, %v12190_v30  ;;  %v4246_v22 = vmul.f32 %v4124_v49, %v9208_v3  ;;  %v12191_v18 = vmax.f32 %v9263_v13, 0.0 }
 0x1eb   :  { %v4247_v40 = vmul.f32 %v4124_v49, %v9210_v17  ;;  %v9701_v58 = vmul.f32 %v4128_v6, %v9532_v45  ;;  %v12192_v31 = vmax.f32 %v9516_v52, 0.0  ;;  %v3723_v9 = vmul.f32 %v9358_v35, %v12193_v48 }
 0x1ec   :  { %v4132_v24 = vpop.permute.xlu1 %4131  ;;  %v4248_v29 = vmul.f32 %v4124_v49, %v12191_v18  ;;  %v12195_v3 = vmax.f32 %v12194_v53, 0.0  ;;  %v4436_v54 = vrot.slane %v4240_v37, 1  ;;  %v4437_v17 = vrot.slane %v4241_v44, 1  ;;  %v9714_v33 = vpop.permute.xlu0 %3055  ;;  %v12197_v49 = vld [vmem:[#allocation122_spill] sm:$0xff] }
 0x1ed   :  { %v9705_v32 = vmul.f32 %v4128_v6, %v12192_v31  ;;  %12196 = vst [vmem:[#allocation200_spill] sm:$0xff] %v9714_v33  ;;  %v9718_v18 = vadd.f32 %v9369_v27, %v12197_v49  ;;  %v9722_v52 = vmul.f32 %v9396_v23, %v12199_v0  ;;  %v9726_v35 = vmul.f32 %v9396_v23, %v9313_v34 }
 0x1ee   :  { %v9712_v41 = vmul.f32 %v9440_v46, %v12195_v3  ;;  %v4439_v6 = vrot.slane %v4242_v61, 1  ;;  %v4446_v37 = vrot.slane %v4246_v22, 1  ;;  %v12201_v44 = vmax.f32 %v9263_v13, 0.0  ;;  %v12202_v3 = vld [vmem:[#allocation134_spill] sm:$0xff]  ;;  %5899 = vset.pattern.permute.xlu1 %v11830_v5 }
 0x1ef   :  { %12198 = vst [vmem:[#allocation154_spill] sm:$0xff] %v9718_v18  ;;  %12200 = vst [vmem:[#allocation147_spill] sm:$0xff] %v9726_v35  ;;  %v4447_v18 = vrot.slane %v4247_v40, 1  ;;  %v4449_v27 = vrot.slane %v4248_v29, 1  ;;  %v5005_v45 = vrot.slane %v12203_v62, %v6032_v12  ;;  %v4252_v23 = vmul.f32 %v4132_v24, %v9273_v56 }
 0x1f0   :  { %v5188_v33 = vmul.f32 %v12202_v3, %v12201_v44  ;;  %v4136_v49 = vpop.permute.xlu1 %4135  ;;  %v4434_v61 = vrot.slane %v9712_v41, 1  ;;  %v4438_v46 = vsel %vm1240_vm0, %v4436_v54, %v4437_v17  ;;  %v4253_v22 = vmul.f32 %v4132_v24, %v12193_v48  ;;  %v3588_v44 = vpop.permute.xlu0 %3587 }
 0x1f1   :  { %v12204_v13 = vmax.f32 %v9298_v39, 0.0  ;;  %v4440_v3 = vsel %vm1240_vm0, %v4437_v17, %v4439_v6  ;;  %v5177_v29 = vmul.f32 %v9528_v47, %v9192_v7  ;;  %v5178_v62 = vmul.f32 %v9528_v47, %v12190_v30  ;;  %5131 = vperm.xlu1 %5899, %v5005_v45  }
 0x1f2   :  { %v4456_v56 = vrot.slane %v4252_v23, 1  ;;  %v12205_v40 = vmax.f32 %v12194_v53, 0.0  ;;  %v5389_v41 = vrot.slane %v5188_v33, 2  ;;  %v4457_v48 = vrot.slane %v4253_v22, 1  ;;  %v12206_v33 = vld [vmem:[#allocation79_spill] sm:$0xff]  ;;  %v12208_v23 = vld [vmem:[#allocation133_spill] sm:$0xff] }
 0x1f3   :  { %v4254_v31 = vmul.f32 %v4132_v24, %v12204_v13  ;;  %v9752_v24 = vmul.f32 %v9577_v20, %v9496_v50  ;;  %v9756_v17 = vmul.f32 %v9577_v20, %v9521_v15  ;;  %v4448_v6 = vsel %vm1240_vm0, %v4446_v37, %v4447_v18 }
 0x1f4   :  { %v5179_v54 = vmul.f32 %v9528_v47, %v12205_v40  ;;  %v4140_v38 = vpop.permute.xlu1 %4139  ;;  %v4450_v45 = vsel %vm1240_vm0, %v4447_v18, %v4449_v27  ;;  %v9761_v53 = vadd.f32 %v4438_v46, %v9631_v16  ;;  %v9764_v47 = vadd.f32 %v4440_v3, %v9635_v42  ;;  %v3596_v35 = vpop.permute.xlu0 %3595 }
 0x1f5   :  { %v4459_v36 = vrot.slane %v4254_v31, 1  ;;  %v12207_v31 = vrot.slane %v12206_v33, 2  ;;  %v12209_v22 = vrot.slane %v12208_v23, 2  ;;  %v12210_v40 = vmax.f32 %v9298_v39, 0.0  ;;  %5900 = vset.pattern.permute.xlu1 %v11903_v10 }
 0x1f6   :  { %v5371_v37 = vrot.slane %v5177_v29, 2  ;;  %v5372_v14 = vrot.slane %v5178_v62, 2  ;;  %v4458_v27 = vsel %vm1240_vm0, %v4456_v56, %v4457_v48  ;;  %v5374_v42 = vrot.slane %v5179_v54, 2  ;;  %v12214_v54 = vld [vmem:[#allocation198_spill] sm:$0xff] }
 0x1f7   :  { %v5388_v13 = vsel %vm2245_vm1, %v12209_v22, %v12207_v31  ;;  %v5194_v21 = vmul.f32 %v12211_v26, %v12210_v40  ;;  %v4460_v16 = vsel %vm1240_vm0, %v4457_v48, %v4459_v36  ;;  %v12212_v18 = vmax.f32 %v9494_v4, 0.0 }
 0x1f8   :  { %v4658_v3 = vadd.f32 %v4448_v6, %v9643_v59  ;;  %v4659_v39 = vadd.f32 %v4450_v45, %v9654_v60  ;;  %v9784_v26 = vpop.permute.xlu1 %4143  ;;  %v4441_v29 = vrot.slane %v9752_v24, 1  ;;  %v4442_v62 = vrot.slane %v9756_v17, 1  ;;  %v9797_v60 = vpop.permute.xlu0 %3603 }
 0x1f9   :  { %v9780_v46 = vmul.f32 %v9577_v20, %v12212_v18  ;;  %v12213_v36 = vmov %v12207_v31  ;;  %v3928_v4 = vcombine.high %v12214_v54, %v12214_v54  ;;  %v4662_v20 = vadd.f32 %v4458_v27, %v9678_v57 }
 0x1fa   :  { %v5390_v56 = vsel %vm2245_vm1, %v12213_v36, %v5389_v41  ;;  %v4663_v48 = vadd.f32 %v4460_v16, %v3723_v9  ;;  %v5399_v31 = vrot.slane %v5194_v21, 2  ;;  %v9795_v59 = vmul.f32 %v4136_v49, %v9571_v8 }
 0x1fb   :  { %v9800_v24 = vrot.slane %v3928_v4, %v6032_v12  ;;  %v9803_v17 = vmul.f32 %v4136_v49, %v9581_v55  ;;  %v12215_v41 = vmax.f32 %v9540_v1, 0.0  ;;  %v3712_v45 = vmul.f32 %v3588_v44, %v9192_v7 }
 0x1fc   :  { %v4444_v57 = vrot.slane %v9780_v46, 1  ;;  %v9811_v21 = vadd.f32 %v5388_v13, %v4658_v3  ;;  %v9813_v9 = vadd.f32 %v5390_v56, %v4659_v39  ;;  %v4451_v33 = vrot.slane %v9684_v25, 1  ;;  %v9816_v23 = vpop.permute.xlu1 %4147  ;;  %v9840_v4 = vpop.permute.xlu0 %3611 }
 0x1fd   :  { %v9807_v6 = vmul.f32 %v4136_v49, %v12215_v41  ;;  %v4452_v22 = vrot.slane %v9701_v58, 1  ;;  %v4454_v40 = vrot.slane %v9705_v32, 1  ;;  %v12216_v1 = vrot.slane %v9322_v2, 2  ;;  %v12217_v49 = vld [vmem:[#allocation76_spill] sm:$0xff]  ;;  %4199 = vperm.xlu1 %5900, %v9800_v24   ;;  %v12255_v32 = vld [vmem:[#allocation178_spill] sm:$0xff] }
 0x1fe   :  { %v12218_v27 = vrot.slane %v12217_v49, 2  ;;  %v3713_v13 = vmul.f32 %v3588_v44, %v12190_v30  ;;  %v12220_v3 = vrot.slane %v9693_v63, 1  ;;  %v12221_v39 = vrot.slane %v9689_v11, 1 }
 0x1ff   :  { %v12219_v16 = vmov %v12216_v1  ;;  %v5373_v44 = vsel %vm2245_vm1, %v5371_v37, %v5372_v14  ;;  %v4258_v11 = vmul.f32 %v4140_v38, %v12199_v0  ;;  %v4259_v49 = vmul.f32 %v4140_v38, %v9313_v34 }
 0x200   :  { %v5398_v7 = vsel %vm2245_vm1, %v12218_v27, %v12216_v1  ;;  %v5400_v18 = vsel %vm2245_vm1, %v12219_v16, %v5399_v31  ;;  %v4433_v36 = vsel %vm1240_vm0, %v12221_v39, %v12220_v3  ;;  %v12222_v56 = vmov %v12220_v3  ;;  %v12223_v31 = vld [vmem:[#allocation135_spill] sm:$0xff]  ;;  %v9856_v16 = vpop.permute.xlu0 %3627 }
 0x201   :  { %v9830_v46 = vadd.f32 %v5398_v7, %v4662_v20  ;;  %v4435_v54 = vsel %vm1240_vm0, %v12222_v56, %v4434_v61  ;;  %v9842_v41 = vadd.f32 %v5400_v18, %v4663_v48  ;;  %v4652_v30 = vadd.f32 %v4433_v36, %v3712_v45  ;;  %5901 = vset.pattern.permute.xlu1 %v11830_v5  ;;  %v9853_v45 = vpop.permute.xlu1 %3619  ;;  %v12225_v39 = vld [vmem:[#allocation63_spill] sm:$0xff] }
 0x202   :  { %v4653_v2 = vadd.f32 %v4435_v54, %v3713_v13  ;;  %v5375_v20 = vsel %vm2245_vm1, %v5372_v14, %v5374_v42  ;;  %v3180_v1 = vmax.f32 %v12223_v31, 0.0  ;;  %v4866_v61 = vcombine.high %v9475_v43, %v9475_v43  ;;  %v12224_v42 = vld [vmem:[#allocation152_spill] sm:$0xff] }
 0x203   :  { %v5592_v27 = vadd.f32 %v5373_v44, %v4652_v30  ;;  %v3716_v48 = vmul.f32 %v3596_v35, %v9496_v50  ;;  %v4466_v7 = vrot.slane %v4258_v11, 1  ;;  %v4467_v14 = vrot.slane %v4259_v49, 1 }
 0x204   :  { %v5593_v63 = vadd.f32 %v5375_v20, %v4653_v2  ;;  %v4260_v37 = vmul.f32 %v4140_v38, %v3180_v1  ;;  %v5200_v13 = vmul.f32 %v12224_v42, %v3180_v1  ;;  %v4461_v34 = vrot.slane %v9795_v59, 1  ;;  %v12227_v38 = vld [vmem:[#allocation53_spill] sm:$0xff]  ;;  %v9874_v49 = vpop.permute.xlu0 %3631  ;;  %v12262_v59 = vld [vmem:[#allocation156_spill] sm:$0xff] }
 0x205   :  { %v4462_v0 = vrot.slane %v9803_v17, 1  ;;  %v5009_v18 = vrot.slane %v4866_v61, %v6032_v12  ;;  %v3717_v3 = vmul.f32 %v3596_v35, %v9521_v15  ;;  %v4468_v43 = vsel %vm1240_vm0, %v4466_v7, %v4467_v14  ;;  %v12229_v61 = vld [vmem:[#allocation77_spill] sm:$0xff]  ;;  %v12231_v7 = vld [vmem:[#allocation124_spill] sm:$0xff] }
 0x206   :  { %v4469_v50 = vrot.slane %v4260_v37, 1  ;;  %v12226_v36 = vrot.slane %v12225_v39, 2  ;;  %v12228_v56 = vrot.slane %v12227_v38, 2  ;;  %v4443_v30 = vsel %vm1240_vm0, %v4441_v29, %v4442_v62  ;;  %v12239_v42 = vld [vmem:[#allocation185_spill] sm:$0xff] }
 0x207   :  { %v5654_v2 = vadd.f32 %v5592_v27, %v9619_v51  ;;  %v5685_v44 = vadd.f32 %v5593_v63, %v9621_v28  ;;  %5135 = vperm.xlu1 %5901, %v5009_v18   ;;  %v4445_v20 = vsel %vm1240_vm0, %v4442_v62, %v4444_v57  ;;  %v4656_v31 = vadd.f32 %v4443_v30, %v3716_v48  ;;  %v12233_v27 = vld [vmem:[#allocation108_spill] sm:$0xff]  ;;  %v12237_v48 = vld [vmem:[#allocation143_spill] sm:$0xff] }
 0x208   :  { %v5408_v54 = vsel %vm2245_vm1, %v12228_v56, %v12226_v36  ;;  %v4470_v15 = vsel %vm1240_vm0, %v4467_v14, %v4469_v50  ;;  %v4666_v35 = vadd.f32 %v4468_v43, %v9722_v52  ;;  %v5409_v1 = vrot.slane %v5200_v13, 2  ;;  %v9896_v43 = vpop.permute.xlu1 %5087  ;;  %v12242_v30 = vld [vmem:[#allocation147_spill] sm:$0xff] }
 0x209   :  { %v4657_v11 = vadd.f32 %v4445_v20, %v3717_v3  ;;  %v12230_v37 = vrot.slane %v12229_v61, 2  ;;  %v12232_v29 = vrot.slane %v12231_v7, 2  ;;  %v12234_v28 = vrot.slane %v12233_v27, 2  ;;  %v12243_v61 = vld [vmem:[#allocation81_spill] sm:$0xff]  ;;  %v12245_v27 = vld [vmem:[#allocation188_spill] sm:$0xff] }
 0x20a   :  { %v12236_v57 = vrot.slane %v9553_v19, 2  ;;  %v12238_v52 = vrot.slane %v12237_v48, 2  ;;  %v12240_v13 = vrot.slane %v12239_v42, 2  ;;  %v4667_v20 = vadd.f32 %v4470_v15, %v12242_v30  ;;  %v12244_v7 = vld [vmem:[#allocation17_spill] sm:$0xff]  ;;  %v12252_v42 = vld [vmem:[#allocation146_spill] sm:$0xff] }
 0x20b   :  { %v5378_v51 = vsel %vm2245_vm1, %v12232_v29, %v12230_v37  ;;  %v12235_v63 = vmov %v12230_v37  ;;  %v4261_v37 = vmul.f32 %v9784_v26, %v12243_v61  ;;  %v4262_v29 = vmul.f32 %v9784_v26, %v12244_v7  ;;  %5902 = vset.pattern.permute.xlu1 %v11903_v10 }
 0x20c   :  { %v5380_v62 = vsel %vm2245_vm1, %v12235_v63, %v12234_v28  ;;  %v5383_v14 = vsel %vm2245_vm1, %v12238_v52, %v12236_v57  ;;  %v12241_v18 = vmov %v12236_v57  ;;  %v5594_v50 = vadd.f32 %v5378_v51, %v9761_v53  ;;  %v12247_v51 = vld [vmem:[#allocation166_spill] sm:$0xff] }
 0x20d   :  { %v5385_v3 = vsel %vm2245_vm1, %v12241_v18, %v12240_v13  ;;  %v5595_v36 = vadd.f32 %v5380_v62, %v9764_v47  ;;  %v5596_v38 = vadd.f32 %v5383_v14, %v4656_v31  ;;  %v12246_v19 = vmax.f32 %v12245_v27, 0.0  ;;  %v12248_v31 = vld [vmem:[#allocation103_spill] sm:$0xff]  ;;  %v9929_v14 = vpop.permute.xlu1 %3623 }
 0x20e   :  { %v5597_v56 = vadd.f32 %v5385_v3, %v4657_v11  ;;  %v5655_v63 = vadd.f32 %v5654_v2, %v5594_v50  ;;  %v3720_v47 = vmul.f32 %v9797_v60, %v12247_v51  ;;  %v3721_v15 = vmul.f32 %v9797_v60, %v12248_v31  ;;  %v9913_v11 = vpop.permute.xlu0 %3647  ;;  %v12260_v51 = vld [vmem:[#allocation87_spill] sm:$0xff] }
 0x20f   :  { %v4263_v28 = vmul.f32 %v9784_v26, %v12246_v19  ;;  %v5686_v53 = vadd.f32 %v5685_v44, %v5595_v36  ;;  %v4464_v62 = vrot.slane %v9807_v6, 1  ;;  %v12249_v57 = vrot.slane %v12225_v39, 2  ;;  %v12261_v31 = vld [vmem:[#allocation151_spill] sm:$0xff] }
 0x210   :  { %v5606_v52 = vadd.f32 %v5408_v54, %v4666_v35  ;;  %v4453_v26 = vsel %vm1240_vm0, %v4451_v33, %v4452_v22  ;;  %v5656_v2 = vadd.f32 %v5655_v63, %v5596_v38  ;;  %v4455_v60 = vsel %vm1240_vm0, %v4452_v22, %v4454_v40  ;;  %v12250_v54 = vld [vmem:[#allocation18_spill] sm:$0xff]  ;;  %v12254_v33 = vld [vmem:[#allocation67_spill] sm:$0xff] }
 0x211   :  { %v5410_v48 = vsel %vm2245_vm1, %v12249_v57, %v5409_v1  ;;  %v5687_v44 = vadd.f32 %v5686_v53, %v5597_v56  ;;  %v4660_v6 = vadd.f32 %v4453_v26, %v3720_v47  ;;  %v4661_v1 = vadd.f32 %v4455_v60, %v3721_v15 }
 0x212   :  { %v5607_v39 = vadd.f32 %v5410_v48, %v4667_v20  ;;  %v12251_v35 = vrot.slane %v12250_v54, 2  ;;  %v12253_v13 = vrot.slane %v12252_v42, 2  ;;  %v9938_v18 = vrot.slane %v12254_v33, %v6032_v12  ;;  %v9947_v38 = vpop.permute.xlu0 %3651 }
 0x213   :  { %v12256_v3 = vrot.slane %v12255_v32, 2  ;;  %v5657_v50 = vadd.f32 %v5656_v2, %v9811_v21  ;;  %v5688_v36 = vadd.f32 %v5687_v44, %v9813_v9  ;;  %12258 = vst [vmem:[#allocation62_spill] sm:$0xff] %v9947_v38  ;;  %v4471_v56 = vrot.slane %v4261_v37, 1  ;;  %v12259_v37 = vld [vmem:[#allocation82_spill] sm:$0xff]  ;;  %v12267_v44 = vld [vmem:[#allocation89_spill] sm:$0xff] }
 0x214   :  { %v5393_v25 = vsel %vm2245_vm1, %v12253_v13, %v12251_v35  ;;  %v12257_v58 = vmov %v12251_v35  ;;  %v4472_v30 = vrot.slane %v4262_v29, 1  ;;  %4203 = vperm.xlu1 %5902, %v9938_v18   ;;  %v3724_v27 = vmul.f32 %v9840_v4, %v9571_v8 }
 0x215   :  { %v5395_v22 = vsel %vm2245_vm1, %v12257_v58, %v12256_v3  ;;  %v5600_v40 = vadd.f32 %v5393_v25, %v4660_v6  ;;  %v4474_v19 = vrot.slane %v4263_v28, 1  ;;  %v3725_v53 = vmul.f32 %v9840_v4, %v9581_v55  ;;  %v9965_v28 = vpop.permute.xlu1 %5091 }
 0x216   :  { %v5601_v20 = vadd.f32 %v5395_v22, %v4661_v1  ;;  %v4463_v21 = vsel %vm1240_vm0, %v4461_v34, %v4462_v0  ;;  %v3186_v29 = vmax.f32 %v12259_v37, 0.0  ;;  %v4264_v47 = vmul.f32 %v9816_v23, %v12260_v51  ;;  %v12264_v34 = vld [vmem:[#allocation153_spill] sm:$0xff]  ;;  %v9974_v2 = vpop.permute.xlu0 %3667 }
 0x217   :  { %v5658_v63 = vadd.f32 %v5657_v50, %v5600_v40  ;;  %v4465_v8 = vsel %vm1240_vm0, %v4462_v0, %v4464_v62  ;;  %v4265_v55 = vmul.f32 %v9816_v23, %v12261_v31  ;;  %v4664_v4 = vadd.f32 %v4463_v21, %v3724_v27  ;;  %12266 = vst [vmem:[#allocation127_spill] sm:$0xff] %v9974_v2  ;;  %v12271_v40 = vld [vmem:[#allocation173_spill] sm:$0xff]  ;;  %v12272_v50 = vld [vmem:[#allocation70_spill] sm:$0xff] }
 0x218   :  { %v5689_v9 = vadd.f32 %v5688_v36, %v5601_v20  ;;  %v4665_v15 = vadd.f32 %v4465_v8, %v3725_v53  ;;  %v12263_v57 = vrot.slane %v12262_v59, 2  ;;  %v12265_v48 = vrot.slane %v12264_v34, 2 }
 0x219   :  { %v12268_v60 = vrot.slane %v12267_v44, 2  ;;  %v5659_v62 = vadd.f32 %v5658_v63, %v9830_v46  ;;  %v12270_v1 = vmov 0   ;;  %v3728_v42 = vmul.f32 %v9853_v45, %v12243_v61  ;;  %v9991_v22 = vpop.permute.xlu1 %4159  ;;  %v12273_v61 = vld [vmem:[#allocation196_spill] sm:$0xff]  ;;  %v12280_v63 = vld [vmem:[#allocation205_spill] sm:$0xff] }
 0x21a   :  { %v5403_v26 = vsel %vm2245_vm1, %v12265_v48, %v12263_v57  ;;  %v12269_v17 = vmov %v12263_v57  ;;  %v5690_v6 = vadd.f32 %v5689_v9, %v9842_v41  ;;  %5903 = vset.pattern.permute.xlu1 %v12270_v1  ;;  %v3729_v13 = vmul.f32 %v9853_v45, %v12244_v7  ;;  %v12275_v45 = vld [vmem:[#allocation192_spill] sm:$0xff]  ;;  %v10010_v21 = vpop.permute.xlu0 %3671 }
 0x21b   :  { %v5405_v0 = vsel %vm2245_vm1, %v12269_v17, %v12268_v60  ;;  %v5604_v54 = vadd.f32 %v5403_v26, %v4664_v4  ;;  %v4266_v25 = vmul.f32 %v9816_v23, %v3186_v29  ;;  %v4473_v33 = vsel %vm1240_vm0, %v4471_v56, %v4472_v30  ;;  %3675 = vperm.xlu1 %5903, %v9800_v24   ;;  %v12277_v56 = vld [vmem:[#allocation199_spill] sm:$0xff]  ;;  %v12282_v60 = vld [vmem:[#allocation148_spill] sm:$0xff] }
 0x21c   :  { %v5605_v35 = vadd.f32 %v5405_v0, %v4665_v15  ;;  %v4475_v32 = vsel %vm1240_vm0, %v4472_v30, %v4474_v19  ;;  %v4668_v58 = vadd.f32 %v4473_v33, %v3728_v42  ;;  %v3098_v36 = vadd.f32 %v12272_v50, %v12271_v40  ;;  %12281 = vst [vmem:[#allocation161_spill] sm:$0xff] %v10010_v21  ;;  %v12283_v0 = vld [vmem:[#allocation27_spill] sm:$0xff] }
 0x21d   :  { %v5660_v3 = vadd.f32 %v5659_v62, %v5604_v54  ;;  %v4669_v41 = vadd.f32 %v4475_v32, %v3729_v13  ;;  %v12274_v20 = vrot.slane %v12273_v61, 2  ;;  %v12276_v7 = vrot.slane %v12275_v45, 2  ;;  %v5096_v42 = vpop.permute.xlu1 %5095  ;;  %v12287_v13 = vld [vmem:[#allocation121_spill] sm:$0xff]  ;;  %v12290_v45 = vld [vmem:[#allocation6_spill] sm:$0xff] }
 0x21e   :  { %v5691_v46 = vadd.f32 %v5690_v6, %v5605_v35  ;;  %v12278_v27 = vrot.slane %v12277_v56, 2  ;;  %v10008_v53 = vrot.slane %v12280_v63, %v6032_v12  ;;  %v4476_v4 = vrot.slane %v4264_v47, 1  ;;  %v12284_v47 = vld [vmem:[#allocation55_spill] sm:$0xff]  ;;  %v12285_v6 = vld [vmem:[#allocation154_spill] sm:$0xff]  ;;  %v12294_v63 = vld [vmem:[#allocation72_spill] sm:$0xff] }
 0x21f   :  { %v5413_v23 = vsel %vm2245_vm1, %v12276_v7, %v12274_v20  ;;  %v12279_v30 = vmov %v12274_v20  ;;  %v5661_v37 = vadd.f32 %v5660_v3, %v5606_v52  ;;  %v4477_v15 = vrot.slane %v4265_v55, 1  ;;  %5904 = vset.pattern.permute.xlu1 %v11903_v10  ;;  %v12291_v7 = vld [vmem:[#allocation31_spill] sm:$0xff] }
 0x220   :  { %v5415_v19 = vsel %vm2245_vm1, %v12279_v30, %v12278_v27  ;;  %v5608_v9 = vadd.f32 %v5413_v23, %v4668_v58  ;;  %v5692_v8 = vadd.f32 %v5691_v46, %v5607_v39  ;;  %v5204_v59 = vmul.f32 %v9896_v43, %v12260_v51  ;;  %4207 = vperm.xlu1 %5904, %v10008_v53   ;;  %v12289_v58 = vld [vmem:[#allocation126_spill] sm:$0xff] }
 0x221   :  { %v5609_v24 = vadd.f32 %v5415_v19, %v4669_v41  ;;  %v5205_v57 = vmul.f32 %v9896_v43, %v12261_v31  ;;  %v4479_v34 = vrot.slane %v4266_v25, 1  ;;  %v5206_v44 = vmul.f32 %v9896_v43, %v3186_v29  ;;  %v10030_v29 = vpop.permute.xlu0 %3687  ;;  %v12288_v25 = vld [vmem:[#allocation158_spill] sm:$0xff] }
 0x222   :  { %v5662_v48 = vadd.f32 %v5661_v37, %v5608_v9  ;;  %v10018_v17 = vmax.f32 %v12282_v60, 0.0  ;;  %v3189_v62 = vmax.f32 %v12283_v0, 0.0  ;;  %v5416_v52 = vrot.slane %v5204_v59, 2  ;;  %12286 = vst [vmem:[#allocation41_spill] sm:$0xff] %v10030_v29 }
 0x223   :  { %v5693_v26 = vadd.f32 %v5692_v8, %v5609_v24  ;;  %v5417_v39 = vrot.slane %v5205_v57, 2  ;;  %v3099_v55 = vadd.f32 %v12272_v50, %v12284_v47  ;;  %v10025_v54 = vmax.f32 %v12285_v6, 0.0  ;;  %v4164_v8 = vpop.permute.xlu1 %4163  ;;  %v12297_v6 = vld [vmem:[#allocation137_spill] sm:$0xff] }
 0x224   :  { %v5419_v35 = vrot.slane %v5206_v44, 2  ;;  %v3730_v43 = vmul.f32 %v9929_v14, %v12260_v51  ;;  %v3103_v33 = vadd.f32 %v12288_v25, %v12287_v13  ;;  %v3731_v32 = vmul.f32 %v9929_v14, %v12261_v31  ;;  %5906 = vset.pattern.permute.xlu1 %v12270_v1  ;;  %v12300_v13 = vld [vmem:[#allocation203_spill] sm:$0xff] }
 0x225   :  { %v4478_v3 = vsel %vm1240_vm0, %v4476_v4, %v4477_v15  ;;  %v10037_v46 = vmax.f32 %v3098_v36, 0.0  ;;  %v3104_v41 = vadd.f32 %v12288_v25, %v12289_v58  ;;  %v4480_v40 = vsel %vm1240_vm0, %v4477_v15, %v4479_v34  ;;  %v12293_v36 = vld [vmem:[#allocation120_spill] sm:$0xff]  ;;  %3679 = vperm.xlu1 %5906, %v9938_v18   ;;  %v10067_v34 = vpop.permute.xlu0 %3691 }
 0x226   :  { %v4670_v50 = vadd.f32 %v4478_v3, %v3730_v43  ;;  %v4671_v51 = vadd.f32 %v4480_v40, %v3731_v32  ;;  %v5418_v61 = vsel %vm2245_vm1, %v5416_v52, %v5417_v39  ;;  %v5420_v20 = vsel %vm2245_vm1, %v5417_v39, %v5419_v35  ;;  %12295 = vst [vmem:[#allocation149_spill] sm:$0xff] %v10067_v34  ;;  %v12299_v43 = vld [vmem:[#allocation68_spill] sm:$0xff]  ;;  %v12301_v3 = vld [vmem:[#allocation142_spill] sm:$0xff] }
 0x227   :  { %v12292_v23 = vcombine.high %v12291_v7, %v12291_v7  ;;  %v5207_v56 = vmul.f32 %v9965_v28, %v12293_v36  ;;  %v5208_v27 = vmul.f32 %v9965_v28, %v10018_v17  ;;  %v5209_v30 = vmul.f32 %v9965_v28, %v3189_v62  ;;  %v12296_v28 = vld [vmem:[#allocation162_spill] sm:$0xff]  ;;  %v3636_v7 = vpop.permute.xlu1 %3635 }
 0x228   :  { %v5610_v31 = vadd.f32 %v5418_v61, %v4670_v50  ;;  %v3195_v19 = vmax.f32 %v3099_v55, 0.0  ;;  %v10060_v9 = vadd.f32 %v12288_v25, %v12294_v63  ;;  %v5611_v24 = vadd.f32 %v5420_v20, %v4671_v51  ;;  %v12302_v40 = vld [vmem:[#allocation74_spill] sm:$0xff]  ;;  %v12303_v61 = vld [vmem:[#allocation92_spill] sm:$0xff] }
 0x229   :  { %v10048_v14 = vrot.slane %v12292_v23, %v12290_v45  ;;  %v5421_v15 = vrot.slane %v5207_v56, 2  ;;  %v5422_v59 = vrot.slane %v5208_v27, 2  ;;  %v5424_v57 = vrot.slane %v5209_v30, 2  ;;  %5907 = vset.pattern.permute.xlu1 %v11830_v5 }
 0x22a   :  { %v10065_v4 = vadd.f32 %v5662_v48, %v5610_v31  ;;  %v10071_v44 = vmul.f32 %v12296_v28, %v10025_v54  ;;  %v10073_v60 = vadd.f32 %v5693_v26, %v5611_v24  ;;  %v4273_v18 = vmul.f32 %v9991_v22, %v10025_v54  ;;  %v12298_v26 = vld [vmem:[#allocation9_spill] sm:$0xff]  ;;  %v12304_v31 = vld [vmem:[#allocation80_spill] sm:$0xff] }
 0x22b   :  { %v5021_v37 = vrot.slane %v10048_v14, %v6032_v12  ;;  %v4274_v52 = vmul.f32 %v9991_v22, %v10037_v46  ;;  %v5214_v48 = vmul.f32 %v12296_v28, %v10037_v46  ;;  %v10082_v39 = vsel %vm2245_vm1, %v5421_v15, %v5422_v59 }
 0x22c   :  { %v10085_v47 = vsel %vm2245_vm1, %v5422_v59, %v5424_v57  ;;  %v4275_v55 = vmul.f32 %v9991_v22, %v3195_v19  ;;  %v10090_v35 = vmul.f32 %v12298_v26, %v12297_v6  ;;  %v10094_v25 = vadd.f32 %v12300_v13, %v12299_v43 }
 0x22d   :  { %v5215_v32 = vmul.f32 %v12296_v28, %v3195_v19  ;;  %v3190_v58 = vmax.f32 %v12301_v3, 0.0  ;;  %v10101_v50 = vmul.f32 %v12298_v26, %v12302_v40  ;;  %v10103_v51 = vmax.f32 %v3103_v33, 0.0  ;;  %5147 = vperm.xlu1 %5907, %v5021_v37   ;;  %v12305_v33 = vld [vmem:[#allocation83_spill] sm:$0xff] }
 0x22e   :  { %v10105_v22 = vmax.f32 %v3104_v41, 0.0  ;;  %v3191_v20 = vmax.f32 %v12303_v61, 0.0  ;;  %v3192_v56 = vmax.f32 %v12304_v31, 0.0  ;;  %v5431_v30 = vrot.slane %v10071_v44, 2  ;;  %v4152_v41 = vpop.permute.xlu0 %4151  ;;  %v4168_v31 = vpop.permute.xlu1 %4167 }
 0x22f   :  { %v10110_v27 = vmul.f32 %v5096_v42, %v3190_v58  ;;  %v5432_v19 = vrot.slane %v5214_v48, 2  ;;  %v10117_v24 = vrot.slane %v12305_v33, %v12290_v45  ;;  %v5434_v15 = vrot.slane %v5215_v32, 2  ;;  %v12306_v32 = vld [vmem:[#allocation34_spill] sm:$0xff] }
 0x230   :  { %v10113_v63 = vmul.f32 %v5096_v42, %v3191_v20  ;;  %v3732_v37 = vmul.f32 %v9856_v16, %v12293_v36  ;;  %v3733_v59 = vmul.f32 %v9856_v16, %v10018_v17  ;;  %v10123_v57 = vmul.f32 %v5096_v42, %v3192_v56 }
 0x231   :  { %v10126_v28 = vmul.f32 %v9874_v49, %v3190_v58  ;;  %v10129_v44 = vmul.f32 %v9874_v49, %v3191_v20  ;;  %5908 = vset.pattern.permute.xlu1 %v12270_v1  ;;  %v4491_v48 = vrot.slane %v4273_v18, 1  ;;  %v4492_v43 = vrot.slane %v4274_v52, 1  ;;  %v12308_v18 = vld [vmem:[#allocation130_spill] sm:$0xff] }
 0x232   :  { %3683 = vperm.xlu1 %5908, %v10008_v53   ;;  %v4494_v13 = vrot.slane %v4275_v55, 1  ;;  %v12307_v3 = vcombine.high %v12306_v32, %v12306_v32  ;;  %v5426_v42 = vrot.slane %v10110_v27, 2  ;;  %v4267_v61 = vmul.f32 %v4152_v41, %v12293_v36  ;;  %v4156_v34 = vpop.permute.xlu0 %4155 }
 0x233   :  { %v5427_v49 = vrot.slane %v10113_v63, 2  ;;  %v4093_v33 = vrot.slane %v10117_v24, %v6032_v12  ;;  %v3198_v52 = vmax.f32 %v12308_v18, 0.0  ;;  %v10144_v53 = vmul.f32 %v4164_v8, %v12297_v6 }
 0x234   :  { %v5025_v16 = vrot.slane %v12307_v3, %v6032_v12  ;;  %v5429_v55 = vrot.slane %v10123_v57, 2  ;;  %v10148_v32 = vmul.f32 %v4164_v8, %v12302_v40  ;;  %v4268_v27 = vmul.f32 %v4152_v41, %v10018_v17 }
 0x235   :  { %v4269_v36 = vmul.f32 %v4152_v41, %v3189_v62  ;;  %v10153_v3 = vmul.f32 %v4164_v8, %v3198_v52  ;;  %v4916_v63 = vcombine.high %v10048_v14, %v10048_v14  ;;  %v4481_v23 = vrot.slane %v4267_v61, 1  ;;  %v3640_v41 = vpop.permute.xlu1 %3639 }
 0x236   :  { %v3736_v18 = vmul.f32 %v3636_v7, %v10025_v54  ;;  %5909 = vset.pattern.permute.xlu1 %v11830_v5  ;;  %v4482_v57 = vrot.slane %v4268_v27, 1  ;;  %v3737_v21 = vmul.f32 %v3636_v7, %v10037_v46  ;;  %v4493_v17 = vsel %vm1240_vm0, %v4491_v48, %v4492_v43 }
 0x237   :  { %v4484_v29 = vrot.slane %v4269_v36, 1  ;;  %5151 = vperm.xlu1 %5909, %v5025_v16   ;;  %v4495_v0 = vsel %vm1240_vm0, %v4492_v43, %v4494_v13  ;;  %v5433_v8 = vsel %vm2245_vm1, %v5431_v30, %v5432_v19  ;;  %v5435_v14 = vsel %vm2245_vm1, %v5432_v19, %v5434_v15 }
 0x238   :  { %v4676_v62 = vadd.f32 %v4493_v17, %v3736_v18  ;;  %v4483_v54 = vsel %vm1240_vm0, %v4481_v23, %v4482_v57  ;;  %v4677_v2 = vadd.f32 %v4495_v0, %v3737_v21  ;;  %v4270_v27 = vmul.f32 %v4156_v34, %v3190_v58  ;;  %v12312_v18 = vld [vmem:[#allocation145_spill] sm:$0xff] }
 0x239   :  { %v4485_v61 = vsel %vm1240_vm0, %v4482_v57, %v4484_v29  ;;  %v4672_v36 = vadd.f32 %v4483_v54, %v3732_v37  ;;  %v4271_v7 = vmul.f32 %v4156_v34, %v3191_v20  ;;  %v4496_v48 = vrot.slane %v10144_v53, 1 }
 0x23a   :  { %v4673_v38 = vadd.f32 %v4485_v61, %v3733_v59  ;;  %v10166_v46 = vadd.f32 %v5433_v8, %v4676_v62  ;;  %v10169_v43 = vadd.f32 %v5435_v14, %v4677_v2  ;;  %v4272_v13 = vmul.f32 %v4156_v34, %v3192_v56  ;;  %v10185_v56 = vpop.permute.xlu1 %5107  ;;  %v12314_v61 = vld [vmem:[#allocation174_spill] sm:$0xff] }
 0x23b   :  { %v4486_v30 = vrot.slane %v4270_v27, 1  ;;  %5910 = vset.pattern.permute.xlu1 %v11903_v10  ;;  %v5612_v19 = vadd.f32 %v10082_v39, %v4672_v36  ;;  %v4487_v29 = vrot.slane %v4271_v7, 1  ;;  %v10175_v21 = vmul.f32 %v4168_v31, %v10103_v51  ;;  %v12317_v36 = vld [vmem:[#allocation141_spill] sm:$0xff]  ;;  %v12318_v7 = vld [vmem:[#allocation44_spill] sm:$0xff] }
 0x23c   :  { %v5613_v23 = vadd.f32 %v10085_v47, %v4673_v38  ;;  %4219 = vperm.xlu1 %5910, %v4093_v33   ;;  %v5218_v58 = vmul.f32 %v12298_v26, %v3198_v52  ;;  %v4489_v20 = vrot.slane %v4272_v13, 1  ;;  %v10179_v15 = vmul.f32 %v4168_v31, %v10105_v22  ;;  %v12311_v52 = vld [vmem:[#allocation169_spill] sm:$0xff] }
 0x23d   :  { %v12309_v2 = vmax.f32 %v10060_v9, 0.0  ;;  %v5029_v39 = vrot.slane %v4916_v63, %v6032_v12  ;;  %v5664_v38 = vadd.f32 %v10065_v4, %v5612_v19  ;;  %v4488_v37 = vsel %vm1240_vm0, %v4486_v30, %v4487_v29 }
 0x23e   :  { %v5695_v47 = vadd.f32 %v10073_v60, %v5613_v23  ;;  %v4497_v26 = vrot.slane %v10148_v32, 1  ;;  %v4499_v59 = vrot.slane %v10153_v3, 1  ;;  %v4490_v16 = vsel %vm1240_vm0, %v4487_v29, %v4489_v20  ;;  %v5944_v32 = vld [vmem:[%s10975_s3 + $0x18] sm:$0xff]  ;;  %v10210_v14 = vpop.permute.xlu1 %3643  ;;  %v12319_v23 = vld [vmem:[#allocation64_spill] sm:$0xff] }
 0x23f   :  { %v10183_v34 = vmul.f32 %v4168_v31, %v12309_v2  ;;  %v4674_v33 = vadd.f32 %v4488_v37, %v10126_v28  ;;  %v12310_v31 = vld [vmem:[#allocation164_spill] sm:$0xff]  ;;  %v3113_v63 = vadd.f32 %v12311_v52, %v12312_v18  ;;  %v5428_v4 = vsel %vm2245_vm1, %v5426_v42, %v5427_v49  ;;  %v12313_v42 = vld [vmem:[#allocation165_spill] sm:$0xff] }
 0x240   :  { %v3112_v53 = vadd.f32 %v12311_v52, %v12310_v31  ;;  %v4675_v60 = vadd.f32 %v4490_v16, %v10129_v44  ;;  %v5430_v57 = vsel %vm2245_vm1, %v5427_v49, %v5429_v55  ;;  %5911 = vset.pattern.permute.xlu1 %v11830_v5  ;;  %v3405_v3 = vcombine.high %v5944_v32, %v5944_v32  ;;  %v10237_v2 = vld [vmem:[%s10972_s0] sm:$0xff] }
 0x241   :  { %v3738_v28 = vmul.f32 %v3640_v41, %v12297_v6  ;;  %v3739_v17 = vmul.f32 %v3640_v41, %v12302_v40  ;;  %v5439_v0 = vrot.slane %v5218_v58, 2  ;;  %5155 = vperm.xlu1 %5911, %v5029_v39   ;;  %v5614_v62 = vadd.f32 %v5428_v4, %v4674_v33  ;;  %v12315_v40 = vld [vmem:[#allocation167_spill] sm:$0xff]  ;;  %v12320_v58 = vld [vmem:[#allocation132_spill] sm:$0xff] }
 0x242   :  { %v5615_v8 = vadd.f32 %v5430_v57, %v4675_v60  ;;  %v4097_v44 = vrot.slane %v12313_v42, %v6032_v12  ;;  %v10213_v49 = vrot.slane %v3405_v3, %v12290_v45  ;;  %v4498_v55 = vsel %vm1240_vm0, %v4496_v48, %v4497_v26  ;;  %v12321_v39 = vld [vmem:[#allocation112_spill] sm:$0xff]  ;;  %v10250_v4 = vpop.permute.xlu1 %5111 }
 0x243   :  { %v4500_v54 = vsel %vm1240_vm0, %v4497_v26, %v4499_v59  ;;  %v5436_v6 = vrot.slane %v10090_v35, 2  ;;  %v12316_v41 = vrot.slane %v12315_v40, 1  ;;  %v3106_v13 = vadd.f32 %v12318_v7, %v12317_v36  ;;  %v12324_v3 = vld [vmem:[#allocation204_spill] sm:$0xff]  ;;  %v12329_v40 = vld [vmem:[#allocation171_spill] sm:$0xff]  ;;  %v12330_v36 = vld [vmem:[#allocation50_spill] sm:$0xff] }
 0x244   :  { %v4678_v30 = vadd.f32 %v4498_v55, %v3738_v28  ;;  %v4679_v19 = vadd.f32 %v4500_v54, %v3739_v17  ;;  %v3107_v29 = vadd.f32 %v12318_v7, %v12319_v23  ;;  %v10227_v20 = vadd.f32 %v12318_v7, %v12320_v58  ;;  %v12325_v17 = vld [vmem:[#allocation102_spill] sm:$0xff]  ;;  %v12327_v55 = vld [vmem:[#allocation23_spill] sm:$0xff]  ;;  %v4172_v58 = vpop.permute.xlu0 %4171 }
 0x245   :  { %v1559_v27 = vadd.f32 %v12316_v41, %v12314_v61  ;;  %v10231_v48 = vrot.slane %v10213_v49, %v12290_v45  ;;  %v5437_v35 = vrot.slane %v10101_v50, 2  ;;  %v558_v37 = vmul.f32 %v10237_v2, %v12321_v39  ;;  %5913 = vset.pattern.permute.xlu1 %v11903_v10  ;;  %v12331_v7 = vld [vmem:[#allocation75_spill] sm:$0xff] }
 0x246   :  { %v10241_v26 = vmax.f32 %v3112_v53, 0.0  ;;  %v5665_v59 = vadd.f32 %v5664_v38, %v5614_v62  ;;  %v5696_v16 = vadd.f32 %v5695_v47, %v5615_v8  ;;  %v10244_v33 = vmax.f32 %v3113_v63, 0.0  ;;  %4223 = vperm.xlu1 %5913, %v4097_v44   ;;  %v12322_v38 = vld [vmem:[#allocation155_spill] sm:$0xff]  ;;  %v12323_v47 = vld [vmem:[#allocation66_spill] sm:$0xff] }
 0x247   :  { %v3569_v50 = vrot.slane %v10231_v48, %v6032_v12  ;;  %v5438_v31 = vsel %vm2245_vm1, %v5436_v6, %v5437_v35  ;;  %v5440_v18 = vsel %vm2245_vm1, %v5437_v35, %v5439_v0  ;;  %v2562_v63 = vadd.f32 %v12323_v47, %v12322_v38  ;;  %v12328_v6 = vld [vmem:[#allocation93_spill] sm:$0xff] }
 0x248   :  { %v5618_v60 = vadd.f32 %v5438_v31, %v4678_v30  ;;  %v5619_v57 = vadd.f32 %v5440_v18, %v4679_v19  ;;  %v5666_v53 = vadd.f32 %v5665_v59, %v10166_v46  ;;  %v5697_v32 = vadd.f32 %v5696_v16, %v10169_v43  ;;  %v10269_v46 = vld [vmem:[%s10972_s0 + $0x8] sm:$0xff] }
 0x249   :  { %v10258_v28 = vadd.f32 %v12324_v3, %v10094_v25  ;;  %v12326_v62 = vrot.slane %v12325_v17, 2  ;;  %v3975_v0 = vcombine.high %v10117_v24, %v10117_v24  ;;  %v10273_v43 = vmul.f32 %v10269_v46, %v12321_v39  ;;  %v10278_v25 = vld [vmem:[%s10972_s0 + $0x10] sm:$0xf]  ;;  %v12333_v18 = vld [vmem:[#allocation128_spill] sm:$0xff] }
 0x24a   :  { %v10282_v42 = vmul.f32 %v10278_v25, %v12321_v39  ;;  %v5667_v44 = vadd.f32 %v5666_v53, %v5618_v60  ;;  %v5698_v24 = vadd.f32 %v5697_v32, %v5619_v57  ;;  %v10285_v54 = vadd.f32 %v12327_v55, %v558_v37  ;;  %5914 = vset.pattern.permute.xlu1 %v12270_v1 }
 0x24b   :  { %v10262_v8 = vadd.f32 %v12326_v62, %v1559_v27  ;;  %v10289_v61 = vadd.f32 %v12311_v52, %v12328_v6  ;;  %v10293_v41 = vmul.f32 %v12329_v40, %v10241_v26  ;;  %v10297_v27 = vmul.f32 %v12329_v40, %v10244_v33  ;;  %3695 = vperm.xlu1 %5914, %v3569_v50   ;;  %v10303_v52 = vpop.permute.xlu1 %4179 }
 0x24c   :  { %v3109_v30 = vadd.f32 %v12331_v7, %v12330_v36  ;;  %v3202_v19 = vmax.f32 %v3106_v13, 0.0  ;;  %v3203_v23 = vmax.f32 %v3107_v29, 0.0  ;;  %v3204_v35 = vmax.f32 %v10227_v20, 0.0 }
 0x24d   :  { %v4101_v39 = vrot.slane %v3975_v0, %v6032_v12  ;;  %v5219_v37 = vmul.f32 %v10185_v56, %v10103_v51  ;;  %v5220_v59 = vmul.f32 %v10185_v56, %v10105_v22  ;;  %v12332_v16 = vmax.f32 %v10060_v9, 0.0 }
 0x24e   :  { %v4501_v13 = vrot.slane %v10175_v21, 1  ;;  %v4502_v29 = vrot.slane %v10179_v15, 1  ;;  %v4504_v20 = vrot.slane %v10183_v34, 1  ;;  %v3421_v50 = vcombine.high %v10213_v49, %v10213_v49  ;;  %v12334_v15 = vld [vmem:[#allocation35_spill] sm:$0xff]  ;;  %v12335_v34 = vld [vmem:[#allocation57_spill] sm:$0xff] }
 0x24f   :  { %v5221_v31 = vmul.f32 %v10185_v56, %v12332_v16  ;;  %v3110_v60 = vadd.f32 %v12331_v7, %v12333_v18  ;;  %v4282_v57 = vmul.f32 %v4172_v58, %v3202_v19  ;;  %v5441_v53 = vrot.slane %v5219_v37, 2  ;;  %5915 = vset.pattern.permute.xlu1 %v11903_v10  ;;  %v10335_v62 = vpop.permute.xlu1 %5115  ;;  %v12337_v37 = vld [vmem:[#allocation176_spill] sm:$0xff] }
 0x250   :  { %v5442_v32 = vrot.slane %v5220_v59, 2  ;;  %v4283_v38 = vmul.f32 %v4172_v58, %v3203_v23  ;;  %v4284_v47 = vmul.f32 %v4172_v58, %v3204_v35  ;;  %v10322_v21 = vrot.slane %v3421_v50, %v12290_v45  ;;  %4227 = vperm.xlu1 %5915, %v4101_v39   ;;  %v12336_v39 = vld [vmem:[#allocation129_spill] sm:$0xff] }
 0x251   :  { %v5444_v9 = vrot.slane %v5221_v31, 2  ;;  %v10325_v56 = vadd.f32 %v12334_v15, %v2562_v63  ;;  %v10329_v49 = vadd.f32 %v12331_v7, %v12335_v34  ;;  %v3740_v3 = vmul.f32 %v10210_v14, %v10103_v51 }
 0x252   :  { %v3741_v17 = vmul.f32 %v10210_v14, %v10105_v22  ;;  %v10337_v10 = vmax.f32 %v3109_v30, 0.0  ;;  %v3573_v45 = vrot.slane %v10322_v21, %v6032_v12  ;;  %v4503_v63 = vsel %vm1240_vm0, %v4501_v13, %v4502_v29  ;;  %v12338_v13 = vld [vmem:[#allocation26_spill] sm:$0xff] }
 0x253   :  { %v4505_v0 = vsel %vm1240_vm0, %v4502_v29, %v4504_v20  ;;  %v10343_v55 = vmax.f32 %v3110_v60, 0.0  ;;  %v4680_v6 = vadd.f32 %v4503_v63, %v3740_v3  ;;  %v5443_v51 = vsel %vm2245_vm1, %v5441_v53, %v5442_v32  ;;  %v12339_v20 = vld [vmem:[#allocation65_spill] sm:$0xff]  ;;  %v10359_v53 = vpop.permute.xlu1 %4183 }
 0x254   :  { %v4681_v36 = vadd.f32 %v4505_v0, %v3741_v17  ;;  %v4506_v7 = vrot.slane %v4282_v57, 1  ;;  %v4507_v58 = vrot.slane %v4283_v38, 1  ;;  %v4509_v22 = vrot.slane %v4284_v47, 1  ;;  %5916 = vset.pattern.permute.xlu1 %v12270_v1  ;;  %v4176_v57 = vpop.permute.xlu0 %4175  ;;  %v12340_v47 = vld [vmem:[#allocation115_spill] sm:$0xff] }
 0x255   :  { %v5445_v14 = vsel %vm2245_vm1, %v5442_v32, %v5444_v9  ;;  %v3207_v30 = vmax.f32 %v10329_v49, 0.0  ;;  %v3115_v59 = vadd.f32 %v12337_v37, %v12336_v39  ;;  %v5620_v16 = vadd.f32 %v5443_v51, %v4680_v6  ;;  %3699 = vperm.xlu1 %5916, %v3573_v45  }
 0x256   :  { %v5621_v31 = vadd.f32 %v5445_v14, %v4681_v36  ;;  %v3116_v29 = vadd.f32 %v12337_v37, %v12338_v13  ;;  %v10355_v50 = vadd.f32 %v12337_v37, %v12339_v20  ;;  %v3742_v18 = vmul.f32 %v9913_v11, %v3202_v19 }
 0x257   :  { %v3743_v60 = vmul.f32 %v9913_v11, %v3203_v23  ;;  %v5668_v32 = vadd.f32 %v5667_v44, %v5620_v16  ;;  %v4915_v9 = vcombine.high %v12340_v47, %v12340_v47  ;;  %v5222_v34 = vmul.f32 %v10250_v4, %v3202_v19 }
 0x258   :  { %v5699_v38 = vadd.f32 %v5698_v24, %v5621_v31  ;;  %v4508_v3 = vsel %vm1240_vm0, %v4506_v7, %v4507_v58  ;;  %v4510_v17 = vsel %vm1240_vm0, %v4507_v58, %v4509_v22  ;;  %v5223_v63 = vmul.f32 %v10250_v4, %v3203_v23  ;;  %v10380_v58 = vpop.permute.xlu1 %3655 }
 0x259   :  { %v5224_v0 = vmul.f32 %v10250_v4, %v3204_v35  ;;  %v4285_v11 = vmul.f32 %v4176_v57, %v10337_v10  ;;  %v4286_v45 = vmul.f32 %v4176_v57, %v10343_v55  ;;  %v5041_v44 = vrot.slane %v4915_v9, %v6032_v12  ;;  %5918 = vset.pattern.permute.xlu1 %v11830_v5 }
 0x25a   :  { %v5446_v24 = vrot.slane %v5222_v34, 2  ;;  %v3119_v6 = vadd.f32 %v12334_v15, %v10258_v28  ;;  %v10373_v36 = vmax.f32 %v3115_v59, 0.0  ;;  %v5447_v19 = vrot.slane %v5223_v63, 2  ;;  %v12343_v63 = vld [vmem:[#allocation175_spill] sm:$0xff] }
 0x25b   :  { %v5449_v51 = vrot.slane %v5224_v0, 2  ;;  %v10376_v7 = vmax.f32 %v3116_v29, 0.0  ;;  %v4682_v23 = vadd.f32 %v4508_v3, %v3742_v18  ;;  %v4683_v4 = vadd.f32 %v4510_v17, %v3743_v60  ;;  %5167 = vperm.xlu1 %5918, %v5041_v44   ;;  %v12341_v18 = vld [vmem:[#allocation99_spill] sm:$0xff] }
 0x25c   :  { %v4287_v35 = vmul.f32 %v4176_v57, %v3207_v30  ;;  %v3213_v22 = vmax.f32 %v10355_v50, 0.0  ;;  %v5448_v28 = vsel %vm2245_vm1, %v5446_v24, %v5447_v19  ;;  %v3451_v5 = vcombine.high %v10231_v48, %v10231_v48  ;;  %v12342_v60 = vld [vmem:[#allocation95_spill] sm:$0xff]  ;;  %v10428_v0 = vpop.permute.xlu1 %4187 }
 0x25d   :  { %v5450_v14 = vsel %vm2245_vm1, %v5447_v19, %v5449_v51  ;;  %v4511_v39 = vrot.slane %v4285_v11, 1  ;;  %v4512_v37 = vrot.slane %v4286_v45, 1  ;;  %v5622_v59 = vadd.f32 %v5448_v28, %v4682_v23  ;;  %v12346_v19 = vld [vmem:[#allocation62_spill] sm:$0xff] }
 0x25e   :  { %v5623_v16 = vadd.f32 %v5450_v14, %v4683_v4  ;;  %v3577_v31 = vrot.slane %v3451_v5, %v6032_v12  ;;  %v3210_v13 = vmax.f32 %v10289_v61, 0.0  ;;  %v10391_v29 = vmul.f32 %v10303_v52, %v10241_v26  ;;  %v4192_v4 = vpop.permute.xlu0 %4191 }
 0x25f   :  { %v10395_v20 = vmul.f32 %v10303_v52, %v10244_v33  ;;  %v3121_v57 = vadd.f32 %v12342_v60, %v12341_v18  ;;  %v4514_v48 = vrot.slane %v4287_v35, 1  ;;  %v10399_v47 = vadd.f32 %v5668_v32, %v5622_v59  ;;  %5919 = vset.pattern.permute.xlu1 %v12270_v1  ;;  %v12344_v1 = vld [vmem:[#allocation100_spill] sm:$0xff] }
 0x260   :  { %v10401_v9 = vadd.f32 %v5699_v38, %v5623_v16  ;;  %v10406_v61 = vadd.f32 %v12334_v15, %v10262_v8  ;;  %v10409_v34 = vmax.f32 %v10325_v56, 0.0  ;;  %v10411_v3 = vmax.f32 %v3119_v6, 0.0  ;;  %3703 = vperm.xlu1 %5919, %v3577_v31   ;;  %v12345_v15 = vld [vmem:[#allocation193_spill] sm:$0xff] }
 0x261   :  { %v4290_v17 = vmul.f32 %v10303_v52, %v3210_v13  ;;  %v10416_v32 = vmul.f32 %v12343_v63, %v10373_v36  ;;  %v10420_v38 = vmul.f32 %v12343_v63, %v10376_v7  ;;  %v3122_v8 = vadd.f32 %v12342_v60, %v12344_v1 }
 0x262   :  { %v10426_v56 = vadd.f32 %v12342_v60, %v12345_v15  ;;  %v4513_v11 = vsel %vm1240_vm0, %v4511_v39, %v4512_v37  ;;  %v3453_v52 = vcombine.high %v10322_v21, %v10322_v21  ;;  %v5225_v45 = vmul.f32 %v10335_v62, %v10337_v10  ;;  %v5844_v60 = vld [vmem:[#allocation2] ss:$0 sm:$0xff] }
 0x263   :  { %v5226_v44 = vmul.f32 %v10335_v62, %v10343_v55  ;;  %v10440_v24 = vmul.f32 %v12343_v63, %v3213_v22  ;;  %v10442_v6 = vmax.f32 %v3121_v57, 0.0  ;;  %v3744_v51 = vmul.f32 %v12346_v19, %v10337_v10  ;;  %v3660_v57 = vpop.permute.xlu1 %3659 }
 0x264   :  { %v4515_v23 = vsel %vm1240_vm0, %v4512_v37, %v4514_v48  ;;  %v3581_v21 = vrot.slane %v3453_v52, %v6032_v12  ;;  %v5227_v35 = vmul.f32 %v10335_v62, %v3207_v30  ;;  %v5451_v28 = vrot.slane %v5225_v45, 2 }
 0x265   :  { %v5452_v14 = vrot.slane %v5226_v44, 2  ;;  %v5461_v5 = vrot.slane %v10416_v32, 2  ;;  %v10452_v39 = vmax.f32 %v3122_v8, 0.0  ;;  %v3745_v59 = vmul.f32 %v12346_v19, %v10343_v55  ;;  %v5733_v44 = vld [vmem:[%s10978_s6 + $0x8] sm:$0xff] }
 0x266   :  { %v4684_v16 = vadd.f32 %v4513_v11, %v3744_v51  ;;  %v3219_v10 = vmax.f32 %v10426_v56, 0.0  ;;  %v10458_v37 = vmul.f32 %v4192_v4, %v10442_v6  ;;  %3707 = vperm.xlu1 %5919, %v3581_v21   ;;  %v5454_v49 = vrot.slane %v5227_v35, 2 }
 0x267   :  { %v5453_v12 = vsel %vm2245_vm1, %v5451_v28, %v5452_v14  ;;  %v4685_v62 = vadd.f32 %v4515_v23, %v3745_v59  ;;  %v10462_v30 = vmul.f32 %v4192_v4, %v10452_v39  ;;  %v5230_v31 = vmul.f32 %v12329_v40, %v3210_v13  ;;  %v5128_v35 = vpop.permute.xlu1 %5127 }
 0x268   :  { %v5624_v18 = vadd.f32 %v5453_v12, %v4684_v16  ;;  %v10467_v55 = vmul.f32 %v4192_v4, %v3219_v10  ;;  %v4516_v48 = vrot.slane %v10391_v29, 1  ;;  %v4517_v63 = vrot.slane %v10395_v20, 1 }
 0x269   :  { %v5455_v1 = vsel %vm2245_vm1, %v5452_v14, %v5454_v49  ;;  %v4519_v8 = vrot.slane %v4290_v17, 1  ;;  %v4291_v11 = vmul.f32 %v10359_v53, %v10373_v36  ;;  %v4292_v40 = vmul.f32 %v10359_v53, %v10376_v7 }
 0x26a   :  { %v5625_v15 = vadd.f32 %v5455_v1, %v4685_v62  ;;  %v5462_v13 = vrot.slane %v10420_v38, 2  ;;  %v5464_v52 = vrot.slane %v10440_v24, 2  ;;  %v4531_v45 = vrot.slane %v10458_v37, 1  ;;  %5723 = vperm.xlu1 %5919, %v5844_v60  }
 0x26b   :  { %v4293_v29 = vmul.f32 %v10359_v53, %v3213_v22  ;;  %v4532_v20 = vrot.slane %v10462_v30, 1  ;;  %v5459_v17 = vrot.slane %v5230_v31, 2  ;;  %v3746_v19 = vmul.f32 %v10380_v58, %v10241_v26 }
 0x26c   :  { %v3747_v38 = vmul.f32 %v10380_v58, %v10244_v33  ;;  %v4534_v24 = vrot.slane %v10467_v55, 1  ;;  %v4521_v51 = vrot.slane %v4291_v11, 1  ;;  %v4522_v23 = vrot.slane %v4292_v40, 1 }
 0x26d   :  { %v4524_v50 = vrot.slane %v4293_v29, 1  ;;  %v4518_v53 = vsel %vm1240_vm0, %v4516_v48, %v4517_v63  ;;  %v4520_v22 = vsel %vm1240_vm0, %v4517_v63, %v4519_v8  ;;  %v5456_v4 = vrot.slane %v10293_v41, 2 }
 0x26e   :  { %v5457_v21 = vrot.slane %v10297_v27, 2  ;;  %5741 = vperm.xlu1 %5919, %v5733_v44   ;;  %v4686_v28 = vadd.f32 %v4518_v53, %v3746_v19  ;;  %v4687_v26 = vadd.f32 %v4520_v22, %v3747_v38  ;;  %v5670_v14 = vadd.f32 %v10399_v47, %v5624_v18  ;;  %v12347_v53 = vld [vmem:[#allocation180_spill] sm:$0xff] }
 0x26f   :  { %v5701_v33 = vadd.f32 %v10401_v9, %v5625_v15  ;;  %v3216_v16 = vmax.f32 %v10406_v61, 0.0  ;;  %v4294_v12 = vmul.f32 %v10428_v0, %v10409_v34  ;;  %v4295_v27 = vmul.f32 %v10428_v0, %v10411_v3 }
 0x270   :  { %v5458_v58 = vsel %vm2245_vm1, %v5456_v4, %v5457_v21  ;;  %v5460_v59 = vsel %vm2245_vm1, %v5457_v21, %v5459_v17  ;;  %v3748_v62 = vmul.f32 %v3660_v57, %v10373_v36  ;;  %v3749_v9 = vmul.f32 %v3660_v57, %v10376_v7  ;;  %v3664_v36 = vpop.permute.xlu1 %3663  ;;  %v12348_v4 = vld [vmem:[#allocation139_spill] sm:$0xff] }
 0x271   :  { %v5626_v41 = vadd.f32 %v5458_v58, %v4686_v28  ;;  %v5627_v49 = vadd.f32 %v5460_v59, %v4687_v26  ;;  %v4296_v47 = vmul.f32 %v10428_v0, %v3216_v16  ;;  %v4526_v31 = vrot.slane %v4294_v12, 1  ;;  %v12349_v28 = vld [vmem:[#allocation217_spill] sm:$0xff]  ;;  %v12352_v12 = vld [vmem:[#allocation206_spill] sm:$0xff] }
 0x272   :  { %v4523_v18 = vsel %vm1240_vm0, %v4521_v51, %v4522_v23  ;;  %v4527_v61 = vrot.slane %v4295_v27, 1  ;;  %v4525_v63 = vsel %vm1240_vm0, %v4522_v23, %v4524_v50  ;;  %v5463_v11 = vsel %vm2245_vm1, %v5461_v5, %v5462_v13 }
 0x273   :  { %v5671_v60 = vadd.f32 %v5670_v14, %v5626_v41  ;;  %v5702_v48 = vadd.f32 %v5701_v33, %v5627_v49  ;;  %v4529_v1 = vrot.slane %v4296_v47, 1  ;;  %v4688_v8 = vadd.f32 %v4523_v18, %v3748_v62  ;;  %v12350_v14 = vld [vmem:[#allocation170_spill] sm:$0xff] }
 0x274   :  { %v4689_v15 = vadd.f32 %v4525_v63, %v3749_v9  ;;  %v5465_v0 = vsel %vm2245_vm1, %v5462_v13, %v5464_v52  ;;  %v5234_v40 = vmul.f32 %v5128_v35, %v10409_v34  ;;  %v5235_v7 = vmul.f32 %v5128_v35, %v10411_v3  ;;  %v5132_v27 = vpop.permute.xlu1 %5131  ;;  %v12353_v9 = vld [vmem:[#allocation207_spill] sm:$0xff] }
 0x275   :  { %v5236_v57 = vmul.f32 %v5128_v35, %v3216_v16  ;;  %v5628_v29 = vadd.f32 %v5463_v11, %v4688_v8  ;;  %v3750_v44 = vmul.f32 %v3664_v36, %v10409_v34  ;;  %v3751_v19 = vmul.f32 %v3664_v36, %v10411_v3  ;;  %v5732_v3 = vld [vmem:[%s10978_s6] sm:$0xff] }
 0x276   :  { %v5629_v17 = vadd.f32 %v5465_v0, %v4689_v15  ;;  %v5466_v38 = vrot.slane %v5234_v40, 2  ;;  %v5467_v51 = vrot.slane %v5235_v7, 2  ;;  %v4528_v32 = vsel %vm1240_vm0, %v4526_v31, %v4527_v61  ;;  %5736 = vperm.xlu0 %5920, %v5732_v3   ;;  %v12358_v11 = vld [vmem:[#allocation184_spill] sm:$0xff]  ;;  %v12363_v3 = vld [vmem:[#allocation33_spill] sm:$0xff] }
 0x277   :  { %v5469_v23 = vrot.slane %v5236_v57, 2  ;;  %v5672_v5 = vadd.f32 %v5671_v60, %v5628_v29  ;;  %v4530_v13 = vsel %vm1240_vm0, %v4527_v61, %v4529_v1  ;;  %v4690_v52 = vadd.f32 %v4528_v32, %v3750_v44  ;;  %v12357_v1 = vld [vmem:[#allocation219_spill] sm:$0xff]  ;;  %v12359_v44 = vld [vmem:[#allocation190_spill] sm:$0xff] }
 0x278   :  { %v5703_v50 = vadd.f32 %v5702_v48, %v5629_v17  ;;  %v2361_v22 = vrot.slane %v12347_v53, 2  ;;  %v1564_v21 = vadd.f32 %v12348_v4, %v10273_v43  ;;  %v4691_v35 = vadd.f32 %v4530_v13, %v3751_v19 }
 0x279   :  { %v5468_v34 = vsel %vm2245_vm1, %v5466_v38, %v5467_v51  ;;  %v2362_v26 = vrot.slane %v12349_v28, 2  ;;  %v12351_v33 = vrot.slane %v12350_v14, 1  ;;  %v5470_v59 = vsel %vm2245_vm1, %v5467_v51, %v5469_v23  ;;  %v4196_v23 = vpop.permute.xlu0 %4195 }
 0x27a   :  { %v5630_v16 = vadd.f32 %v5468_v34, %v4690_v52  ;;  %v2568_v43 = vadd.f32 %v12352_v12, %v10285_v54  ;;  %v4533_v41 = vsel %vm1240_vm0, %v4531_v45, %v4532_v20  ;;  %v4535_v49 = vsel %vm1240_vm0, %v4532_v20, %v4534_v24  ;;  %v12354_v45 = vld [vmem:[#allocation127_spill] sm:$0xff]  ;;  %v12355_v20 = vld [vmem:[#allocation109_spill] sm:$0xff]  ;;  %v12360_v52 = vld [vmem:[#allocation218_spill] sm:$0xff] }
 0x27b   :  { %v1565_v58 = vadd.f32 %v12351_v33, %v10282_v42  ;;  %v5631_v42 = vadd.f32 %v5470_v59, %v4691_v35  ;;  %v5237_v47 = vmul.f32 %v5132_v27, %v10442_v6  ;;  %v5238_v31 = vmul.f32 %v5132_v27, %v10452_v39  ;;  %v12361_v35 = vld [vmem:[#allocation106_spill] sm:$0xff]  ;;  %v12365_v59 = vld [vmem:[#allocation195_spill] sm:$0xff] }
 0x27c   :  { %v5673_v62 = vadd.f32 %v5672_v5, %v5630_v16  ;;  %v5239_v54 = vmul.f32 %v5132_v27, %v3219_v10  ;;  %v2569_v37 = vadd.f32 %v12353_v9, %v1564_v21  ;;  %v3752_v18 = vmul.f32 %v12354_v45, %v10442_v6  ;;  %v5730_v6 = vld [vmem:[%s10977_s5] sm:$0xff] }
 0x27d   :  { %v3753_v30 = vmul.f32 %v12354_v45, %v10452_v39  ;;  %v5704_v55 = vadd.f32 %v5703_v50, %v5631_v42  ;;  %v12356_v24 = vrot.slane %v12355_v20, 2  ;;  %v5471_v48 = vrot.slane %v5237_v47, 2  ;;  %5855 = vmatprep.mubr.msk.f32.mxu0 %vm5744_vm2, %v5730_v6  ;;  %v12366_v12 = vld [vmem:[#allocation179_spill] sm:$0xff]  ;;  %v10620_v45 = vpop.permute.xlu1 %4199 }
 0x27e   :  { %v5472_v61 = vrot.slane %v5238_v31, 2  ;;  %v5474_v63 = vrot.slane %v5239_v54, 2  ;;  %v3124_v8 = vadd.f32 %v12357_v1, %v2568_v43  ;;  %v3125_v56 = vadd.f32 %v12357_v1, %v2569_v37 }
 0x27f   :  { %v2570_v60 = vadd.f32 %v12356_v24, %v1565_v58  ;;  %v4692_v10 = vadd.f32 %v4533_v41, %v3752_v18  ;;  %v4693_v15 = vadd.f32 %v4535_v49, %v3753_v30  ;;  %v10561_v39 = vmul.f32 %v10237_v2, %v12358_v11 }
 0x280   :  { %v5473_v0 = vsel %vm2245_vm1, %v5471_v48, %v5472_v61  ;;  %v5475_v40 = vsel %vm2245_vm1, %v5472_v61, %v5474_v63  ;;  %v10570_v7 = vmul.f32 %v10269_v46, %v12358_v11  ;;  %v10574_v17 = vmul.f32 %v10278_v25, %v12358_v11  ;;  %v12370_v48 = vld [vmem:[#allocation52_spill] sm:$0xff]  ;;  %v12372_v11 = vld [vmem:[#allocation59_spill] sm:$0xff] }
 0x281   :  { %v10564_v36 = vadd.f32 %v12357_v1, %v2570_v60  ;;  %v5632_v57 = vadd.f32 %v5473_v0, %v4692_v10  ;;  %v5633_v29 = vadd.f32 %v5475_v40, %v4693_v15  ;;  %v10578_v19 = vmul.f32 %v10237_v2, %v12359_v44  ;;  %v12371_v1 = vld [vmem:[#allocation69_spill] sm:$0xff]  ;;  %v12417_v63 = vld [vmem:[#allocation19_spill] sm:$0xff] }
 0x282   :  { %v10582_v38 = vmul.f32 %v10269_v46, %v12359_v44  ;;  %v10586_v51 = vmul.f32 %v10278_v25, %v12359_v44  ;;  %v3220_v32 = vmax.f32 %v3124_v8, 0.0  ;;  %v3221_v5 = vmax.f32 %v3125_v56, 0.0 }
 0x283   :  { %v10589_v50 = vadd.f32 %v5673_v62, %v5632_v57  ;;  %v10591_v13 = vadd.f32 %v5704_v55, %v5633_v29  ;;  %v2364_v4 = vrot.slane %v12360_v52, 2  ;;  %v2371_v21 = vrot.slane %v10561_v39, 2  ;;  %v12367_v55 = vld [vmem:[#allocation107_spill] sm:$0xff]  ;;  %v12373_v29 = vld [vmem:[#allocation10_spill] sm:$0xff]  ;;  %v12413_v39 = vld [vmem:[#allocation29_spill] sm:$0xff] }
 0x284   :  { %v12362_v34 = vrot.slane %v12361_v35, 1  ;;  %v12364_v14 = vrot.slane %v12363_v3, 1  ;;  %v3222_v58 = vmax.f32 %v10564_v36, 0.0  ;;  %v10603_v16 = vmul.f32 %v10237_v2, %v12365_v59 }
 0x285   :  { %v564_v43 = vmul.f32 %v10237_v2, %v12366_v12  ;;  %v4300_v41 = vmul.f32 %v4196_v23, %v3220_v32  ;;  %v4301_v49 = vmul.f32 %v4196_v23, %v3221_v5  ;;  %v2372_v42 = vrot.slane %v10570_v7, 2 }
 0x286   :  { %v1358_v33 = vsel %vm1240_vm0, %v12364_v14, %v12362_v34  ;;  %v10610_v27 = vmul.f32 %v10269_v46, %v12365_v59  ;;  %v10614_v62 = vmul.f32 %v10278_v25, %v12365_v59  ;;  %v4302_v47 = vmul.f32 %v4196_v23, %v3222_v58  ;;  %v12374_v23 = vld [vmem:[#allocation36_spill] sm:$0xff] }
 0x287   :  { %v2374_v31 = vrot.slane %v10574_v17, 2  ;;  %v2381_v54 = vrot.slane %v10578_v19, 2  ;;  %v2382_v9 = vrot.slane %v10582_v38, 2  ;;  %v2384_v37 = vrot.slane %v10586_v51, 2  ;;  %v12377_v14 = vld [vmem:[#allocation16_spill] sm:$0xff] }
 0x288   :  { %v565_v18 = vmul.f32 %v10269_v46, %v12366_v12  ;;  %v566_v30 = vmul.f32 %v10278_v25, %v12366_v12  ;;  %v12368_v20 = vrot.slane %v12367_v55, 1  ;;  %v12369_v24 = vmov %v12362_v34  ;;  %v12376_v34 = vld [vmem:[#allocation61_spill] sm:$0xff] }
 0x289   :  { %v1566_v61 = vadd.f32 %v1358_v33, %v12370_v48  ;;  %v1569_v8 = vadd.f32 %v12371_v1, %v564_v43  ;;  %v4536_v56 = vrot.slane %v4300_v41, 1  ;;  %v4537_v10 = vrot.slane %v4301_v49, 1  ;;  %v12379_v41 = vld [vmem:[#allocation78_spill] sm:$0xff]  ;;  %v12381_v48 = vld [vmem:[#allocation161_spill] sm:$0xff] }
 0x28a   :  { %v1360_v60 = vsel %vm1240_vm0, %v12369_v24, %v12368_v20  ;;  %v10638_v36 = vmul.f32 %v10237_v2, %v12372_v11  ;;  %v4539_v0 = vrot.slane %v4302_v47, 1  ;;  %v10642_v40 = vmul.f32 %v10269_v46, %v12372_v11  ;;  %v12380_v47 = vld [vmem:[#allocation216_spill] sm:$0xff] }
 0x28b   :  { %v10646_v57 = vmul.f32 %v10278_v25, %v12372_v11  ;;  %v1567_v44 = vadd.f32 %v1360_v60, %v12373_v29  ;;  %v12375_v52 = vmov %v12368_v20  ;;  %v1570_v3 = vadd.f32 %v12376_v34, %v565_v18  ;;  %v5136_v20 = vpop.permute.xlu1 %5135  ;;  %v12382_v34 = vld [vmem:[#allocation49_spill] sm:$0xff] }
 0x28c   :  { %v1568_v35 = vadd.f32 %v12375_v52, %v12374_v23  ;;  %v12378_v33 = vrot.slane %v12377_v14, 1  ;;  %v2363_v12 = vsel %vm2245_vm1, %v2361_v22, %v2362_v26  ;;  %v2365_v43 = vsel %vm2245_vm1, %v2362_v26, %v2364_v4 }
 0x28d   :  { %v2574_v49 = vadd.f32 %v12379_v41, %v1569_v8  ;;  %v570_v55 = vmul.f32 %v10237_v2, %v12380_v47  ;;  %v571_v18 = vmul.f32 %v10269_v46, %v12380_v47  ;;  %v4540_v24 = vsel %vm1240_vm0, %v4537_v10, %v4539_v0 }
 0x28e   :  { %v1571_v59 = vadd.f32 %v12378_v33, %v566_v30  ;;  %v4538_v30 = vsel %vm1240_vm0, %v4536_v56, %v4537_v10  ;;  %v5240_v53 = vmul.f32 %v5136_v20, %v3220_v32  ;;  %v5241_v60 = vmul.f32 %v5136_v20, %v3221_v5  ;;  %v12383_v33 = vld [vmem:[#allocation73_spill] sm:$0xff] }
 0x28f   :  { %v5242_v22 = vmul.f32 %v5136_v20, %v3222_v58  ;;  %v572_v28 = vmul.f32 %v10278_v25, %v12380_v47  ;;  %v2571_v26 = vadd.f32 %v2363_v12, %v1566_v61  ;;  %v3754_v1 = vmul.f32 %v12381_v48, %v3220_v32  ;;  %v12384_v47 = vld [vmem:[#allocation163_spill] sm:$0xff] }
 0x290   :  { %v3755_v8 = vmul.f32 %v12381_v48, %v3221_v5  ;;  %v2572_v11 = vadd.f32 %v2365_v43, %v1567_v44  ;;  %v5476_v29 = vrot.slane %v5240_v53, 2  ;;  %v5477_v23 = vrot.slane %v5241_v60, 2  ;;  %v12388_v60 = vld [vmem:[#allocation8_spill] sm:$0xff] }
 0x291   :  { %v5479_v52 = vrot.slane %v5242_v22, 2  ;;  %v576_v56 = vmul.f32 %v10237_v2, %v12382_v34  ;;  %v2573_v14 = vadd.f32 %v2364_v4, %v1568_v35  ;;  %v4694_v10 = vadd.f32 %v4538_v30, %v3754_v1  ;;  %v12385_v4 = vld [vmem:[#allocation208_spill] sm:$0xff]  ;;  %v12386_v30 = vld [vmem:[#allocation181_spill] sm:$0xff] }
 0x292   :  { %v4695_v0 = vadd.f32 %v4540_v24, %v3755_v8  ;;  %v3127_v58 = vadd.f32 %v12383_v33, %v2571_v26  ;;  %v3128_v41 = vadd.f32 %v12383_v33, %v2572_v11  ;;  %v5478_v61 = vsel %vm2245_vm1, %v5476_v29, %v5477_v23  ;;  %v12389_v26 = vld [vmem:[#allocation101_spill] sm:$0xff]  ;;  %v12390_v29 = vld [vmem:[#allocation86_spill] sm:$0xff] }
 0x293   :  { %v5480_v32 = vsel %vm2245_vm1, %v5477_v23, %v5479_v52  ;;  %v577_v5 = vmul.f32 %v10269_v46, %v12382_v34  ;;  %v3129_v44 = vadd.f32 %v12383_v33, %v2573_v14  ;;  %v5634_v12 = vadd.f32 %v5478_v61, %v4694_v10  ;;  %v12393_v10 = vld [vmem:[#allocation15_spill] sm:$0xff]  ;;  %v12394_v33 = vld [vmem:[#allocation20_spill] sm:$0xff]  ;;  %v12395_v61 = vld [vmem:[#allocation209_spill] sm:$0xff] }
 0x294   :  { %v5635_v43 = vadd.f32 %v5480_v32, %v4695_v0  ;;  %v1575_v20 = vadd.f32 %v12384_v47, %v570_v55  ;;  %v1576_v35 = vadd.f32 %v12385_v4, %v571_v18  ;;  %v12387_v24 = vrot.slane %v12386_v30, 1  ;;  %v12400_v30 = vld [vmem:[#allocation210_spill] sm:$0xff] }
 0x295   :  { %v3130_v22 = vadd.f32 %v12388_v60, %v2574_v49  ;;  %v2575_v48 = vadd.f32 %v12389_v26, %v1570_v3  ;;  %v578_v1 = vmul.f32 %v10278_v25, %v12382_v34  ;;  %v10692_v8 = vadd.f32 %v10589_v50, %v5634_v12  ;;  %v12402_v26 = vld [vmem:[#allocation211_spill] sm:$0xff] }
 0x296   :  { %v1577_v53 = vadd.f32 %v12387_v24, %v572_v28  ;;  %v10695_v11 = vadd.f32 %v10591_v13, %v5635_v43  ;;  %v1581_v18 = vadd.f32 %v12390_v29, %v576_v56  ;;  %v3223_v23 = vmax.f32 %v3127_v58, 0.0  ;;  %v12391_v28 = vld [vmem:[#allocation172_spill] sm:$0xff]  ;;  %v12396_v13 = vld [vmem:[#allocation177_spill] sm:$0xff]  ;;  %v12398_v56 = vld [vmem:[#allocation187_spill] sm:$0xff] }
 0x297   :  { %v3224_v52 = vmax.f32 %v3128_v41, 0.0  ;;  %v12392_v14 = vrot.slane %v12391_v28, 2  ;;  %v1582_v3 = vadd.f32 %v12393_v10, %v577_v5  ;;  %v3131_v0 = vadd.f32 %v12388_v60, %v2575_v48  ;;  %v12401_v24 = vld [vmem:[#allocation182_spill] sm:$0xff] }
 0x298   :  { %v3225_v34 = vmax.f32 %v3129_v44, 0.0  ;;  %v2580_v50 = vadd.f32 %v12394_v33, %v1575_v20  ;;  %v2581_v32 = vadd.f32 %v12395_v61, %v1576_v35  ;;  %v12397_v12 = vrot.slane %v12396_v13, 2  ;;  %v4204_v44 = vpop.permute.xlu1 %4203  ;;  %v12403_v28 = vld [vmem:[#allocation110_spill] sm:$0xff] }
 0x299   :  { %v2576_v49 = vadd.f32 %v12392_v14, %v1571_v59  ;;  %v10707_v47 = vmax.f32 %v3130_v22, 0.0  ;;  %v12399_v58 = vrot.slane %v12398_v56, 1  ;;  %v4303_v59 = vmul.f32 %v10620_v45, %v3223_v23  ;;  %v12407_v33 = vld [vmem:[#allocation186_spill] sm:$0xff] }
 0x29a   :  { %v2582_v43 = vadd.f32 %v12397_v12, %v1577_v53  ;;  %v4304_v5 = vmul.f32 %v10620_v45, %v3224_v52  ;;  %v4305_v4 = vmul.f32 %v10620_v45, %v3225_v34  ;;  %v10717_v20 = vadd.f32 %v12400_v30, %v1581_v18  ;;  %v12405_v45 = vld [vmem:[#allocation37_spill] sm:$0xff] }
 0x29b   :  { %v10711_v41 = vadd.f32 %v12399_v58, %v578_v1  ;;  %v3132_v35 = vadd.f32 %v12388_v60, %v2576_v49  ;;  %v5243_v53 = vmul.f32 %v12401_v24, %v3223_v23  ;;  %v5244_v22 = vmul.f32 %v12401_v24, %v3224_v52  ;;  %v12408_v49 = vld [vmem:[#allocation96_spill] sm:$0xff] }
 0x29c   :  { %v10723_v48 = vadd.f32 %v12402_v26, %v1582_v3  ;;  %v10725_v1 = vmax.f32 %v3131_v0, 0.0  ;;  %v5245_v29 = vmul.f32 %v12401_v24, %v3225_v34  ;;  %v12404_v14 = vrot.slane %v12403_v28, 1  ;;  %v12409_v0 = vld [vmem:[#allocation111_spill] sm:$0xff] }
 0x29d   :  { %v12406_v10 = vrot.slane %v12405_v45, 1  ;;  %v10735_v60 = vmul.f32 %v12407_v33, %v10707_v47  ;;  %v10739_v61 = vmul.f32 %v10237_v2, %v12408_v49  ;;  %v10743_v3 = vmul.f32 %v10269_v46, %v12408_v49 }
 0x29e   :  { %v12410_v34 = vrot.slane %v12409_v0, 1  ;;  %v12411_v13 = vmov %v12404_v14  ;;  %v2373_v56 = vsel %vm2245_vm1, %v2371_v21, %v2372_v42  ;;  %v4541_v58 = vrot.slane %v4303_v59, 1  ;;  %v12414_v59 = vld [vmem:[#allocation38_spill] sm:$0xff] }
 0x29f   :  { %v1368_v18 = vsel %vm1240_vm0, %v12406_v10, %v12404_v14  ;;  %v4542_v30 = vrot.slane %v4304_v5, 1  ;;  %v4544_v2 = vrot.slane %v4305_v4, 1  ;;  %v5481_v24 = vrot.slane %v5243_v53, 2  ;;  %v12412_v14 = vld [vmem:[#allocation46_spill] sm:$0xff]  ;;  %v3676_v4 = vpop.permute.xlu1 %3675  ;;  %v12415_v53 = vld [vmem:[#allocation11_spill] sm:$0xff] }
 0x2a0   :  { %v1370_v12 = vsel %vm1240_vm0, %v12411_v13, %v12410_v34  ;;  %v5482_v26 = vrot.slane %v5244_v22, 2  ;;  %v1572_v46 = vadd.f32 %v1368_v18, %v12412_v14  ;;  %v2375_v28 = vsel %vm2245_vm1, %v2372_v42, %v2374_v31 }
 0x2a1   :  { %v10763_v45 = vmul.f32 %v12407_v33, %v10725_v1  ;;  %v10766_v10 = vadd.f32 %v12413_v39, %v2580_v50  ;;  %v5484_v21 = vrot.slane %v5245_v29, 2  ;;  %v1573_v5 = vadd.f32 %v1370_v12, %v12414_v59 }
 0x2a2   :  { %v12416_v22 = vmov %v12410_v34  ;;  %v2577_v34 = vadd.f32 %v2373_v56, %v1572_v46  ;;  %v3756_v13 = vmul.f32 %v3676_v4, %v3223_v23  ;;  %v3757_v7 = vmul.f32 %v3676_v4, %v3224_v52  ;;  %v12420_v46 = vld [vmem:[#allocation39_spill] sm:$0xff] }
 0x2a3   :  { %v1574_v18 = vadd.f32 %v12416_v22, %v12415_v53  ;;  %v2578_v14 = vadd.f32 %v2375_v28, %v1573_v5  ;;  %v3228_v42 = vmax.f32 %v3132_v35, 0.0  ;;  %v4543_v55 = vsel %vm1240_vm0, %v4541_v58, %v4542_v30  ;;  %v12422_v5 = vld [vmem:[#allocation114_spill] sm:$0xff] }
 0x2a4   :  { %v4545_v6 = vsel %vm1240_vm0, %v4542_v30, %v4544_v2  ;;  %v3133_v50 = vadd.f32 %v12417_v63, %v2577_v34  ;;  %v4696_v15 = vadd.f32 %v4543_v55, %v3756_v13  ;;  %v5483_v12 = vsel %vm2245_vm1, %v5481_v24, %v5482_v26  ;;  %v4208_v30 = vpop.permute.xlu1 %4207  ;;  %v12418_v2 = vld [vmem:[#allocation113_spill] sm:$0xff] }
 0x2a5   :  { %v4697_v29 = vadd.f32 %v4545_v6, %v3757_v7  ;;  %v4306_v59 = vmul.f32 %v4204_v44, %v10707_v47  ;;  %v4307_v0 = vmul.f32 %v4204_v44, %v10725_v1  ;;  %v4308_v53 = vmul.f32 %v4204_v44, %v3228_v42  ;;  %v12426_v7 = vld [vmem:[#allocation117_spill] sm:$0xff] }
 0x2a6   :  { %v5485_v23 = vsel %vm2245_vm1, %v5482_v26, %v5484_v21  ;;  %v2579_v52 = vadd.f32 %v2374_v31, %v1574_v18  ;;  %v3134_v35 = vadd.f32 %v12417_v63, %v2578_v14  ;;  %v5636_v56 = vadd.f32 %v5483_v12, %v4696_v15 }
 0x2a7   :  { %v5637_v58 = vadd.f32 %v5485_v23, %v4697_v29  ;;  %v3137_v55 = vadd.f32 %v12413_v39, %v2581_v32  ;;  %v10784_v6 = vadd.f32 %v12413_v39, %v2582_v43  ;;  %v12419_v24 = vrot.slane %v12418_v2, 1 }
 0x2a8   :  { %v12421_v28 = vrot.slane %v12420_v46, 1  ;;  %v5248_v26 = vmul.f32 %v12407_v33, %v3228_v42  ;;  %v3135_v17 = vadd.f32 %v12417_v63, %v2579_v52  ;;  %v3229_v31 = vmax.f32 %v3133_v50, 0.0  ;;  %v12425_v33 = vld [vmem:[#allocation40_spill] sm:$0xff]  ;;  %v3680_v19 = vpop.permute.xlu1 %3679 }
 0x2a9   :  { %v5676_v15 = vadd.f32 %v10692_v8, %v5636_v56  ;;  %v5707_v21 = vadd.f32 %v10695_v11, %v5637_v58  ;;  %v12423_v32 = vrot.slane %v12422_v5, 1  ;;  %v12424_v43 = vmov %v12419_v24  ;;  %v4212_v58 = vpop.permute.xlu0 %4211 }
 0x2aa   :  { %v1378_v44 = vsel %vm1240_vm0, %v12421_v28, %v12419_v24  ;;  %v4546_v4 = vrot.slane %v4306_v59, 1  ;;  %v4547_v22 = vrot.slane %v4307_v0, 1  ;;  %v4549_v18 = vrot.slane %v4308_v53, 1 }
 0x2ab   :  { %v1380_v39 = vsel %vm1240_vm0, %v12424_v43, %v12423_v32  ;;  %v3230_v34 = vmax.f32 %v3134_v35, 0.0  ;;  %v2383_v63 = vsel %vm2245_vm1, %v2381_v54, %v2382_v9  ;;  %v5486_v8 = vrot.slane %v10735_v60, 2  ;;  %v12428_v54 = vld [vmem:[#allocation12_spill] sm:$0xff] }
 0x2ac   :  { %v5487_v11 = vrot.slane %v10763_v45, 2  ;;  %v1578_v13 = vadd.f32 %v1378_v44, %v12425_v33  ;;  %v12427_v14 = vmov %v12423_v32  ;;  %v2385_v50 = vsel %vm2245_vm1, %v2382_v9, %v2384_v37  ;;  %v5148_v44 = vpop.permute.xlu1 %5147 }
 0x2ad   :  { %v1580_v42 = vadd.f32 %v12427_v14, %v12426_v7  ;;  %v5489_v29 = vrot.slane %v5248_v26, 2  ;;  %v3231_v12 = vmax.f32 %v3135_v17, 0.0  ;;  %v1579_v59 = vadd.f32 %v1380_v39, %v12428_v54 }
 0x2ae   :  { %v3758_v60 = vmul.f32 %v3680_v19, %v10707_v47  ;;  %v3759_v45 = vmul.f32 %v3680_v19, %v10725_v1  ;;  %v2583_v0 = vadd.f32 %v2383_v63, %v1578_v13  ;;  %v4548_v23 = vsel %vm1240_vm0, %v4546_v4, %v4547_v22 }
 0x2af   :  { %v2585_v53 = vadd.f32 %v2384_v37, %v1580_v42  ;;  %v4550_v52 = vsel %vm1240_vm0, %v4547_v22, %v4549_v18  ;;  %v2584_v38 = vadd.f32 %v2385_v50, %v1579_v59  ;;  %v5488_v56 = vsel %vm2245_vm1, %v5486_v8, %v5487_v11 }
 0x2b0   :  { %v4698_v35 = vadd.f32 %v4548_v23, %v3758_v60  ;;  %v4699_v9 = vadd.f32 %v4550_v52, %v3759_v45  ;;  %v4309_v2 = vmul.f32 %v4208_v30, %v3229_v31  ;;  %v4310_v24 = vmul.f32 %v4208_v30, %v3230_v34 }
 0x2b1   :  { %v4311_v46 = vmul.f32 %v4208_v30, %v3231_v12  ;;  %v5490_v47 = vsel %vm2245_vm1, %v5487_v11, %v5489_v29  ;;  %v3232_v1 = vmax.f32 %v10766_v10, 0.0  ;;  %v3233_v28 = vmax.f32 %v3137_v55, 0.0  ;;  %v12429_v11 = vld [vmem:[#allocation183_spill] sm:$0xff]  ;;  %v3684_v50 = vpop.permute.xlu1 %3683 }
 0x2b2   :  { %v5638_v51 = vadd.f32 %v5488_v56, %v4698_v35  ;;  %v5639_v37 = vadd.f32 %v5490_v47, %v4699_v9  ;;  %v3234_v26 = vmax.f32 %v10784_v6, 0.0  ;;  %v5249_v17 = vmul.f32 %v5148_v44, %v3229_v31  ;;  %v12431_v6 = vld [vmem:[#allocation194_spill] sm:$0xff]  ;;  %v4216_v9 = vpop.permute.xlu0 %4215 }
 0x2b3   :  { %v5250_v5 = vmul.f32 %v5148_v44, %v3230_v34  ;;  %v5251_v32 = vmul.f32 %v5148_v44, %v3231_v12  ;;  %v4312_v43 = vmul.f32 %v4212_v58, %v3232_v1  ;;  %v4313_v39 = vmul.f32 %v4212_v58, %v3233_v28 }
 0x2b4   :  { %v5677_v4 = vadd.f32 %v5676_v15, %v5638_v51  ;;  %v5708_v22 = vadd.f32 %v5707_v21, %v5639_v37  ;;  %v4314_v18 = vmul.f32 %v4212_v58, %v3234_v26  ;;  %v4551_v63 = vrot.slane %v4309_v2, 1 }
 0x2b5   :  { %v4552_v30 = vrot.slane %v4310_v24, 1  ;;  %v4554_v8 = vrot.slane %v4311_v46, 1  ;;  %v12430_v10 = vrot.slane %v12429_v11, 2  ;;  %v10832_v33 = vmul.f32 %v10278_v25, %v12408_v49  ;;  %v12435_v11 = vld [vmem:[#allocation71_spill] sm:$0xff] }
 0x2b6   :  { %v3139_v13 = vadd.f32 %v12431_v6, %v2583_v0  ;;  %v10836_v7 = vadd.f32 %v12431_v6, %v2585_v53  ;;  %v3140_v15 = vadd.f32 %v12431_v6, %v2584_v38  ;;  %v5491_v21 = vrot.slane %v5249_v17, 2  ;;  %v12433_v38 = vld [vmem:[#allocation41_spill] sm:$0xff]  ;;  %v5152_v24 = vpop.permute.xlu1 %5151 }
 0x2b7   :  { %v2588_v55 = vadd.f32 %v12430_v10, %v10711_v41  ;;  %v5492_v14 = vrot.slane %v5250_v5, 2  ;;  %v5494_v42 = vrot.slane %v5251_v32, 2  ;;  %v4556_v29 = vrot.slane %v4312_v43, 1  ;;  %v12432_v41 = vld [vmem:[#allocation212_spill] sm:$0xff] }
 0x2b8   :  { %v4557_v19 = vrot.slane %v4313_v39, 1  ;;  %v3760_v12 = vmul.f32 %v3684_v50, %v3229_v31  ;;  %v3761_v54 = vmul.f32 %v3684_v50, %v3230_v34  ;;  %v10841_v59 = vadd.f32 %v12432_v41, %v10739_v61  ;;  %v10867_v50 = vpop.permute.xlu0 %4231 }
 0x2b9   :  { %v4559_v25 = vrot.slane %v4314_v18, 1  ;;  %v4553_v49 = vsel %vm1240_vm0, %v4551_v63, %v4552_v30  ;;  %v4555_v60 = vsel %vm1240_vm0, %v4552_v30, %v4554_v8  ;;  %v3235_v45 = vmax.f32 %v3139_v13, 0.0  ;;  %v12434_v30 = vld [vmem:[#allocation213_spill] sm:$0xff] }
 0x2ba   :  { %v3237_v0 = vmax.f32 %v10836_v7, 0.0  ;;  %v4700_v53 = vadd.f32 %v4553_v49, %v3760_v12  ;;  %v4701_v23 = vadd.f32 %v4555_v60, %v3761_v54  ;;  %v3236_v52 = vmax.f32 %v3140_v15, 0.0 }
 0x2bb   :  { %v3762_v35 = vmul.f32 %v12433_v38, %v3232_v1  ;;  %v5493_v31 = vsel %vm2245_vm1, %v5491_v21, %v5492_v14  ;;  %v5495_v34 = vsel %vm2245_vm1, %v5492_v14, %v5494_v42  ;;  %v3763_v61 = vmul.f32 %v12433_v38, %v3233_v28 }
 0x2bc   :  { %v4558_v56 = vsel %vm1240_vm0, %v4556_v29, %v4557_v19  ;;  %v5640_v58 = vadd.f32 %v5493_v31, %v4700_v53  ;;  %v5641_v2 = vadd.f32 %v5495_v34, %v4701_v23  ;;  %v4560_v46 = vsel %vm1240_vm0, %v4557_v19, %v4559_v25  ;;  %v12445_v23 = vld [vmem:[#allocation45_spill] sm:$0xff] }
 0x2bd   :  { %v5252_v47 = vmul.f32 %v5152_v24, %v3232_v1  ;;  %v5253_v51 = vmul.f32 %v5152_v24, %v3233_v28  ;;  %v5254_v37 = vmul.f32 %v5152_v24, %v3234_v26  ;;  %v4315_v44 = vmul.f32 %v4216_v9, %v3235_v45  ;;  %v12436_v28 = vld [vmem:[#allocation58_spill] sm:$0xff] }
 0x2be   :  { %v4316_v17 = vmul.f32 %v4216_v9, %v3236_v52  ;;  %v5678_v5 = vadd.f32 %v5677_v4, %v5640_v58  ;;  %v5709_v32 = vadd.f32 %v5708_v22, %v5641_v2  ;;  %v4317_v43 = vmul.f32 %v4216_v9, %v3237_v0  ;;  %v12438_v4 = vld [vmem:[#allocation42_spill] sm:$0xff] }
 0x2bf   :  { %v5496_v39 = vrot.slane %v5252_v47, 2  ;;  %v5497_v18 = vrot.slane %v5253_v51, 2  ;;  %v5499_v63 = vrot.slane %v5254_v37, 2  ;;  %v10854_v8 = vadd.f32 %v12434_v30, %v10743_v3  ;;  %v4220_v3 = vpop.permute.xlu1 %4219  ;;  %v12452_v51 = vld [vmem:[#allocation47_spill] sm:$0xff] }
 0x2c0   :  { %v3142_v10 = vadd.f32 %v12435_v11, %v10717_v20  ;;  %v4702_v6 = vadd.f32 %v4558_v56, %v3762_v35  ;;  %v4703_v13 = vadd.f32 %v4560_v46, %v3763_v61  ;;  %v3143_v1 = vadd.f32 %v12435_v11, %v10723_v48  ;;  %v12440_v48 = vld [vmem:[#allocation116_spill] sm:$0xff]  ;;  %v12446_v35 = vld [vmem:[#allocation118_spill] sm:$0xff]  ;;  %v12448_v61 = vld [vmem:[#allocation191_spill] sm:$0xff] }
 0x2c1   :  { %v12437_v26 = vrot.slane %v12436_v28, 1  ;;  %v12439_v22 = vrot.slane %v12438_v4, 1  ;;  %v5498_v15 = vsel %vm2245_vm1, %v5496_v39, %v5497_v18  ;;  %v5500_v21 = vsel %vm2245_vm1, %v5497_v18, %v5499_v63 }
 0x2c2   :  { %v4561_v14 = vrot.slane %v4315_v44, 1  ;;  %v4562_v42 = vrot.slane %v4316_v17, 1  ;;  %v5642_v20 = vadd.f32 %v5498_v15, %v4702_v6  ;;  %v5643_v29 = vadd.f32 %v5500_v21, %v4703_v13  ;;  %v5160_v6 = vpop.permute.xlu0 %5159 }
 0x2c3   :  { %v1388_v7 = vsel %vm1240_vm0, %v12439_v22, %v12437_v26  ;;  %v3144_v19 = vadd.f32 %v12435_v11, %v2588_v55  ;;  %v12441_v12 = vrot.slane %v12440_v48, 1  ;;  %v12442_v54 = vmov %v12437_v26  ;;  %v12454_v11 = vld [vmem:[#allocation149_spill] sm:$0xff] }
 0x2c4   :  { %v12443_v25 = vrot.slane %v10610_v27, 2  ;;  %v12444_v49 = vrot.slane %v10603_v16, 2  ;;  %v4564_v53 = vrot.slane %v4317_v43, 1  ;;  %v1584_v38 = vadd.f32 %v1388_v7, %v12445_v23 }
 0x2c5   :  { %v1390_v41 = vsel %vm1240_vm0, %v12442_v54, %v12441_v12  ;;  %v12447_v9 = vmov %v12441_v12  ;;  %v5679_v55 = vadd.f32 %v5678_v5, %v5642_v20  ;;  %v5710_v34 = vadd.f32 %v5709_v32, %v5643_v29  ;;  %v5156_v32 = vpop.permute.xlu1 %5155  ;;  %v12456_v12 = vld [vmem:[#allocation94_spill] sm:$0xff] }
 0x2c6   :  { %v2393_v60 = vsel %vm2245_vm1, %v12444_v49, %v12443_v25  ;;  %v1586_v31 = vadd.f32 %v12447_v9, %v12446_v35  ;;  %v12449_v56 = vrot.slane %v12448_v61, 1  ;;  %v3238_v2 = vmax.f32 %v3142_v10, 0.0 }
 0x2c7   :  { %v3239_v24 = vmax.f32 %v3143_v1, 0.0  ;;  %v12450_v46 = vrot.slane %v10614_v62, 2  ;;  %v12451_v16 = vmov %v12443_v25  ;;  %v1585_v37 = vadd.f32 %v1390_v41, %v12452_v51 }
 0x2c8   :  { %v1589_v58 = vadd.f32 %v12449_v56, %v10832_v33  ;;  %v2589_v44 = vadd.f32 %v2393_v60, %v1584_v38  ;;  %v4563_v5 = vsel %vm1240_vm0, %v4561_v14, %v4562_v42  ;;  %v4565_v39 = vsel %vm1240_vm0, %v4562_v42, %v4564_v53  ;;  %v12458_v56 = vld [vmem:[#allocation189_spill] sm:$0xff] }
 0x2c9   :  { %v2395_v47 = vsel %vm2245_vm1, %v12451_v16, %v12450_v46  ;;  %v12453_v17 = vmov %v12450_v46  ;;  %v5255_v33 = vmul.f32 %v5156_v32, %v3235_v45  ;;  %v5256_v18 = vmul.f32 %v5156_v32, %v3236_v52  ;;  %v4224_v20 = vpop.permute.xlu1 %4223 }
 0x2ca   :  { %v2591_v43 = vadd.f32 %v12453_v17, %v1586_v31  ;;  %v5257_v63 = vmul.f32 %v5156_v32, %v3237_v0  ;;  %v2590_v30 = vadd.f32 %v2395_v47, %v1585_v37  ;;  %v3764_v10 = vmul.f32 %v12454_v11, %v3235_v45  ;;  %v12455_v45 = vld [vmem:[#allocation214_spill] sm:$0xff]  ;;  %v12457_v31 = vld [vmem:[#allocation215_spill] sm:$0xff] }
 0x2cb   :  { %v3765_v27 = vmul.f32 %v12454_v11, %v3236_v52  ;;  %v3240_v13 = vmax.f32 %v3144_v19, 0.0  ;;  %v4318_v1 = vmul.f32 %v4220_v3, %v3238_v2  ;;  %v5501_v28 = vrot.slane %v5255_v33, 2  ;;  %v12460_v47 = vld [vmem:[#allocation43_spill] sm:$0xff] }
 0x2cc   :  { %v5502_v26 = vrot.slane %v5256_v18, 2  ;;  %v5504_v62 = vrot.slane %v5257_v63, 2  ;;  %v4704_v4 = vadd.f32 %v4563_v5, %v3764_v10  ;;  %v4319_v7 = vmul.f32 %v4220_v3, %v3239_v24  ;;  %v5164_v18 = vpop.permute.xlu0 %5163  ;;  %v12465_v63 = vld [vmem:[#allocation13_spill] sm:$0xff] }
 0x2cd   :  { %v4705_v22 = vadd.f32 %v4565_v39, %v3765_v27  ;;  %v4320_v15 = vmul.f32 %v4220_v3, %v3240_v13  ;;  %v5258_v21 = vmul.f32 %v5160_v6, %v3238_v2  ;;  %v5259_v14 = vmul.f32 %v5160_v6, %v3239_v24 }
 0x2ce   :  { %v5503_v42 = vsel %vm2245_vm1, %v5501_v28, %v5502_v26  ;;  %v5505_v0 = vsel %vm2245_vm1, %v5502_v26, %v5504_v62  ;;  %v2592_v52 = vadd.f32 %v12455_v45, %v10841_v59  ;;  %v5260_v29 = vmul.f32 %v5160_v6, %v3240_v13  ;;  %v12469_v45 = vld [vmem:[#allocation51_spill] sm:$0xff] }
 0x2cf   :  { %v5644_v19 = vadd.f32 %v5503_v42, %v4704_v4  ;;  %v5645_v48 = vadd.f32 %v5505_v0, %v4705_v22  ;;  %v3145_v54 = vadd.f32 %v12456_v12, %v2589_v44  ;;  %v3146_v41 = vadd.f32 %v12456_v12, %v2590_v30  ;;  %v3696_v44 = vpop.permute.xlu1 %3695 }
 0x2d0   :  { %v3147_v25 = vadd.f32 %v12456_v12, %v2591_v43  ;;  %v4566_v3 = vrot.slane %v4318_v1, 1  ;;  %v4567_v49 = vrot.slane %v4319_v7, 1  ;;  %v4569_v60 = vrot.slane %v4320_v15, 1  ;;  %v12461_v43 = vld [vmem:[#allocation119_spill] sm:$0xff] }
 0x2d1   :  { %v5680_v53 = vadd.f32 %v5679_v55, %v5644_v19  ;;  %v5711_v23 = vadd.f32 %v5710_v34, %v5645_v48  ;;  %v2402_v38 = vrot.slane %v10642_v40, 2  ;;  %v2404_v35 = vrot.slane %v10646_v57, 2  ;;  %v12463_v34 = vld [vmem:[#allocation48_spill] sm:$0xff]  ;;  %v12470_v48 = vld [vmem:[#allocation123_spill] sm:$0xff] }
 0x2d2   :  { %v5506_v9 = vrot.slane %v5258_v21, 2  ;;  %v5507_v59 = vrot.slane %v5259_v14, 2  ;;  %v2593_v61 = vadd.f32 %v12457_v31, %v10854_v8  ;;  %v12459_v46 = vrot.slane %v12458_v56, 2 }
 0x2d3   :  { %v3148_v51 = vadd.f32 %v12460_v47, %v2592_v52  ;;  %v5509_v37 = vrot.slane %v5260_v29, 2  ;;  %v3241_v17 = vmax.f32 %v3145_v54, 0.0  ;;  %v12462_v55 = vrot.slane %v12461_v43, 1  ;;  %v4228_v7 = vpop.permute.xlu1 %4227 }
 0x2d4   :  { %v2594_v16 = vadd.f32 %v12459_v46, %v1589_v58  ;;  %v12464_v5 = vrot.slane %v12463_v34, 1  ;;  %v3766_v57 = vmul.f32 %v3696_v44, %v3238_v2  ;;  %v3767_v32 = vmul.f32 %v3696_v44, %v3239_v24 }
 0x2d5   :  { %v3242_v39 = vmax.f32 %v3146_v41, 0.0  ;;  %v3243_v33 = vmax.f32 %v3147_v25, 0.0  ;;  %v4568_v8 = vsel %vm1240_vm0, %v4566_v3, %v4567_v49  ;;  %v4570_v58 = vsel %vm1240_vm0, %v4567_v49, %v4569_v60  ;;  %v12471_v3 = vld [vmem:[#allocation56_spill] sm:$0xff] }
 0x2d6   :  { %v1398_v40 = vsel %vm1240_vm0, %v12464_v5, %v12462_v55  ;;  %v12466_v30 = vrot.slane %v12465_v63, 1  ;;  %v12467_v11 = vmov %v12462_v55  ;;  %v4706_v27 = vadd.f32 %v4568_v8, %v3766_v57 }
 0x2d7   :  { %v4707_v6 = vadd.f32 %v4570_v58, %v3767_v32  ;;  %v5508_v13 = vsel %vm2245_vm1, %v5506_v9, %v5507_v59  ;;  %v4321_v1 = vmul.f32 %v4224_v20, %v3241_v17  ;;  %v4322_v2 = vmul.f32 %v4224_v20, %v3242_v39 }
 0x2d8   :  { %v1400_v10 = vsel %vm1240_vm0, %v12467_v11, %v12466_v30  ;;  %v4323_v24 = vmul.f32 %v4224_v20, %v3243_v33  ;;  %v5510_v28 = vsel %vm2245_vm1, %v5507_v59, %v5509_v37  ;;  %v5261_v26 = vmul.f32 %v5164_v18, %v3241_v17 }
 0x2d9   :  { %v5262_v62 = vmul.f32 %v5164_v18, %v3242_v39  ;;  %v5646_v4 = vadd.f32 %v5508_v13, %v4706_v27  ;;  %v5647_v22 = vadd.f32 %v5510_v28, %v4707_v6  ;;  %v3149_v15 = vadd.f32 %v12460_v47, %v2593_v61 }
 0x2da   :  { %v3150_v21 = vadd.f32 %v12460_v47, %v2594_v16  ;;  %v12468_v14 = vrot.slane %v10638_v36, 2  ;;  %v5263_v0 = vmul.f32 %v5164_v18, %v3243_v33  ;;  %v1590_v52 = vadd.f32 %v1398_v40, %v12469_v45  ;;  %v3700_v16 = vpop.permute.xlu1 %3699 }
 0x2db   :  { %v2405_v20 = vsel %vm2245_vm1, %v2402_v38, %v2404_v35  ;;  %v5681_v29 = vadd.f32 %v5680_v53, %v5646_v4  ;;  %v5712_v19 = vadd.f32 %v5711_v23, %v5647_v22  ;;  %v1591_v12 = vadd.f32 %v1400_v10, %v12470_v48  ;;  %v12473_v53 = vld [vmem:[#allocation200_spill] sm:$0xff] }
 0x2dc   :  { %v2403_v42 = vsel %vm2245_vm1, %v12468_v14, %v2402_v38  ;;  %v4571_v54 = vrot.slane %v4321_v1, 1  ;;  %v4572_v41 = vrot.slane %v4322_v2, 1  ;;  %v4574_v25 = vrot.slane %v4323_v24, 1  ;;  %v5172_v1 = vpop.permute.xlu0 %5171 }
 0x2dd   :  { %v12472_v49 = vmov %v12466_v30  ;;  %v2595_v9 = vadd.f32 %v2403_v42, %v1590_v52  ;;  %v5511_v36 = vrot.slane %v5261_v26, 2  ;;  %v5512_v59 = vrot.slane %v5262_v62, 2 }
 0x2de   :  { %v1592_v60 = vadd.f32 %v12472_v49, %v12471_v3  ;;  %v3244_v31 = vmax.f32 %v3148_v51, 0.0  ;;  %v3245_v61 = vmax.f32 %v3149_v15, 0.0  ;;  %v2596_v56 = vadd.f32 %v2405_v20, %v1591_v12  ;;  %v5168_v8 = vpop.permute.xlu1 %5167 }
 0x2df   :  { %v5514_v46 = vrot.slane %v5263_v0, 2  ;;  %v3151_v23 = vadd.f32 %v12473_v53, %v2595_v9  ;;  %v3768_v47 = vmul.f32 %v3700_v16, %v3241_v17  ;;  %v3769_v37 = vmul.f32 %v3700_v16, %v3242_v39 }
 0x2e0   :  { %v2597_v38 = vadd.f32 %v2404_v35, %v1592_v60  ;;  %v3152_v44 = vadd.f32 %v12473_v53, %v2596_v56  ;;  %v3246_v43 = vmax.f32 %v3150_v21, 0.0  ;;  %v4573_v55 = vsel %vm1240_vm0, %v4571_v54, %v4572_v41 }
 0x2e1   :  { %v4575_v34 = vsel %vm1240_vm0, %v4572_v41, %v4574_v25  ;;  %v4708_v40 = vadd.f32 %v4573_v55, %v3768_v47  ;;  %v5513_v57 = vsel %vm2245_vm1, %v5511_v36, %v5512_v59  ;;  %v4324_v32 = vmul.f32 %v4228_v7, %v3244_v31 }
 0x2e2   :  { %v3153_v5 = vadd.f32 %v12473_v53, %v2597_v38  ;;  %v4709_v51 = vadd.f32 %v4575_v34, %v3769_v37  ;;  %v4325_v33 = vmul.f32 %v4228_v7, %v3245_v61  ;;  %v4326_v35 = vmul.f32 %v4228_v7, %v3246_v43  ;;  %v3704_v21 = vpop.permute.xlu1 %3703 }
 0x2e3   :  { %v5515_v18 = vsel %vm2245_vm1, %v5512_v59, %v5514_v46  ;;  %v5648_v17 = vadd.f32 %v5513_v57, %v4708_v40  ;;  %v5264_v58 = vmul.f32 %v5168_v8, %v3244_v31  ;;  %v5265_v63 = vmul.f32 %v5168_v8, %v3245_v61 }
 0x2e4   :  { %v5649_v39 = vadd.f32 %v5515_v18, %v4709_v51  ;;  %v5266_v30 = vmul.f32 %v5168_v8, %v3246_v43  ;;  %v3247_v11 = vmax.f32 %v3151_v23, 0.0  ;;  %v3248_v10 = vmax.f32 %v3152_v44, 0.0 }
 0x2e5   :  { %v5682_v27 = vadd.f32 %v5681_v29, %v5648_v17  ;;  %v3249_v13 = vmax.f32 %v3153_v5, 0.0  ;;  %v4576_v2 = vrot.slane %v4324_v32, 1  ;;  %v4577_v24 = vrot.slane %v4325_v33, 1 }
 0x2e6   :  { %v5713_v6 = vadd.f32 %v5712_v19, %v5649_v39  ;;  %v4579_v28 = vrot.slane %v4326_v35, 1  ;;  %v4327_v26 = vmul.f32 %v10867_v50, %v3247_v11  ;;  %v4328_v62 = vmul.f32 %v10867_v50, %v3248_v10  ;;  %v3708_v59 = vpop.permute.xlu1 %3707  ;;  %v5731_v35 = vld [vmem:[%s10977_s5 + $0x8] sm:$0xff] }
 0x2e7   :  { %v4329_v4 = vmul.f32 %v10867_v50, %v3249_v13  ;;  %v5516_v22 = vrot.slane %v5264_v58, 2  ;;  %v5517_v7 = vrot.slane %v5265_v63, 2  ;;  %v5519_v15 = vrot.slane %v5266_v30, 2 }
 0x2e8   :  { %v5267_v14 = vmul.f32 %v5172_v1, %v3247_v11  ;;  %v3770_v42 = vmul.f32 %v3704_v21, %v3244_v31  ;;  %v3771_v0 = vmul.f32 %v3704_v21, %v3245_v61  ;;  %v5268_v45 = vmul.f32 %v5172_v1, %v3248_v10 }
 0x2e9   :  { %v5269_v52 = vmul.f32 %v5172_v1, %v3249_v13  ;;  %v4578_v20 = vsel %vm1240_vm0, %v4576_v2, %v4577_v24  ;;  %v4580_v29 = vsel %vm1240_vm0, %v4577_v24, %v4579_v28  ;;  %v4581_v19 = vrot.slane %v4327_v26, 1 }
 0x2ea   :  { %v4710_v48 = vadd.f32 %v4578_v20, %v3770_v42  ;;  %v4711_v12 = vadd.f32 %v4580_v29, %v3771_v0  ;;  %v4582_v54 = vrot.slane %v4328_v62, 1  ;;  %v4584_v41 = vrot.slane %v4329_v4, 1  ;;  %v5724_v5 = vpop.permute.xlu1 %5723 }
 0x2eb   :  { %v5518_v50 = vsel %vm2245_vm1, %v5516_v22, %v5517_v7  ;;  %v5520_v25 = vsel %vm2245_vm1, %v5517_v7, %v5519_v15  ;;  %v5521_v60 = vrot.slane %v5267_v14, 2  ;;  %v5522_v9 = vrot.slane %v5268_v45, 2 }
 0x2ec   :  { %v5650_v3 = vadd.f32 %v5518_v50, %v4710_v48  ;;  %v5651_v49 = vadd.f32 %v5520_v25, %v4711_v12  ;;  %v5524_v36 = vrot.slane %v5269_v52, 2  ;;  %v3772_v31 = vmul.f32 %v3708_v59, %v3247_v11 }
 0x2ed   :  { %v3773_v61 = vmul.f32 %v3708_v59, %v3248_v10  ;;  %v4583_v16 = vsel %vm1240_vm0, %v4581_v19, %v4582_v54  ;;  %v4585_v38 = vsel %vm1240_vm0, %v4582_v54, %v4584_v41  ;;  %v5523_v47 = vsel %vm2245_vm1, %v5521_v60, %v5522_v9 }
 0x2ee   :  { %v5683_v56 = vadd.f32 %v5682_v27, %v5650_v3  ;;  %v5714_v46 = vadd.f32 %v5713_v6, %v5651_v49  ;;  %v4712_v53 = vadd.f32 %v4583_v16, %v3772_v31  ;;  %v5525_v37 = vsel %vm2245_vm1, %v5522_v9, %v5524_v36  ;;  %v5742_v17 = vpop.permute.xlu1 %5741 }
 0x2ef   :  { %v4713_v23 = vadd.f32 %v4585_v38, %v3773_v61 }
 0x2f0   :  { %v5652_v44 = vadd.f32 %v5523_v47, %v4712_v53 }
 0x2f1   :  { %v5653_v43 = vadd.f32 %v5525_v37, %v4713_v23 }
 0x2f2   :  { %v5684_v55 = vadd.f32 %v5683_v56, %v5652_v44 }
 0x2f3   :  { %v5715_v34 = vadd.f32 %v5714_v46, %v5653_v43 }
 0x2f4   :  { %v5726_v40 = vadd.f32 %v5724_v5, %v5684_v55 }
 0x2f5   :  { %v5727_v51 = vadd.f32 %v5724_v5, %v5715_v34  ;;  %v5737_v18 = vpop.permute.xlu0 %5736 }
 0x2f6   :  { %v5728_v57 = vmax.f32 %v5726_v40, 0.0 }
 0x2f7   :  { %v5729_v32 = vmax.f32 %v5727_v51, 0.0 }
 0x2f9   :  { %v5858_v33 = vpack.c.bf16 %v5729_v32, %v5728_v57 }
 0x2fb   :  { %5859 = vmatprep.subr.bf16.mxu0 %v5858_v33 }
 0x2fc   :  { %5861 = vmatpush3.bf16.msra.mxu0 %v5858_v33 }
 0x2ff   :  { %5856 = vmatmul.mubr.msk.f32.vlgmr.msra.gmra.mrb[0].mxu0 %vm5744_vm2, %v5731_v35 }
 0x3d2   :  { %v5857_v39 = vpop.f32.mrb[0].mxu0 }
 0x3d3   :  { %v5823_v8 = vadd.f32 %v5857_v39, %v5742_v17  ;;  %v5817_v58 = vpop.f32.mrb[1].mxu0 }
 0x3d4   :  { %v5818_v63 = vadd.f32 %v5817_v58, %v5737_v18 }
 0x3d5   :  { %5827 = vst [vmem:[#allocation3 + $0x8] sm:$0xff] %v5823_v8 }
 0x3d6   :  { %5826 = vst [vmem:[#allocation3] sm:$0xff] %v5818_v63 }
 0x3d7   :  { %5959 = shalt.err (!%p5956_p4)
}
 0x3d8   :  { %s5960_s16 = scalar_lea.hbm %s10979_s7, 256 }
 0x3d9   :  { %p5961_p5 = scmp.ne.s32.totalorder %s10979_s7, %s5960_s16  ;;  %p5964_p6 = scmp.lt.u32.totalorder %s5960_s16, %s10979_s7 }
 0x3db   :  { %p5966_p7 = pnand %p5964_p6, %p5961_p5 }
 0x3dd   :  { %5969 = shalt.err (!%p5966_p7)
}
 0x3de   :  { %s5977_s21 = smov 128   ;;  %s5978_s22 = smov 8  }
 0x3df   :  { %5839 = dma.vmem_to_hbm [thread:$0]  %s5834_s13, 256, %s10979_s7, [#allocation4], %s5977_s21, %s5977_s21, %s5978_s22  }
 0x3e0   :  { %5970 = dma.done.wait [#allocation4], 256  }
 0x3e1   :  { %5971 = vsyncadd [#allocation4], 4294967040 }
 0x3e2   :  { %5843 = vsyncpa [#allocation4], 1 }

</bundles_post_ra>
